<compile_context>
chip_gen: v7x
topology: tpu7x:2x2x1
jax: 0.10.0
libtpu: 0.0.40
codegen_flags: <defaults>
</compile_context>

<pallas_src>
import functools

import jax
import jax.numpy as jnp
from jax.experimental import pallas as pl
from jax.experimental.pallas import tpu as pltpu


def _conv3x3_acc(src_ref, w_ref, H, W, C):
    """3x3 'valid' conv over a zero-padded (H+2, W+2, C) bf16 source ref.

    Accumulated as 3 MXU matmuls of K = 3C: for each dy, the 3 dx taps are
    concatenated along the lane (channel) axis and contracted against the
    (3C, C) weight slab w_ref[dy].  Returns an (H*W, C) f32 accumulator.
    """
    acc = None
    for dy in range(3):
        p = jnp.concatenate(
            [src_ref[dy:dy + H, dx:dx + W, :] for dx in range(3)],
            axis=-1).reshape(H * W, 3 * C)                       # (H*W, 3C) bf16
        y = jnp.dot(p, w_ref[dy], preferred_element_type=jnp.float32)
        acc = y if acc is None else acc + y
    return acc                                                   # (H*W, C) f32


def _basic_block_kernel(xp_ref, xr_ref, w1_ref, b1_ref, w2_ref, b2_ref,
                        o_ref, y1_ref, *, H, W, C):
    """One batch element per grid step; everything resident in VMEM.

    xp_ref : (H+2, W+2, C) bf16  conv input, spatially zero-padded by 1 (NHWC)
    xr_ref : (H,   W,   C) f32   residual input (unpadded, tile-aligned)
    w*_ref : (3, 3C, C)    bf16  conv weights with BN scale folded, (dy)(dx,cin)(cout)
    b*_ref : (1, C)        f32   folded BN bias
    o_ref  : (H, W, C)     f32   output block
    y1_ref : (H+2, W+2, C) bf16  VMEM scratch: zero-padded conv2 input
    """
    # Zero the scratch every step so its 1-px halo is zero (interior is fully
    # overwritten below).  Done per-step rather than under pl.when(pid == 0):
    # with "parallel" grid semantics each megacore TensorCore has its own
    # scratch copy and only one core would see step 0.
    y1_ref[...] = jnp.zeros_like(y1_ref)

    # ---- Conv1 (3x3, pad=1, BN1 scale folded into w1) + bias + ReLU ----------
    y1 = _conv3x3_acc(xp_ref, w1_ref, H, W, C).reshape(H, W, C)
    y1 = jnp.maximum(y1 + b1_ref[...].reshape(1, 1, C), 0.0)
    # bf16 store into the interior of the halo scratch -> zero-padded conv2 input.
    y1_ref[1:H + 1, 1:W + 1, :] = y1.astype(y1_ref.dtype)

    # ---- Conv2 (3x3, pad=1, BN2 scale folded into w2) + bias + residual + ReLU
    y2 = _conv3x3_acc(y1_ref, w2_ref, H, W, C).reshape(H, W, C)
    out = jnp.maximum(y2 + b2_ref[...].reshape(1, 1, C) + xr_ref[...], 0.0)
    o_ref[...] = out.astype(o_ref.dtype)


def _fold_conv_bn(w, s):
    """(Cout, Cin, 3, 3) f32 weight * per-Cout BN scale -> (3, 3*Cin, Cout) bf16."""
    cout, cin = w.shape[0], w.shape[1]
    ws = w.astype(jnp.float32) * s.astype(jnp.float32)[:, None, None, None]
    # (Cout, Cin, ky, kx) -> (ky, kx, Cin, Cout) -> (ky, kx*Cin, Cout)
    return jnp.transpose(ws, (2, 3, 1, 0)).reshape(3, 3 * cin, cout).astype(jnp.bfloat16)


def basic_block_pallas(x_nchw, w1, s1, b1, w2, s2, b2):
    """x_nchw: (N, C, H, W) float32. Returns (N, C, H, W)."""
    N, C, H, W = x_nchw.shape

    # NCHW -> NHWC (layout glue, not the hot path).
    x_nhwc = jnp.transpose(x_nchw, (0, 2, 3, 1)).astype(jnp.float32)
    # Residual-branch input: unpadded f32 (tile-aligned load in-kernel).
    x_res = x_nhwc
    # Conv-branch input: zero-pad by 1 and pre-cast to bf16 (bf16 MXU operands;
    # halves the per-image input DMA).
    x_pad = jnp.pad(x_nhwc, ((0, 0), (1, 1), (1, 1), (0, 0))).astype(jnp.bfloat16)

    w1_f = _fold_conv_bn(w1, s1)
    w2_f = _fold_conv_bn(w2, s2)
    b1_2d = b1.reshape(1, C).astype(jnp.float32)
    b2_2d = b2.reshape(1, C).astype(jnp.float32)

    kernel = functools.partial(_basic_block_kernel, H=H, W=W, C=C)

    out_nhwc = pl.pallas_call(
        kernel,
        out_shape=jax.ShapeDtypeStruct((N, H, W, C), jnp.float32),
        grid_spec=pltpu.PrefetchScalarGridSpec(
            num_scalar_prefetch=0,
            grid=(N,),
            in_specs=[
                pl.BlockSpec((None, H + 2, W + 2, C), lambda n: (n, 0, 0, 0)),
                pl.BlockSpec((None, H, W, C), lambda n: (n, 0, 0, 0)),
                # Constant index_map: weights/biases are DMA'd once.
                pl.BlockSpec((3, 3 * C, C), lambda n: (0, 0, 0)),
                pl.BlockSpec((1, C), lambda n: (0, 0)),
                pl.BlockSpec((3, 3 * C, C), lambda n: (0, 0, 0)),
                pl.BlockSpec((1, C), lambda n: (0, 0)),
            ],
            out_specs=pl.BlockSpec((None, H, W, C), lambda n: (n, 0, 0, 0)),
            scratch_shapes=[pltpu.VMEM((H + 2, W + 2, C), jnp.bfloat16)],
        ),
        compiler_params=pltpu.CompilerParams(
            dimension_semantics=("parallel",),
            vmem_limit_bytes=32 * 1024 * 1024),
    )(x_pad, x_res, w1_f, b1_2d, w2_f, b2_2d)

    return jnp.transpose(out_nhwc, (0, 3, 1, 2)).astype(x_nchw.dtype)


def _reference(x_nchw, w1, s1, b1, w2, s2, b2):
    """Pure-JAX NCHW reference mirroring the kernel arithmetic: BN scale folded
    into the weights in f32 then cast to bf16, conv operands rounded to bf16,
    f32 accumulation; everything else in f32."""
    f32, bf16 = jnp.float32, jnp.bfloat16

    def conv(x_, w_bf16):
        dn = jax.lax.conv_dimension_numbers(x_.shape, w_bf16.shape,
                                            ("NCHW", "OIHW", "NCHW"))
        return jax.lax.conv_general_dilated(
            x_.astype(bf16).astype(f32), w_bf16.astype(f32),
            (1, 1), ((1, 1), (1, 1)), dimension_numbers=dn,
            precision=jax.lax.Precision.HIGHEST)

    w1s = (w1 * s1[:, None, None, None]).astype(bf16)
    w2s = (w2 * s2[:, None, None, None]).astype(bf16)
    y = conv(x_nchw, w1s)
    y = jnp.maximum(y + b1[None, :, None, None], 0.0)
    y = conv(y, w2s)
    y = y + b2[None, :, None, None]
    return jnp.maximum(y + x_nchw, 0.0)


if __name__ == "__main__":
    # C is a multiple of 128 so channels fill the 128-lane vreg dimension
    # (lane-dense loads/stores, tile-aligned tap concat); in_channel ==
    # out_channel, stride=1, downsample=None as in the instantiated module.
    N, C, H, W = 2, 128, 16, 16
    eps = 1e-5

    key = jax.random.PRNGKey(0)
    keys = jax.random.split(key, 11)

    x = jax.random.normal(keys[0], (N, C, H, W), dtype=jnp.float32)

    # Conv weights, PyTorch layout (Cout, Cin, 3, 3).
    w1 = jax.random.normal(keys[1], (C, C, 3, 3), dtype=jnp.float32) * 0.03
    w2 = jax.random.normal(keys[2], (C, C, 3, 3), dtype=jnp.float32) * 0.03

    # BatchNorm parameters (inference-mode fold).
    g1 = 1.0 + 0.1 * jax.random.normal(keys[3], (C,), dtype=jnp.float32)
    beta1 = 0.1 * jax.random.normal(keys[4], (C,), dtype=jnp.float32)
    m1 = 0.1 * jax.random.normal(keys[5], (C,), dtype=jnp.float32)
    v1 = jnp.abs(jax.random.normal(keys[6], (C,), dtype=jnp.float32)) + 0.5
    g2 = 1.0 + 0.1 * jax.random.normal(keys[7], (C,), dtype=jnp.float32)
    beta2 = 0.1 * jax.random.normal(keys[8], (C,), dtype=jnp.float32)
    m2 = 0.1 * jax.random.normal(keys[9], (C,), dtype=jnp.float32)
    v2 = jnp.abs(jax.random.normal(keys[10], (C,), dtype=jnp.float32)) + 0.5

    s1 = g1 / jnp.sqrt(v1 + eps)
    b1 = beta1 - m1 * s1
    s2 = g2 / jnp.sqrt(v2 + eps)
    b2 = beta2 - m2 * s2

    out = basic_block_pallas(x, w1, s1, b1, w2, s2, b2)
    out = jax.block_until_ready(out)

    ref = _reference(x, w1, s1, b1, w2, s2, b2)
    assert out.shape == (N, C, H, W)
    max_err = float(jnp.max(jnp.abs(out - ref)))
    assert jnp.allclose(out, ref, atol=2e-2, rtol=2e-2), (
        f"mismatch vs reference (max abs err {max_err})")

    print("KERNEL_OK")
</pallas_src>

<mosaic_0001>
module attributes {stable_mosaic.version = 11 : i64} {
  func.func @_basic_block_kernel(%arg0: i32, %arg1: memref<1x18x18x128xbf16, #tpu.memory_space<vmem>>, %arg2: memref<1x16x16x128xf32, #tpu.memory_space<vmem>>, %arg3: memref<3x384x128xbf16, #tpu.memory_space<vmem>>, %arg4: memref<1x128xf32, #tpu.memory_space<vmem>>, %arg5: memref<3x384x128xbf16, #tpu.memory_space<vmem>>, %arg6: memref<1x128xf32, #tpu.memory_space<vmem>>, %arg7: memref<1x16x16x128xf32, #tpu.memory_space<vmem>>, %arg8: memref<18x18x128xbf16, #tpu.memory_space<vmem>>) attributes {dimension_semantics = [#tpu.dimension_semantics<parallel>], iteration_bounds = array<i64: 2>, scalar_prefetch = 0 : i64, scratch_operands = 1 : i64, tpu.core_type = #tpu.core_type<tc>, window_params = [{transform_indices = @transform_0, window_bounds = array<i64: 1, 18, 18, 128>}, {transform_indices = @transform_1, window_bounds = array<i64: 1, 16, 16, 128>}, {pipeline_mode = #tpu.pipeline_mode<synchronous>, transform_indices = @transform_2, window_bounds = array<i64: 3, 384, 128>}, {pipeline_mode = #tpu.pipeline_mode<synchronous>, transform_indices = @transform_3, window_bounds = array<i64: 1, 128>}, {pipeline_mode = #tpu.pipeline_mode<synchronous>, transform_indices = @transform_4, window_bounds = array<i64: 3, 384, 128>}, {pipeline_mode = #tpu.pipeline_mode<synchronous>, transform_indices = @transform_5, window_bounds = array<i64: 1, 128>}, {transform_indices = @transform_6, window_bounds = array<i64: 1, 16, 16, 128>}]} {
    %cst = arith.constant 0.000000e+00 : bf16
    %0 = vector.broadcast %cst : bf16 to vector<18x18x128xbf16>
    %c0 = arith.constant 0 : index
    %c0_0 = arith.constant 0 : index
    %c0_1 = arith.constant 0 : index
    %1 = vector.load %arg8[%c0, %c0_0, %c0_1] : memref<18x18x128xbf16, #tpu.memory_space<vmem>>, vector<18x18x128xbf16>
    tpu.vector_store %arg8[%c0, %c0_0, %c0_1], %0 {strides = array<i32>} : memref<18x18x128xbf16, #tpu.memory_space<vmem>>, vector<18x18x128xbf16>,
    %c0_2 = arith.constant 0 : index
    %c0_3 = arith.constant 0 : index
    %c0_4 = arith.constant 0 : index
    %c0_5 = arith.constant 0 : index
    %2 = vector.load %arg1[%c0_2, %c0_3, %c0_4, %c0_5] : memref<1x18x18x128xbf16, #tpu.memory_space<vmem>>, vector<1x16x16x128xbf16>
    %3 = vector.shape_cast %2 : vector<1x16x16x128xbf16> to vector<16x16x128xbf16>
    %c0_6 = arith.constant 0 : index
    %c0_7 = arith.constant 0 : index
    %c1 = arith.constant 1 : index
    %c0_8 = arith.constant 0 : index
    %4 = vector.load %arg1[%c0_6, %c0_7, %c1, %c0_8] : memref<1x18x18x128xbf16, #tpu.memory_space<vmem>>, vector<1x16x16x128xbf16>
    %5 = vector.shape_cast %4 : vector<1x16x16x128xbf16> to vector<16x16x128xbf16>
    %c0_9 = arith.constant 0 : index
    %c0_10 = arith.constant 0 : index
    %c2 = arith.constant 2 : index
    %c0_11 = arith.constant 0 : index
    %6 = vector.load %arg1[%c0_9, %c0_10, %c2, %c0_11] : memref<1x18x18x128xbf16, #tpu.memory_space<vmem>>, vector<1x16x16x128xbf16>
    %7 = vector.shape_cast %6 : vector<1x16x16x128xbf16> to vector<16x16x128xbf16>
    %8 = tpu.concatenate %3, %5, %7 in 2 : vector<16x16x128xbf16>, vector<16x16x128xbf16>, vector<16x16x128xbf16> -> vector<16x16x384xbf16>
    %9 = vector.shape_cast %8 : vector<16x16x384xbf16> to vector<256x384xbf16>
    %c0_12 = arith.constant 0 : index
    %c0_13 = arith.constant 0 : index
    %c0_14 = arith.constant 0 : index
    %10 = vector.load %arg3[%c0_12, %c0_13, %c0_14] : memref<3x384x128xbf16, #tpu.memory_space<vmem>>, vector<1x384x128xbf16>
    %11 = vector.shape_cast %10 : vector<1x384x128xbf16> to vector<384x128xbf16>
    %cst_15 = arith.constant dense<0.000000e+00> : vector<256x128xf32>
    %12 = tpu.matmul %9, %11, %cst_15 {dimension_numbers = #tpu.dot_dimension_numbers<[1], [0], [0], [1], [0, 0, 1, 1], [], []>} : vector<256x384xbf16>, vector<384x128xbf16>, vector<256x128xf32> -> vector<256x128xf32>
    %c0_16 = arith.constant 0 : index
    %c1_17 = arith.constant 1 : index
    %c0_18 = arith.constant 0 : index
    %c0_19 = arith.constant 0 : index
    %13 = vector.load %arg1[%c0_16, %c1_17, %c0_18, %c0_19] : memref<1x18x18x128xbf16, #tpu.memory_space<vmem>>, vector<1x16x16x128xbf16>
    %14 = vector.shape_cast %13 : vector<1x16x16x128xbf16> to vector<16x16x128xbf16>
    %c0_20 = arith.constant 0 : index
    %c1_21 = arith.constant 1 : index
    %c1_22 = arith.constant 1 : index
    %c0_23 = arith.constant 0 : index
    %15 = vector.load %arg1[%c0_20, %c1_21, %c1_22, %c0_23] : memref<1x18x18x128xbf16, #tpu.memory_space<vmem>>, vector<1x16x16x128xbf16>
    %16 = vector.shape_cast %15 : vector<1x16x16x128xbf16> to vector<16x16x128xbf16>
    %c0_24 = arith.constant 0 : index
    %c1_25 = arith.constant 1 : index
    %c2_26 = arith.constant 2 : index
    %c0_27 = arith.constant 0 : index
    %17 = vector.load %arg1[%c0_24, %c1_25, %c2_26, %c0_27] : memref<1x18x18x128xbf16, #tpu.memory_space<vmem>>, vector<1x16x16x128xbf16>
    %18 = vector.shape_cast %17 : vector<1x16x16x128xbf16> to vector<16x16x128xbf16>
    %19 = tpu.concatenate %14, %16, %18 in 2 : vector<16x16x128xbf16>, vector<16x16x128xbf16>, vector<16x16x128xbf16> -> vector<16x16x384xbf16>
    %20 = vector.shape_cast %19 : vector<16x16x384xbf16> to vector<256x384xbf16>
    %c1_28 = arith.constant 1 : index
    %c0_29 = arith.constant 0 : index
    %c0_30 = arith.constant 0 : index
    %21 = vector.load %arg3[%c1_28, %c0_29, %c0_30] : memref<3x384x128xbf16, #tpu.memory_space<vmem>>, vector<1x384x128xbf16>
    %22 = vector.shape_cast %21 : vector<1x384x128xbf16> to vector<384x128xbf16>
    %cst_31 = arith.constant dense<0.000000e+00> : vector<256x128xf32>
    %23 = tpu.matmul %20, %22, %cst_31 {dimension_numbers = #tpu.dot_dimension_numbers<[1], [0], [0], [1], [0, 0, 1, 1], [], []>} : vector<256x384xbf16>, vector<384x128xbf16>, vector<256x128xf32> -> vector<256x128xf32>
    %24 = arith.addf %12, %23 : vector<256x128xf32>
    %c0_32 = arith.constant 0 : index
    %c2_33 = arith.constant 2 : index
    %c0_34 = arith.constant 0 : index
    %c0_35 = arith.constant 0 : index
    %25 = vector.load %arg1[%c0_32, %c2_33, %c0_34, %c0_35] : memref<1x18x18x128xbf16, #tpu.memory_space<vmem>>, vector<1x16x16x128xbf16>
    %26 = vector.shape_cast %25 : vector<1x16x16x128xbf16> to vector<16x16x128xbf16>
    %c0_36 = arith.constant 0 : index
    %c2_37 = arith.constant 2 : index
    %c1_38 = arith.constant 1 : index
    %c0_39 = arith.constant 0 : index
    %27 = vector.load %arg1[%c0_36, %c2_37, %c1_38, %c0_39] : memref<1x18x18x128xbf16, #tpu.memory_space<vmem>>, vector<1x16x16x128xbf16>
    %28 = vector.shape_cast %27 : vector<1x16x16x128xbf16> to vector<16x16x128xbf16>
    %c0_40 = arith.constant 0 : index
    %c2_41 = arith.constant 2 : index
    %c2_42 = arith.constant 2 : index
    %c0_43 = arith.constant 0 : index
    %29 = vector.load %arg1[%c0_40, %c2_41, %c2_42, %c0_43] : memref<1x18x18x128xbf16, #tpu.memory_space<vmem>>, vector<1x16x16x128xbf16>
    %30 = vector.shape_cast %29 : vector<1x16x16x128xbf16> to vector<16x16x128xbf16>
    %31 = tpu.concatenate %26, %28, %30 in 2 : vector<16x16x128xbf16>, vector<16x16x128xbf16>, vector<16x16x128xbf16> -> vector<16x16x384xbf16>
    %32 = vector.shape_cast %31 : vector<16x16x384xbf16> to vector<256x384xbf16>
    %c2_44 = arith.constant 2 : index
    %c0_45 = arith.constant 0 : index
    %c0_46 = arith.constant 0 : index
    %33 = vector.load %arg3[%c2_44, %c0_45, %c0_46] : memref<3x384x128xbf16, #tpu.memory_space<vmem>>, vector<1x384x128xbf16>
    %34 = vector.shape_cast %33 : vector<1x384x128xbf16> to vector<384x128xbf16>
    %cst_47 = arith.constant dense<0.000000e+00> : vector<256x128xf32>
    %35 = tpu.matmul %32, %34, %cst_47 {dimension_numbers = #tpu.dot_dimension_numbers<[1], [0], [0], [1], [0, 0, 1, 1], [], []>} : vector<256x384xbf16>, vector<384x128xbf16>, vector<256x128xf32> -> vector<256x128xf32>
    %36 = arith.addf %24, %35 : vector<256x128xf32>
    %37 = vector.shape_cast %36 : vector<256x128xf32> to vector<16x16x128xf32>
    %c0_48 = arith.constant 0 : index
    %c0_49 = arith.constant 0 : index
    %38 = vector.load %arg4[%c0_48, %c0_49] : memref<1x128xf32, #tpu.memory_space<vmem>>, vector<1x128xf32>
    %39 = vector.shape_cast %38 : vector<1x128xf32> to vector<1x1x128xf32>
    %40 = vector.broadcast %39 : vector<1x1x128xf32> to vector<16x16x128xf32>
    %41 = arith.addf %37, %40 : vector<16x16x128xf32>
    %cst_50 = arith.constant 0.000000e+00 : f32
    %42 = vector.broadcast %cst_50 : f32 to vector<16x16x128xf32>
    %43 = arith.maximumf %41, %42 : vector<16x16x128xf32>
    %44 = arith.truncf %43 : vector<16x16x128xf32> to vector<16x16x128xbf16>
    %c1_51 = arith.constant 1 : index
    %c1_52 = arith.constant 1 : index
    %c0_53 = arith.constant 0 : index
    %45 = vector.load %arg8[%c1_51, %c1_52, %c0_53] : memref<18x18x128xbf16, #tpu.memory_space<vmem>>, vector<16x16x128xbf16>
    tpu.vector_store %arg8[%c1_51, %c1_52, %c0_53], %44 {strides = array<i32>} : memref<18x18x128xbf16, #tpu.memory_space<vmem>>, vector<16x16x128xbf16>,
    %c0_54 = arith.constant 0 : index
    %c0_55 = arith.constant 0 : index
    %c0_56 = arith.constant 0 : index
    %46 = vector.load %arg8[%c0_54, %c0_55, %c0_56] : memref<18x18x128xbf16, #tpu.memory_space<vmem>>, vector<16x16x128xbf16>
    %c0_57 = arith.constant 0 : index
    %c1_58 = arith.constant 1 : index
    %c0_59 = arith.constant 0 : index
    %47 = vector.load %arg8[%c0_57, %c1_58, %c0_59] : memref<18x18x128xbf16, #tpu.memory_space<vmem>>, vector<16x16x128xbf16>
    %c0_60 = arith.constant 0 : index
    %c2_61 = arith.constant 2 : index
    %c0_62 = arith.constant 0 : index
    %48 = vector.load %arg8[%c0_60, %c2_61, %c0_62] : memref<18x18x128xbf16, #tpu.memory_space<vmem>>, vector<16x16x128xbf16>
    %49 = tpu.concatenate %46, %47, %48 in 2 : vector<16x16x128xbf16>, vector<16x16x128xbf16>, vector<16x16x128xbf16> -> vector<16x16x384xbf16>
    %50 = vector.shape_cast %49 : vector<16x16x384xbf16> to vector<256x384xbf16>
    %c0_63 = arith.constant 0 : index
    %c0_64 = arith.constant 0 : index
    %c0_65 = arith.constant 0 : index
    %51 = vector.load %arg5[%c0_63, %c0_64, %c0_65] : memref<3x384x128xbf16, #tpu.memory_space<vmem>>, vector<1x384x128xbf16>
    %52 = vector.shape_cast %51 : vector<1x384x128xbf16> to vector<384x128xbf16>
    %cst_66 = arith.constant dense<0.000000e+00> : vector<256x128xf32>
    %53 = tpu.matmul %50, %52, %cst_66 {dimension_numbers = #tpu.dot_dimension_numbers<[1], [0], [0], [1], [0, 0, 1, 1], [], []>} : vector<256x384xbf16>, vector<384x128xbf16>, vector<256x128xf32> -> vector<256x128xf32>
    %c1_67 = arith.constant 1 : index
    %c0_68 = arith.constant 0 : index
    %c0_69 = arith.constant 0 : index
    %54 = vector.load %arg8[%c1_67, %c0_68, %c0_69] : memref<18x18x128xbf16, #tpu.memory_space<vmem>>, vector<16x16x128xbf16>
    %c1_70 = arith.constant 1 : index
    %c1_71 = arith.constant 1 : index
    %c0_72 = arith.constant 0 : index
    %55 = vector.load %arg8[%c1_70, %c1_71, %c0_72] : memref<18x18x128xbf16, #tpu.memory_space<vmem>>, vector<16x16x128xbf16>
    %c1_73 = arith.constant 1 : index
    %c2_74 = arith.constant 2 : index
    %c0_75 = arith.constant 0 : index
    %56 = vector.load %arg8[%c1_73, %c2_74, %c0_75] : memref<18x18x128xbf16, #tpu.memory_space<vmem>>, vector<16x16x128xbf16>
    %57 = tpu.concatenate %54, %55, %56 in 2 : vector<16x16x128xbf16>, vector<16x16x128xbf16>, vector<16x16x128xbf16> -> vector<16x16x384xbf16>
    %58 = vector.shape_cast %57 : vector<16x16x384xbf16> to vector<256x384xbf16>
    %c1_76 = arith.constant 1 : index
    %c0_77 = arith.constant 0 : index
    %c0_78 = arith.constant 0 : index
    %59 = vector.load %arg5[%c1_76, %c0_77, %c0_78] : memref<3x384x128xbf16, #tpu.memory_space<vmem>>, vector<1x384x128xbf16>
    %60 = vector.shape_cast %59 : vector<1x384x128xbf16> to vector<384x128xbf16>
    %cst_79 = arith.constant dense<0.000000e+00> : vector<256x128xf32>
    %61 = tpu.matmul %58, %60, %cst_79 {dimension_numbers = #tpu.dot_dimension_numbers<[1], [0], [0], [1], [0, 0, 1, 1], [], []>} : vector<256x384xbf16>, vector<384x128xbf16>, vector<256x128xf32> -> vector<256x128xf32>
    %62 = arith.addf %53, %61 : vector<256x128xf32>
    %c2_80 = arith.constant 2 : index
    %c0_81 = arith.constant 0 : index
    %c0_82 = arith.constant 0 : index
    %63 = vector.load %arg8[%c2_80, %c0_81, %c0_82] : memref<18x18x128xbf16, #tpu.memory_space<vmem>>, vector<16x16x128xbf16>
    %c2_83 = arith.constant 2 : index
    %c1_84 = arith.constant 1 : index
    %c0_85 = arith.constant 0 : index
    %64 = vector.load %arg8[%c2_83, %c1_84, %c0_85] : memref<18x18x128xbf16, #tpu.memory_space<vmem>>, vector<16x16x128xbf16>
    %c2_86 = arith.constant 2 : index
    %c2_87 = arith.constant 2 : index
    %c0_88 = arith.constant 0 : index
    %65 = vector.load %arg8[%c2_86, %c2_87, %c0_88] : memref<18x18x128xbf16, #tpu.memory_space<vmem>>, vector<16x16x128xbf16>
    %66 = tpu.concatenate %63, %64, %65 in 2 : vector<16x16x128xbf16>, vector<16x16x128xbf16>, vector<16x16x128xbf16> -> vector<16x16x384xbf16>
    %67 = vector.shape_cast %66 : vector<16x16x384xbf16> to vector<256x384xbf16>
    %c2_89 = arith.constant 2 : index
    %c0_90 = arith.constant 0 : index
    %c0_91 = arith.constant 0 : index
    %68 = vector.load %arg5[%c2_89, %c0_90, %c0_91] : memref<3x384x128xbf16, #tpu.memory_space<vmem>>, vector<1x384x128xbf16>
    %69 = vector.shape_cast %68 : vector<1x384x128xbf16> to vector<384x128xbf16>
    %cst_92 = arith.constant dense<0.000000e+00> : vector<256x128xf32>
    %70 = tpu.matmul %67, %69, %cst_92 {dimension_numbers = #tpu.dot_dimension_numbers<[1], [0], [0], [1], [0, 0, 1, 1], [], []>} : vector<256x384xbf16>, vector<384x128xbf16>, vector<256x128xf32> -> vector<256x128xf32>
    %71 = arith.addf %62, %70 : vector<256x128xf32>
    %72 = vector.shape_cast %71 : vector<256x128xf32> to vector<16x16x128xf32>
    %c0_93 = arith.constant 0 : index
    %c0_94 = arith.constant 0 : index
    %73 = vector.load %arg6[%c0_93, %c0_94] : memref<1x128xf32, #tpu.memory_space<vmem>>, vector<1x128xf32>
    %74 = vector.shape_cast %73 : vector<1x128xf32> to vector<1x1x128xf32>
    %75 = vector.broadcast %74 : vector<1x1x128xf32> to vector<16x16x128xf32>
    %76 = arith.addf %72, %75 : vector<16x16x128xf32>
    %c0_95 = arith.constant 0 : index
    %c0_96 = arith.constant 0 : index
    %c0_97 = arith.constant 0 : index
    %c0_98 = arith.constant 0 : index
    %77 = vector.load %arg2[%c0_95, %c0_96, %c0_97, %c0_98] : memref<1x16x16x128xf32, #tpu.memory_space<vmem>>, vector<1x16x16x128xf32>
    %78 = vector.shape_cast %77 : vector<1x16x16x128xf32> to vector<16x16x128xf32>
    %79 = arith.addf %76, %78 : vector<16x16x128xf32>
    %cst_99 = arith.constant 0.000000e+00 : f32
    %80 = vector.broadcast %cst_99 : f32 to vector<16x16x128xf32>
    %81 = arith.maximumf %79, %80 : vector<16x16x128xf32>
    %c0_100 = arith.constant 0 : index
    %c0_101 = arith.constant 0 : index
    %c0_102 = arith.constant 0 : index
    %c0_103 = arith.constant 0 : index
    %82 = vector.load %arg7[%c0_100, %c0_101, %c0_102, %c0_103] : memref<1x16x16x128xf32, #tpu.memory_space<vmem>>, vector<1x16x16x128xf32>
    %83 = vector.shape_cast %82 : vector<1x16x16x128xf32> to vector<16x16x128xf32>
    %84 = vector.shape_cast %81 : vector<16x16x128xf32> to vector<1x16x16x128xf32>
    tpu.vector_store %arg7[%c0_100, %c0_101, %c0_102, %c0_103], %84 {strides = array<i32>} : memref<1x16x16x128xf32, #tpu.memory_space<vmem>>, vector<1x16x16x128xf32>,
    return
  }
  func.func @transform_0(%arg0: i32) -> (i32, i32, i32, i32) {
    %c0_i32 = arith.constant 0 : i32
    %c0_i32_0 = arith.constant 0 : i32
    %c0_i32_1 = arith.constant 0 : i32
    %c0_i32_2 = arith.constant 0 : i32
    return %arg0, %c0_i32, %c0_i32_0, %c0_i32_1 : i32, i32, i32, i32
  }
  func.func @transform_1(%arg0: i32) -> (i32, i32, i32, i32) {
    %c0_i32 = arith.constant 0 : i32
    %c0_i32_0 = arith.constant 0 : i32
    %c0_i32_1 = arith.constant 0 : i32
    %c0_i32_2 = arith.constant 0 : i32
    return %arg0, %c0_i32, %c0_i32_0, %c0_i32_1 : i32, i32, i32, i32
  }
  func.func @transform_2(%arg0: i32) -> (i32, i32, i32) {
    %c0_i32 = arith.constant 0 : i32
    %c0_i32_0 = arith.constant 0 : i32
    %c0_i32_1 = arith.constant 0 : i32
    %c0_i32_2 = arith.constant 0 : i32
    return %c0_i32, %c0_i32_0, %c0_i32_1 : i32, i32, i32
  }
  func.func @transform_3(%arg0: i32) -> (i32, i32) {
    %c0_i32 = arith.constant 0 : i32
    %c0_i32_0 = arith.constant 0 : i32
    %c0_i32_1 = arith.constant 0 : i32
    return %c0_i32, %c0_i32_0 : i32, i32
  }
  func.func @transform_4(%arg0: i32) -> (i32, i32, i32) {
    %c0_i32 = arith.constant 0 : i32
    %c0_i32_0 = arith.constant 0 : i32
    %c0_i32_1 = arith.constant 0 : i32
    %c0_i32_2 = arith.constant 0 : i32
    return %c0_i32, %c0_i32_0, %c0_i32_1 : i32, i32, i32
  }
  func.func @transform_5(%arg0: i32) -> (i32, i32) {
    %c0_i32 = arith.constant 0 : i32
    %c0_i32_0 = arith.constant 0 : i32
    %c0_i32_1 = arith.constant 0 : i32
    return %c0_i32, %c0_i32_0 : i32, i32
  }
  func.func @transform_6(%arg0: i32) -> (i32, i32, i32, i32) {
    %c0_i32 = arith.constant 0 : i32
    %c0_i32_0 = arith.constant 0 : i32
    %c0_i32_1 = arith.constant 0 : i32
    %c0_i32_2 = arith.constant 0 : i32
    return %arg0, %c0_i32, %c0_i32_0, %c0_i32_1 : i32, i32, i32, i32
  }
}

</mosaic_0001>

<bundles_post_ra>
// kernel: tpu_custom_call.1
= control target key start
LH: loop header
LB: loop body
LE: loop exit
PB: predicated region body
PF: predicated region fallthrough
CT: control target
= control target key end

     0   :  { %11 = vsyncpa [#allocation4], 0  ;;  %s13342_s0 = inlined_call_operand.vmem [shape: bf16[2,18,18,128], index: 0, kind: input, shape index: {}]   ;;  %s13343_s1 = inlined_call_operand.hbm [shape: f32[2,16,16,128], index: 1, kind: input, shape index: {}]   ;;  %s13344_s2 = inlined_call_operand.vmem [shape: bf16[3,384,128], index: 2, kind: input, shape index: {}]   ;;  %s13345_s3 = inlined_call_operand.vmem [shape: f32[1,128], index: 3, kind: input, shape index: {}]   ;;  %s13346_s4 = inlined_call_operand.hbm [shape: bf16[3,384,128], index: 4, kind: input, shape index: {}]   ;;  %s13347_s5 = inlined_call_operand.vmem [shape: f32[1,128], index: 5, kind: input, shape index: {}]   ;;  %s13348_s6 = inlined_call_operand.hbm [shape: f32[2,16,16,128], index: 6, kind: output, shape index: {}]  }
   0x1   :  { %13 = vsyncpa [#allocation4 + $0x1], 0 }
   0x2   :  { %14 = vsyncpa [#allocation7], 0 }
   0x3   :  { %15 = vsyncpa [#allocation5], 0 }
   0x4   :  { %17 = vsyncpa [#allocation5 + $0x1], 0  ;;  %s10435_s21 = smov 0   ;;  %s10437_s22 = smov 0  }
   0x5   :  { %s10439_s23 = smov 0   ;;  %s10441_s24 = smov 0  }
   0x6 LB: > { %s10456_s25 = sadd.s32 4294967295, %s10388_s24   ;;  %s7569_s26 = sadd.s32 4294967294, %s10388_s24   ;;  %s10388_s24 = sphi %s10441_s24, %s13456_s24   ;;  %s10384_s23 = sphi %s10439_s23, %s13455_s23   ;;  %s10380_s22 = sphi %s10437_s22, %s13454_s22   ;;  %s10376_s21 = sphi %s10435_s21, %s13453_s21  }
   0x7   : > { %p69_p0 = scmp.ne.s32.totalorder %s10380_s22, %s10376_s21  ;;  %p13349_p1 = scmp.eq.s32.totalorder %s10456_s25, 0 }
   0x8   : > { %p183_p3 = scmp.eq.s32.totalorder %s7569_s26, 1  ;;  %p7570_p5 = scmp.ge.s32.totalorder %s10388_s24, 1 }
   0x9   : > { %p10465_p4 = por %p13349_p1, %p69_p0  ;;  %p190_p7 = scmp.lt.s32.totalorder %s10388_s24, 3 }
   0xa   : > { %p10470_p6 = por %p183_p3, %p69_p0  ;;  %s10390_s30 = smov [#allocation6]  }
   0xb   : > { %s13358_s27 = scalar_select %p10465_p4, 1, 0 }
   0xc   : > { %s13359_s28 = scalar_select %p10470_p6, 1, 0 }
   0xd   : > { %p10475_p8 = pnand %p7570_p5, %p190_p7  ;;  %s208_s7 = sshll.u32 %s10390_s30, 4  ;;  %s10479_s7 = int_to_ptr.vmem [resolvable:$true] %s208_s7 }
   0xe   : > { %s10491_s9 = sadd.s32 1, %s10388_s24   ;;  %s56_s10 = sadd.s32 1, %s10384_s23 }
   0xf   : > { %s13360_s29 = scalar_select %p10475_p8, 1, 0 }
  0x10   : > { %p9743_p9 = pneg %p10475_p8  ;;  %s53_s11 = ssub.s32 %s10388_s24, %s10491_s9 }
  0x11   : > { %s10260_s14 = scalar_lea.hbm %s13346_s4, 9216 }
  0x12   : > { %p10486_p11 = pnand %p9743_p9, %p13349_p1  ;;  %p10261_p12 = scmp.ne.s32.totalorder %s13346_s4, %s10260_s14 }
  0x13   : > { %p10267_p5 = scmp.lt.u32.totalorder %s10260_s14, %s13346_s4 }
  0x14   : > { %p10262_p13 = pneg %p10486_p11 }
  0x16   : > { %p10263_p0 = pnand %p10262_p13, %p10261_p12 }
  0x18   : > { %p10264_p3 = pneg %p10263_p0 }
  0x1a   : > { %p10269_p7 = pnand %p10267_p5, %p10264_p3 }
  0x1c   : > { %10272 = shalt.err (!%p10269_p7)
}
  0x1d   : > { %s10273_s19 = scalar_lea.vmem %s10479_s7, 9216  ;;  %p10281_p2 = scmp.lt.s32.totalorder %s10479_s7, %s10479_s7 }
  0x1e   : > { %p10274_p9 = scmp.ne.s32.totalorder %s10479_s7, %s10273_s19  ;;  %p10282_p6 = scmp.lt.s32.totalorder %s10273_s19, %s10273_s19 }
  0x20   : > { %p10276_p10 = pnand %p10274_p9, %p10262_p13  ;;  %p10283_p4 = por %p10282_p6, %p10281_p2 }
  0x22   : > { %p10277_p1 = pneg %p10276_p10 }
  0x24   : > { %p10284_p8 = pnand %p10283_p4, %p10277_p1 }
  0x26   : > { %10287 = shalt.err (!%p10284_p8)
}
  0x27   : > { %s10391_s20 = smov 64   ;;  %s10392_s26 = smov 4  }
  0x28   : > { %9746 = dma.hbm_to_vmem [thread:$0]  (!%p10486_p11), %s13346_s4, 9216, %s10479_s7, [#allocation7], %s10391_s20, %s10391_s20, %s10392_s26  }
  0x29   : > { %p54_p2 = scmp.eq.s32.totalorder %s53_s11, 0  ;;  %p63_p1 = scmp.ne.s32.totalorder %s10384_s23, %s10380_s22 }
  0x2a   : > { %p64_p4 = scmp.eq.s32.totalorder %s10388_s24, 0  ;;  %p9756_p6 = scmp.lt.s32.totalorder %s10388_s24, 2 }
  0x2b   : > { %s10522_s13 = scalar_select %p54_p2, %s10384_s23, %s56_s10  }
  0x2c   : > { %p65_p8 = por %p64_p4, %p63_p1  ;;  %p13362_p10 = scmp.eq.s32.totalorder %s10456_s25, 1 }
  0x2d   : > { %s233_s15 = sand.u32 1, %s10384_s23   ;;  %s8276_s16 = sshll.u32 %s10388_s24, 12 }
  0x2e   : > { %p10526_p12 = por %p13362_p10, %p63_p1  ;;  %s7573_s17 = sshll.u32 %s233_s15, 8 }
  0x2f   : > { %s10535_s19 = scalar_lea.hbm %s13343_s1, %s8276_s16  ;;  %s237_s7 = scalar_lea.vmem [#allocation3], %s7573_s17 }
  0x30   : > { %s244_s10 = sshll.u32 %s237_s7, 4  ;;  %p10537_p11 = pnand %p9756_p6, %p65_p8  ;;  %s10541_s10 = int_to_ptr.vmem [resolvable:$true] %s244_s10 }
  0x31   : > { %s10543_s20 = scalar_lea.sflag [#allocation4], %s233_s15  ;;  %s10288_s26 = scalar_lea.hbm %s10535_s19, 4096 }
  0x32   : > { %p10289_p13 = scmp.ne.s32.totalorder %s10535_s19, %s10288_s26  ;;  %p10290_p0 = pneg %p10537_p11 }
  0x33   : > { %s10293_s16 = scalar_lea.hbm %s13343_s1, 8192  ;;  %p10294_p7 = scmp.lt.u32.totalorder %s10535_s19, %s13343_s1 }
  0x34   : > { %p10291_p3 = pnand %p10290_p0, %p10289_p13  ;;  %p10295_p9 = scmp.lt.u32.totalorder %s10293_s16, %s10288_s26 }
  0x35   : > { %p10297_p1 = scmp.lt.u32.totalorder %s10288_s26, %s10535_s19 }
  0x36   : > { %p10292_p5 = pneg %p10291_p3  ;;  %p10296_p2 = por %p10295_p9, %p10294_p7 }
  0x38   : > { %p10298_p4 = por %p10297_p1, %p10296_p2 }
  0x3a   : > { %p10299_p6 = pnand %p10298_p4, %p10292_p5 }
  0x3c   : > { %10302 = shalt.err (!%p10299_p6)
}
  0x3d   : > { %s10303_s15 = scalar_lea.vmem %s10541_s10, 4096  ;;  %s10393_s18 = smov [#allocation3]  }
  0x3e   : > { %p10304_p8 = scmp.ne.s32.totalorder %s10541_s10, %s10303_s15  ;;  %s10308_s7 = sshll.u32 %s10393_s18, 4  ;;  %s10309_s7 = int_to_ptr.vmem [resolvable:$false] %s10308_s7 }
  0x3f   : > { %s10310_s30 = scalar_lea.vmem %s10309_s7, 8192  ;;  %p10311_p3 = scmp.lt.s32.totalorder %s10541_s10, %s10309_s7 }
  0x40   : > { %p10306_p10 = pnand %p10304_p8, %p10290_p0  ;;  %p10312_p7 = scmp.lt.s32.totalorder %s10310_s30, %s10303_s15 }
  0x42   : > { %p10307_p13 = pneg %p10306_p10  ;;  %p10313_p9 = por %p10312_p7, %p10311_p3 }
  0x44   : > { %p10314_p2 = pnand %p10313_p9, %p10307_p13 }
  0x46   : > { %10317 = shalt.err (!%p10314_p2)
}
  0x47   : > { %s10394_s26 = smov 128   ;;  %s10395_s12 = smov 8  }
  0x48   : > { %9750 = dma.hbm_to_vmem [thread:$0]  (!%p10537_p11), %s10535_s19, 4096, %s10541_s10, %s10543_s20, %s10394_s26, %s10394_s26, %s10395_s12  }
  0x49   : > { %p13365_p0 = scmp.ne.s32.totalorder %s13360_s29, 0 }
  0x4b   : > { %256 = sbr.rel (%p13365_p0) target bundleno = 1190 (0x4a6), region = 44 }
  0x52   : > { %s10574_s16 = sand.u32 1, %s10380_s22   ;;  %p13366_p5 = scmp.ne.s32.totalorder %s13358_s27, 0 }
  0x53   : > { %s7577_s17 = sshll.u32 %s10574_s16, 8  ;;  %s259_s8 = scalar_lea.sflag [#allocation4], %s10574_s16 }
  0x54   : > { %s10580_s15 = scalar_lea.vmem [#allocation3], %s7577_s17 }
  0x55   : > { %10363 = dma.done.wait (%p13366_p5), %s259_s8, 4096  }
  0x56   : > { %10365 = vsyncadd (%p13366_p5), %s259_s8, 4294963200  ;;  %p13367_p11 = scmp.eq.s32.totalorder %s10456_s25, 0 }
  0x58   : > { %10367 = dma.done.wait (%p13367_p11), [#allocation7], 9216   ;;  %p13368_p1 = pmov %p13367_p11 }
  0x59   : > { %v9799_v0 = vld [vmem:[%s13344_s2 + $0x100] sm:$0xff]   ;;  %v9803_v4 = vld [vmem:[%s13344_s2 + $0x108] sm:$0xff]   ;;  %v9807_v8 = vld [vmem:[%s13344_s2 + $0x110] sm:$0xff]   ;;  %p300_p4 = scmp.lt.s32.totalorder %s10456_s25, 1  ;;  %vm568_vm0 = vsmask.f32 7424 }
  0x5a   : > { %10369 = vsyncadd (%p13368_p1), [#allocation7], 4294958080  ;;  %v9800_v1 = vld [vmem:[%s13344_s2 + $0xc0] sm:$0xff]   ;;  %8310 = vmatprep.subr.bf16.mxu0 %v9799_v0  ;;  %v9804_v5 = vld [vmem:[%s13344_s2 + $0xc8] sm:$0xff]   ;;  %vm825_vm1 = vcmask 1046528   ;;  %vm4015_vm2 = vcmask 1043456  }
  0x5b   : > { %v9801_v2 = vld [vmem:[%s13344_s2 + $0x40] sm:$0xff]   ;;  %8311 = vmatpush3.bf16.msra.mxu0 %v9800_v1  ;;  %v9805_v6 = vld [vmem:[%s13344_s2 + $0x48] sm:$0xff]   ;;  %v9808_v9 = vld [vmem:[%s13344_s2 + $0xd0] sm:$0xff]   ;;  %s301_s30 = scalar_select %p300_p4, %s10456_s25, 1  ;;  %vm4016_vm3 = vsmask.f32 7938 }
  0x5c   : > { %v9802_v3 = vld [vmem:[%s13344_s2] sm:$0xff]   ;;  %8446 = vmatprep.subr.bf16.mxu1 %v9801_v2  ;;  %8312 = vmatprep.subr.bf16.mxu0 %v9803_v4  ;;  %v9806_v7 = vld [vmem:[%s13344_s2 + $0x8] sm:$0xff]   ;;  %v9809_v10 = vld [vmem:[%s13344_s2 + $0x50] sm:$0xff]   ;;  %vm3691_vm4 = vsmask.f32 256  ;;  %vm4022_vm6 = vcmask 1040384  }
  0x5d   : > { %8447 = vmatpush3.bf16.msra.mxu1 %v9802_v3  ;;  %v9810_v11 = vld [vmem:[%s13344_s2 + $0x10] sm:$0xff]   ;;  %v9811_v12 = vld [vmem:[%s13344_s2 + $0x118] sm:$0xff]   ;;  %v9815_v16 = vld [vmem:[%s13344_s2 + $0x120] sm:$0xff]   ;;  %s9734_s18 = smul.u32 216, %s301_s30  ;;  %vm3692_vm5 = vsmask.f32 4368 }
  0x5e   : > { %8448 = vmatprep.subr.bf16.mxu1 %v9805_v6  ;;  %v9812_v13 = vld [vmem:[%s13344_s2 + $0xd8] sm:$0xff]   ;;  %v9816_v17 = vld [vmem:[%s13344_s2 + $0xe0] sm:$0xff]   ;;  %v9819_v20 = vld [vmem:[%s13344_s2 + $0x128] sm:$0xff]   ;;  %s13173_s7 = scalar_lea.vmem [#allocation8], %s7577_s17  ;;  %s8309_s17 = sshll.u32 %s10456_s25, 12 }
  0x5f   : > { %8313 = vmatpush3.bf16.msra.mxu0 %v9804_v5  ;;  %v9813_v14 = vld [vmem:[%s13344_s2 + $0x58] sm:$0xff]   ;;  %v9817_v18 = vld [vmem:[%s13344_s2 + $0x60] sm:$0xff]   ;;  %v9820_v21 = vld [vmem:[%s13344_s2 + $0xe8] sm:$0xff]   ;;  %s10685_s20 = scalar_lea.vmem %s13342_s0, %s9734_s18  ;;  %s7474_s26 = sshll.u32 %s13173_s7, 4  ;;  %s13295_s26 = int_to_ptr.vmem [resolvable:$true] %s7474_s26 }
  0x60   : > { %8314 = vmatprep.subr.bf16.mxu0 %v9807_v8  ;;  %v9814_v15 = vld [vmem:[%s13344_s2 + $0x18] sm:$0xff]   ;;  %v9818_v19 = vld [vmem:[%s13344_s2 + $0x20] sm:$0xff]   ;;  %v9821_v22 = vld [vmem:[%s13344_s2 + $0x68] sm:$0xff]   ;;  %s13293_s8 = scalar_lea.hbm %s13348_s6, %s8309_s17  ;;  %s7461_s25 = scalar_lea.sflag [#allocation5], %s10574_s16 }
  0x61   : > { %8449 = vmatpush3.bf16.msra.mxu1 %v9806_v7  ;;  %v9822_v23 = vld [vmem:[%s13344_s2 + $0x28] sm:$0xff]   ;;  %v9823_v24 = vld [vmem:[%s13344_s2 + $0x130] sm:$0xff]   ;;  %v9827_v28 = vld [vmem:[%s13344_s2 + $0x138] sm:$0xff]   ;;  %s10397_s29 = smov [#allocation8]  }
  0x62   : > { %8450 = vmatprep.subr.bf16.mxu1 %v9809_v10  ;;  %v9824_v25 = vld [vmem:[%s13344_s2 + $0xf0] sm:$0xff]   ;;  %v9828_v29 = vld [vmem:[%s13344_s2 + $0xf8] sm:$0xff]   ;;  %v7629_v32 = vld [vmem:[%s10685_s20 + $0xc] sm:$0xf] }
  0x63   : > { %8315 = vmatpush3.bf16.msra.mxu0 %v9808_v9  ;;  %v9825_v26 = vld [vmem:[%s13344_s2 + $0x70] sm:$0xff]   ;;  %v9829_v30 = vld [vmem:[%s13344_s2 + $0x78] sm:$0xff]   ;;  %v9833_v36 = vld [vmem:[%s13344_s2 + $0x140] sm:$0xff]  }
  0x64   : > { %8316 = vmatprep.subr.bf16.mxu0 %v9811_v12  ;;  %v9826_v27 = vld [vmem:[%s13344_s2 + $0x30] sm:$0xff]   ;;  %v9830_v31 = vld [vmem:[%s13344_s2 + $0x38] sm:$0xff]   ;;  %v360_v37 = vld [vmem:[%s10685_s20] sm:$0xf] }
  0x65   : > { %8451 = vmatpush3.bf16.msra.mxu1 %v9810_v11  ;;  %v7630_v33 = vld [vmem:[%s10685_s20 + $0x10] sm:$0xf]  ;;  %v10696_v35 = vld [vmem:[%s10685_s20 + $0x14] ss:$0 sps:$4 sm:$0x11]   ;;  %v9842_v2 = vld [vmem:[%s13344_s2 + $0x148] sm:$0xff]  }
  0x66   : > { %8452 = vmatprep.subr.bf16.mxu1 %v9813_v14  ;;  %v7693_v34 = vcombine.low %v7629_v32, %v7630_v33  ;;  %13369 = vst [vmem:[#allocation12_spill] sm:$0xff] %v10696_v35  ;;  %v361_v38 = vld [vmem:[%s10685_s20 + $0x4] sm:$0xf]  ;;  %v1155_v41 = vshll.u32 %v10696_v35, 16  ;;  %v7631_v44 = vld [vmem:[%s10685_s20 + $0x18] sm:$0xf]  ;;  %vm12009_vm7 = vmand %vm4015_vm2, %vm4016_vm3 }
  0x67   : > { %8317 = vmatpush3.bf16.msra.mxu0 %v9812_v13  ;;  %v7581_v42 = vcombine.low %v360_v37, %v361_v38  ;;  %v10705_v43 = vld [vmem:[%s10685_s20 + $0x8] ss:$0 sps:$4 sm:$0x11]   ;;  %v7632_v49 = vld [vmem:[%s10685_s20 + $0x1c] sm:$0xf]  ;;  %v9851_v11 = vld [vmem:[%s13344_s2 + $0x150] sm:$0xff]  }
  0x68   : > { %8318 = vmatprep.subr.bf16.mxu0 %v9815_v16  ;;  %v1148_v39 = vshrl.u32 %v7693_v34, 16  ;;  %v1150_v40 = vshll.u32 %v7693_v34, 16  ;;  %13370 = vst [vmem:[#allocation13_spill] sm:$0xff] %v10705_v43  ;;  %v1157_v46 = vrot.slane %v1155_v41, 1  ;;  %v577_v50 = vshll.u32 %v10705_v43, 16  ;;  %v9860_v33 = vld [vmem:[%s13344_s2 + $0x158] sm:$0xff]   ;;  %vm12014_vm8 = vmor %vm3691_vm4, %vm3692_vm5 }
  0x69   : > { %8453 = vmatpush3.bf16.msra.mxu1 %v9814_v15  ;;  %v570_v47 = vshrl.u32 %v7581_v42, 16  ;;  %v572_v48 = vshll.u32 %v7581_v42, 16  ;;  %v10710_v51 = vcombine.low %v7631_v44, %v7632_v49  ;;  %v9837_v52 = vld [vmem:[%s10685_s20 + $0x20] ss:$0 sps:$4 sm:$0x11]   ;;  %vm12022_vm9 = vmand %vm4022_vm6, %vm3691_vm4 }
  0x6a   : > { %8454 = vmatprep.subr.bf16.mxu1 %v9817_v18  ;;  %v1152_v45 = vrot.slane %v1150_v40, 1  ;;  %v362_v55 = vld [vmem:[%s10685_s20 + $0xc] sm:$0xf]  ;;  %v363_v56 = vld [vmem:[%s10685_s20 + $0x10] sm:$0xf]  ;;  %v579_v57 = vrot.slane %v577_v50, 1 }
  0x6b   : > { %8319 = vmatpush3.bf16.msra.mxu0 %v9816_v17  ;;  %v574_v54 = vrot.slane %v572_v48, 1  ;;  %v1160_v58 = vshrl.u32 %v10710_v51, 16  ;;  %v1162_v59 = vshll.u32 %v10710_v51, 16  ;;  %v1167_v60 = vshll.u32 %v9837_v52, 16  ;;  %v7633_v1 = vld [vmem:[%s10685_s20 + $0x24] sm:$0xf] }
  0x6c   : > { %8320 = vmatprep.subr.bf16.mxu0 %v9819_v20  ;;  %v1153_v53 = vor.u32 %v1152_v45, %v1148_v39  ;;  %v10718_v63 = vcombine.low %v362_v55, %v363_v56  ;;  %v9839_v0 = vld [vmem:[%s10685_s20 + $0x14] ss:$0 sps:$4 sm:$0x11]   ;;  %v7634_v5 = vld [vmem:[%s10685_s20 + $0x28] sm:$0xf] }
  0x6d   : > { %8455 = vmatpush3.bf16.msra.mxu1 %v9818_v19  ;;  %v575_v62 = vor.u32 %v574_v54, %v570_v47  ;;  %v1164_v3 = vrot.slane %v1162_v59, 1  ;;  %v1169_v4 = vrot.slane %v1167_v60, 1  ;;  %v589_v9 = vshll.u32 %v9839_v0, 16  ;;  %v9841_v10 = vld [vmem:[%s10685_s20 + $0x2c] ss:$0 sps:$4 sm:$0x11]  }
  0x6e   : > { %8456 = vmatprep.subr.bf16.mxu1 %v9821_v22  ;;  %v1158_v61 = vsel %vm568_vm0, %v1153_v53, %v1157_v46  ;;  %v582_v7 = vshrl.u32 %v10718_v63, 16  ;;  %v584_v8 = vshll.u32 %v10718_v63, 16  ;;  %v10733_v13 = vcombine.low %v7633_v1, %v7634_v5  ;;  %v364_v14 = vld [vmem:[%s10685_s20 + $0x18] sm:$0xf]  ;;  %v365_v18 = vld [vmem:[%s10685_s20 + $0x1c] sm:$0xf] }
  0x6f   : > { %8321 = vmatpush3.bf16.msra.mxu0 %v9820_v21  ;;  %1692 = vmatprep.mubr.bf16.mxu0 %v1158_v61  ;;  %v580_v6 = vsel %vm568_vm0, %v575_v62, %v579_v57  ;;  %v1165_v12 = vor.u32 %v1164_v3, %v1160_v58  ;;  %v591_v16 = vrot.slane %v589_v9, 1  ;;  %v1179_v17 = vshll.u32 %v9841_v10, 16  ;;  %v9872_v19 = vld [vmem:[%s13344_s2 + $0x80] sm:$0xff]   ;;  %v9846_v37 = vld [vmem:[%s10685_s20 + $0x38] ss:$0 sps:$4 sm:$0x11]  }
  0x70   : > { %8322 = vmatprep.subr.bf16.mxu0 %v9823_v24  ;;  %2158 = vmatprep.mubr.bf16.mxu1 %v580_v6  ;;  %v586_v15 = vrot.slane %v584_v8, 1  ;;  %v1172_v21 = vshrl.u32 %v10733_v13, 16  ;;  %v1174_v22 = vshll.u32 %v10733_v13, 16  ;;  %v7635_v24 = vld [vmem:[%s10685_s20 + $0x30] sm:$0xf]  ;;  %v9882_v45 = vld [vmem:[%s13344_s2 + $0x88] sm:$0xff]  }
  0x71   : > { %8457 = vmatpush3.bf16.msra.mxu1 %v9822_v23  ;;  %v1170_v20 = vsel %vm568_vm0, %v1165_v12, %v1169_v4  ;;  %v10743_v23 = vcombine.low %v364_v14, %v365_v18  ;;  %v366_v38 = vld [vmem:[%s10685_s20 + $0x24] sm:$0xf]  ;;  %v367_v44 = vld [vmem:[%s10685_s20 + $0x28] sm:$0xf]  ;;  %v1191_v47 = vshll.u32 %v9846_v37, 16  ;;  %v9892_v4 = vld [vmem:[%s13344_s2 + $0x90] sm:$0xff]  }
  0x72   : > { %8458 = vmatprep.subr.bf16.mxu1 %v9825_v26  ;;  %v1181_v26 = vrot.slane %v1179_v17, 1  ;;  %v10765_v48 = vcombine.low %v366_v38, %v367_v44  ;;  %v7637_v49 = vld [vmem:[%s10685_s20 + $0x3c] sm:$0xf]  ;;  %v9848_v54 = vld [vmem:[%s10685_s20 + $0x2c] ss:$0 sps:$4 sm:$0x11]  }
  0x73   : > { %8323 = vmatpush3.bf16.msra.mxu0 %v9824_v25  ;;  %v587_v25 = vor.u32 %v586_v15, %v582_v7  ;;  %v7638_v55 = vld [vmem:[%s10685_s20 + $0x40] sm:$0xf]  ;;  %v1193_v56 = vrot.slane %v1191_v47, 1  ;;  %v613_v62 = vshll.u32 %v9848_v54, 16  ;;  %v9879_v3 = vld [vmem:[%s13344_s2 + $0x168] sm:$0xff]   ;;  %v9897_v18 = vld [vmem:[%s13344_s2 + $0x98] sm:$0xff]  }
  0x74   : > { %8324 = vmatprep.subr.bf16.mxu0 %v9827_v28  ;;  %v7636_v28 = vld [vmem:[%s10685_s20 + $0x34] sm:$0xf]  ;;  %v608_v57 = vshll.u32 %v10765_v48, 16  ;;  %v10774_v58 = vcombine.low %v7637_v49, %v7638_v55  ;;  %v9869_v59 = vld [vmem:[%s13344_s2 + $0x160] sm:$0xff]   ;;  %v368_v7 = vld [vmem:[%s10685_s20 + $0x30] sm:$0xf] }
  0x75   : > { %8459 = vmatpush3.bf16.msra.mxu1 %v9826_v27  ;;  %v9844_v27 = vld [vmem:[%s10685_s20 + $0x20] ss:$0 sps:$4 sm:$0x11]   ;;  %v10750_v32 = vcombine.low %v7635_v24, %v7636_v28  ;;  %v9850_v0 = vld [vmem:[%s10685_s20 + $0x44] ss:$0 sps:$4 sm:$0x11]  }
  0x76   : > { %8460 = vmatprep.subr.bf16.mxu1 %v9829_v30  ;;  %v594_v30 = vshrl.u32 %v10743_v23, 16  ;;  %v1196_v1 = vshrl.u32 %v10774_v58, 16  ;;  %v615_v5 = vrot.slane %v613_v62, 1  ;;  %v1203_v6 = vshll.u32 %v9850_v0, 16  ;;  %v369_v8 = vld [vmem:[%s10685_s20 + $0x34] sm:$0xf] }
  0x77   : > { %8325 = vmatpush3.bf16.msra.mxu0 %v9828_v29  ;;  %v1176_v29 = vrot.slane %v1174_v22, 1  ;;  %v1184_v41 = vshrl.u32 %v10750_v32, 16  ;;  %v10792_v12 = vcombine.low %v368_v7, %v369_v8  ;;  %v9853_v14 = vld [vmem:[%s10685_s20 + $0x38] ss:$0 sps:$4 sm:$0x11]   ;;  %v9889_v24 = vld [vmem:[%s13344_s2 + $0x170] sm:$0xff]  }
  0x78   : > { %9126 = vmatprep.subr.bf16.mxu0 %v9833_v36  ;;  %v1205_v15 = vrot.slane %v1203_v6, 1  ;;  %v7640_v17 = vld [vmem:[%s10685_s20 + $0x4c] sm:$0xf]  ;;  %v370_v22 = vld [vmem:[%s10685_s20 + $0x3c] sm:$0xf]  ;;  %v9903_v49 = vld [vmem:[%s13344_s2 + $0xa0] sm:$0xff]  }
  0x79   : > { %8461 = vmatpush3.bf16.msra.mxu1 %v9830_v31  ;;  %v596_v31 = vshll.u32 %v10743_v23, 16  ;;  %v1177_v39 = vor.u32 %v1176_v29, %v1172_v21  ;;  %v620_v21 = vshll.u32 %v10792_v12, 16  ;;  %v371_v28 = vld [vmem:[%s10685_s20 + $0x40] sm:$0xf]  ;;  %v9900_v47 = vld [vmem:[%s13344_s2 + $0x178] sm:$0xff]  }
  0x7a   : > { %1693 = vmatmul.mubr.bf16.vlgmr.msra.gmra.mrb[0].mxu0 %v7693_v34  ;;  %9174 = vmatprep.subr.bf16.mxu1 %v9872_v19  ;;  %v592_v34 = vsel %vm568_vm0, %v587_v25, %v591_v16  ;;  %v7639_v16 = vld [vmem:[%s10685_s20 + $0x48] sm:$0xf]  ;;  %v625_v25 = vshll.u32 %v9853_v14, 16  ;;  %v373_v55 = vld [vmem:[%s10685_s20 + $0x4c] sm:$0xf] }
  0x7b   : > { %9127 = vmatpush3.bf16.msra.mxu0 %v9833_v36  ;;  %1700 = vmatprep.mubr.bf16.mxu0 %v1170_v20  ;;  %v601_v36 = vshll.u32 %v9844_v27, 16  ;;  %v598_v40 = vrot.slane %v596_v31, 1  ;;  %v1182_v50 = vsel %vm568_vm0, %v1177_v39, %v1181_v26  ;;  %v618_v20 = vshrl.u32 %v10792_v12, 16  ;;  %v9855_v27 = vld [vmem:[%s10685_s20 + $0x50] ss:$0 sps:$4 sm:$0x11]  }
  0x7c   : > { %2159 = vmatmul.mubr.bf16.vlgmr.msra.gmra.mrb[0].mxu1 %v7581_v42  ;;  %9128 = vmatprep.subr.bf16.mxu0 %v9842_v2  ;;  %v1186_v42 = vshll.u32 %v10750_v32, 16  ;;  %v10808_v26 = vcombine.low %v7639_v16, %v7640_v17  ;;  %v622_v29 = vrot.slane %v620_v21, 1  ;;  %v9857_v31 = vld [vmem:[%s10685_s20 + $0x44] ss:$0 sps:$4 sm:$0x11]   ;;  %v627_v37 = vrot.slane %v625_v25, 1 }
  0x7d   : > { %9175 = vmatpush3.bf16.msra.mxu1 %v9872_v19  ;;  %2166 = vmatprep.mubr.bf16.mxu1 %v592_v34  ;;  %v603_v46 = vrot.slane %v601_v36, 1  ;;  %v599_v52 = vor.u32 %v598_v40, %v594_v30  ;;  %v10813_v30 = vcombine.low %v370_v22, %v371_v28  ;;  %v7641_v34 = vld [vmem:[%s10685_s20 + $0x54] sm:$0xf]  ;;  %v1215_v40 = vshll.u32 %v9855_v27, 16  ;;  %v7645_v21 = vld [vmem:[%s10685_s20 + $0x6c] sm:$0xf] }
  0x7e   : > { %v1188_v53 = vrot.slane %v1186_v42, 1  ;;  %9176 = vmatprep.subr.bf16.mxu1 %v9882_v45  ;;  %v623_v36 = vor.u32 %v622_v29, %v618_v20  ;;  %v1208_v38 = vshrl.u32 %v10808_v26, 16  ;;  %v9862_v62 = vld [vmem:[%s10685_s20 + $0x50] ss:$0 sps:$4 sm:$0x11]   ;;  %v9910_v20 = vld [vmem:[%s13344_s2 + $0xb8] sm:$0xff]  }
  0x7f   : > { %9129 = vmatpush3.bf16.msra.mxu0 %v9842_v2  ;;  %v604_v60 = vsel %vm568_vm0, %v599_v52, %v603_v46  ;;  %v1198_v2 = vshll.u32 %v10774_v58, 16  ;;  %v632_v39 = vshll.u32 %v10813_v30, 16  ;;  %v9859_v46 = vld [vmem:[%s10685_s20 + $0x5c] ss:$0 sps:$4 sm:$0x11]  }
  0x80   : > { %9130 = vmatprep.subr.bf16.mxu0 %v9851_v11  ;;  %v1189_v61 = vor.u32 %v1188_v53, %v1184_v41  ;;  %v637_v41 = vshll.u32 %v9857_v31, 16  ;;  %v372_v52 = vld [vmem:[%s10685_s20 + $0x48] sm:$0xf]  ;;  %v628_v53 = vsel %vm568_vm0, %v623_v36, %v627_v37  ;;  %v10875_v22 = vld [vmem:[%s10685_s20 + $0x70] sm:$0xf] }
  0x81   : > { %9177 = vmatpush3.bf16.msra.mxu1 %v9882_v45  ;;  %v634_v54 = vrot.slane %v632_v39, 1  ;;  %v10865_v17 = vld [vmem:[%s10685_s20 + $0x68] ss:$0 sps:$4 sm:$0x11]   ;;  %v376_v27 = vld [vmem:[%s10685_s20 + $0x60] sm:$0xf]  ;;  %v10889_v36 = vcombine.low %v7645_v21, %v10875_v22 }
  0x82   : > { %1701 = vmatmul.mubr.bf16.gmra.mrb[4].mxu0 %v10710_v51  ;;  %v606_v51 = vshrl.u32 %v10765_v48, 16  ;;  %v1194_v9 = vsel %vm568_vm0, %v1189_v61, %v1193_v56  ;;  %9178 = vmatprep.subr.bf16.mxu1 %v9892_v4  ;;  %v9904_v56 = vld [vmem:[%s13344_s2 + $0xa8] sm:$0xff]   ;;  %v1227_v61 = vshll.u32 %v9859_v46, 16 }
  0x83   : > { %9131 = vmatpush3.bf16.msra.mxu0 %v9851_v11  ;;  %1708 = vmatprep.mubr.bf16.mxu0 %v1182_v50  ;;  %v1200_v11 = vrot.slane %v1198_v2, 1  ;;  %v630_v50 = vshrl.u32 %v10813_v30, 16  ;;  %v9909_v2 = vld [vmem:[%s13344_s2 + $0xb0] sm:$0xff]   ;;  %v10952_v21 = vld [vmem:[%s10685_s20 + $0x8c] ss:$0 sps:$4 sm:$0x11]  }
  0x84   : > { %2167 = vmatmul.mubr.bf16.gmra.mrb[4].mxu1 %v10718_v63  ;;  %9132 = vmatprep.subr.bf16.mxu0 %v9860_v33  ;;  %v610_v63 = vrot.slane %v608_v57, 1  ;;  %v639_v57 = vrot.slane %v637_v41, 1  ;;  %v1229_v14 = vrot.slane %v1227_v61, 1  ;;  %v10898_v41 = vld [vmem:[%s10685_s20 + $0x74] ss:$0 sps:$4 sm:$0x11]  }
  0x85   : > { %2174 = vmatprep.mubr.bf16.mxu1 %v604_v60  ;;  %9179 = vmatpush3.bf16.msra.mxu1 %v9892_v4  ;;  %v10840_v60 = vcombine.low %v372_v52, %v373_v55  ;;  %v374_v4 = vld [vmem:[%s10685_s20 + $0x54] sm:$0xf]  ;;  %v1251_v55 = vshll.u32 %v10898_v41, 16  ;;  %v7685_v35 = vld [vmem:[%s10685_s20 + $0x6c] sm:$0xe] }
  0x86   : > { %v611_v10 = vor.u32 %v610_v63, %v606_v51  ;;  %9180 = vmatprep.subr.bf16.mxu1 %v9897_v18  ;;  %v1217_v51 = vrot.slane %v1215_v40, 1  ;;  %v7643_v63 = vld [vmem:[%s10685_s20 + $0x60] sm:$0xf] }
  0x87   : > { %9133 = vmatpush3.bf16.msra.mxu0 %v9860_v33  ;;  %v1210_v33 = vshll.u32 %v10808_v26, 16  ;;  %v644_v0 = vshll.u32 %v10840_v60, 16 }
  0x88   : > { %9134 = vmatprep.subr.bf16.mxu0 %v9869_v59  ;;  %v616_v19 = vsel %vm568_vm0, %v611_v10, %v615_v5  ;;  %v375_v5 = vld [vmem:[%s10685_s20 + $0x58] sm:$0xf] }
  0x89   : > { %9181 = vmatpush3.bf16.msra.mxu1 %v9897_v18  ;;  %v1212_v45 = vrot.slane %v1210_v33, 1  ;;  %v10859_v10 = vcombine.low %v374_v4, %v375_v5  ;;  %v646_v16 = vrot.slane %v644_v0, 1  ;;  %v1253_v4 = vrot.slane %v1251_v55, 1 }
  0x8a   : > { %1709 = vmatmul.mubr.bf16.gmra.mrb[8].mxu0 %v10733_v13  ;;  %v1201_v13 = vor.u32 %v1200_v11, %v1196_v1  ;;  %9182 = vmatprep.subr.bf16.mxu1 %v9903_v49  ;;  %v10847_v1 = vld [vmem:[%s10685_s20 + $0x64] sm:$0xf] }
  0x8b   : > { %1716 = vmatprep.mubr.bf16.mxu0 %v1194_v9  ;;  %9135 = vmatpush3.bf16.msra.mxu0 %v9869_v59  ;;  %v10857_v8 = vcombine.low %v7643_v63, %v10847_v1  ;;  %v649_v9 = vshll.u32 %v9862_v62, 16  ;;  %v656_v25 = vshll.u32 %v10859_v10, 16  ;;  %v654_v37 = vshrl.u32 %v10859_v10, 16 }
  0x8c   : > { %2175 = vmatmul.mubr.bf16.gmra.mrb[8].mxu1 %v10743_v23  ;;  %9136 = vmatprep.subr.bf16.mxu0 %v9879_v3  ;;  %v7642_v23 = vld [vmem:[%s10685_s20 + $0x58] sm:$0xf]  ;;  %v1206_v44 = vsel %vm568_vm0, %v1201_v13, %v1205_v15  ;;  %v642_v15 = vshrl.u32 %v10840_v60, 16  ;;  %v10880_v13 = vld [vmem:[%s10685_s20 + $0x64] sm:$0xf] }
  0x8d   : > { %2182 = vmatprep.mubr.bf16.mxu1 %v616_v19  ;;  %v10821_v42 = vcombine.low %v7641_v34, %v7642_v23  ;;  %9183 = vmatpush3.bf16.msra.mxu1 %v9903_v49  ;;  %v9866_v19 = vld [vmem:[%s10685_s20 + $0x5c] ss:$0 sps:$4 sm:$0x11]   ;;  %v1232_v31 = vshrl.u32 %v10857_v8, 16  ;;  %v1239_v34 = vshll.u32 %v10865_v17, 16  ;;  %v10893_v39 = vcombine.low %v376_v27, %v10880_v13 }
  0x8e   : > { %9184 = vmatprep.subr.bf16.mxu1 %v9904_v56  ;;  %v647_v28 = vor.u32 %v646_v16, %v642_v15  ;;  %v658_v40 = vrot.slane %v656_v25, 1  ;;  %v10946_v16 = vld [vmem:[%s10685_s20 + $0x7c] sm:$0xf] }
  0x8f   : > { %9137 = vmatpush3.bf16.msra.mxu0 %v9879_v3  ;;  %v1222_v59 = vshll.u32 %v10821_v42, 16  ;;  %v635_v3 = vor.u32 %v634_v54, %v630_v50  ;;  %v1241_v46 = vrot.slane %v1239_v34, 1  ;;  %v668_v49 = vshll.u32 %v10893_v39, 16  ;;  %v10908_v50 = vld [vmem:[%s10685_s20 + $0x7c] sm:$0xf] }
  0x90   : > { %9138 = vmatprep.subr.bf16.mxu0 %v9889_v24  ;;  %v659_v52 = vor.u32 %v658_v40, %v654_v37  ;;  %v1244_v54 = vshrl.u32 %v10889_v36, 16  ;;  %v10967_v34 = vld [vmem:[%s10685_s20 + $0x94] sm:$0xf]  ;;  %v1275_v37 = vshll.u32 %v10952_v21, 16 }
  0x91   : > { %v1224_v6 = vrot.slane %v1222_v59, 1  ;;  %9185 = vmatpush3.bf16.msra.mxu1 %v9904_v56  ;;  %v640_v11 = vsel %vm568_vm0, %v635_v3, %v639_v57  ;;  %v378_v56 = vld [vmem:[%s10685_s20 + $0x6c] sm:$0xf]  ;;  %v666_v59 = vshrl.u32 %v10893_v39, 16  ;;  %v670_v61 = vrot.slane %v668_v49, 1 }
  0x92   : > { %1717 = vmatmul.mubr.bf16.gmra.mrb[12].mxu0 %v10750_v32  ;;  %v1213_v32 = vor.u32 %v1212_v45, %v1208_v38  ;;  %9186 = vmatprep.subr.bf16.mxu1 %v9909_v2  ;;  %v661_v38 = vshll.u32 %v9866_v19, 16 }
  0x93   : > { %1724 = vmatprep.mubr.bf16.mxu0 %v1206_v44  ;;  %9139 = vmatpush3.bf16.msra.mxu0 %v9889_v24  ;;  %v651_v24 = vrot.slane %v649_v9, 1  ;;  %v10901_v44 = vld [vmem:[%s10685_s20 + $0x68] ss:$0 sps:$4 sm:$0x11]  }
  0x94   : > { %2183 = vmatmul.mubr.bf16.gmra.mrb[12].mxu1 %v10765_v48  ;;  %9140 = vmatprep.subr.bf16.mxu0 %v9900_v47  ;;  %v1220_v48 = vshrl.u32 %v10821_v42, 16  ;;  %v1218_v7 = vsel %vm568_vm0, %v1213_v32, %v1217_v51  ;;  %v10914_v51 = vld [vmem:[%s10685_s20 + $0x70] sm:$0xf]  ;;  %v673_v62 = vshll.u32 %v10901_v44, 16 }
  0x95   : > { %2190 = vmatprep.mubr.bf16.mxu1 %v628_v53  ;;  %9187 = vmatpush3.bf16.msra.mxu1 %v9909_v2  ;;  %v652_v23 = vsel %vm568_vm0, %v647_v28, %v651_v24  ;;  %v663_v53 = vrot.slane %v661_v38, 1  ;;  %v10925_v63 = vcombine.low %v378_v56, %v10914_v51  ;;  %v10928_v2 = vld [vmem:[%s10685_s20 + $0x80] ss:$0 sps:$4 sm:$0x11]  }
  0x96   : > { %v1225_v18 = vor.u32 %v1224_v6, %v1220_v48  ;;  %9188 = vmatprep.subr.bf16.mxu1 %v9910_v20  ;;  %v7649_v48 = vld [vmem:[%s10685_s20 + $0x84] sm:$0xf]  ;;  %v10934_v6 = vld [vmem:[%s10685_s20 + $0x88] sm:$0xf] }
  0x97   : > { %9141 = vmatpush3.bf16.msra.mxu0 %v9900_v47  ;;  %v1246_v47 = vshll.u32 %v10889_v36, 16  ;;  %v664_v0 = vsel %vm568_vm0, %v659_v52, %v663_v53  ;;  %v10937_v9 = vld [vmem:[%s10685_s20 + $0x74] ss:$0 sps:$4 sm:$0x11]   ;;  %v10942_v15 = vcombine.low %v7649_v48, %v10934_v6  ;;  %v678_v24 = vshrl.u32 %v10925_v63, 16 }
  0x98   : > { %v1230_v29 = vsel %vm568_vm0, %v1225_v18, %v1229_v14  ;;  %v1263_v14 = vshll.u32 %v10928_v2, 16  ;;  %v685_v27 = vshll.u32 %v10937_v9, 16  ;;  %v1277_v52 = vrot.slane %v1275_v37, 1  ;;  %v11027_v37 = vld [vmem:[%s10685_s20 + $0xac] sm:$0xf] }
  0x99   : > { %9189 = vmatpush3.bf16.msra.mxu1 %v9910_v20  ;;  %v1248_v57 = vrot.slane %v1246_v47, 1  ;;  %v1268_v49 = vshrl.u32 %v10942_v15, 16 }
  0x9a   : > { %1725 = vmatmul.mubr.bf16.gmra.mrb[16].mxu0 %v10774_v58  ;;  %v1234_v58 = vshll.u32 %v10857_v8, 16 }
  0x9b   : > { %1732 = vmatprep.mubr.bf16.mxu0 %v1218_v7  ;;  %v1249_v3 = vor.u32 %v1248_v57, %v1244_v54  ;;  %v675_v7 = vrot.slane %v673_v62, 1  ;;  %v10988_v57 = vld [vmem:[%s10685_s20 + $0x98] ss:$0 sps:$4 sm:$0x11]   ;;  %v7653_v62 = vld [vmem:[%s10685_s20 + $0x9c] sm:$0xf] }
  0x9c   : > { %2191 = vmatmul.mubr.bf16.gmra.mrb[16].mxu1 %v10792_v12  ;;  %v9914_v12 = vld [vmem:[%s13344_s2 + $0x1c0] sm:$0xff]   ;;  %v1236_v33 = vrot.slane %v1234_v58, 1  ;;  %v1287_v48 = vshll.u32 %v10988_v57, 16 }
  0x9d   : > { %2198 = vmatprep.mubr.bf16.mxu1 %v640_v11  ;;  %8582 = vmatprep.subr.bf16.mxu0 %v9914_v12  ;;  %v680_v11 = vshll.u32 %v10925_v63, 16  ;;  %v1254_v18 = vsel %vm568_vm0, %v1249_v3, %v1253_v4  ;;  %v1270_v12 = vshll.u32 %v10942_v15, 16 }
  0x9e   : > { %v1237_v45 = vor.u32 %v1236_v33, %v1232_v31  ;;  %v10963_v33 = vld [vmem:[%s10685_s20 + $0x80] ss:$0 sps:$4 sm:$0x11]  }
  0x9f   : > { %v682_v25 = vrot.slane %v680_v11, 1 }
  0xa1   : > { %v683_v38 = vor.u32 %v682_v25, %v678_v24 }
  0xa2   : > { %1733 = vmatmul.mubr.bf16.gmra.mrb[20].mxu0 %v10808_v26  ;;  %v7647_v26 = vld [vmem:[%s10685_s20 + $0x78] sm:$0xf] }
  0xa3   : > { %1740 = vmatprep.mubr.bf16.mxu0 %v1230_v29  ;;  %v10919_v32 = vcombine.low %v7647_v26, %v10908_v50  ;;  %v1265_v29 = vrot.slane %v1263_v14, 1  ;;  %v1272_v26 = vrot.slane %v1270_v12, 1  ;;  %v11022_v12 = vld [vmem:[%s10685_s20 + $0x98] ss:$0 sps:$4 sm:$0x11]  }
  0xa4   : > { %2199 = vmatmul.mubr.bf16.gmra.mrb[20].mxu1 %v10813_v30  ;;  %v1242_v30 = vsel %vm568_vm0, %v1237_v45, %v1241_v46  ;;  %v382_v45 = vld [vmem:[%s10685_s20 + $0x84] sm:$0xf]  ;;  %v10973_v46 = vld [vmem:[%s10685_s20 + $0x88] sm:$0xf] }
  0xa5   : > { %2206 = vmatprep.mubr.bf16.mxu1 %v652_v23  ;;  %v1258_v5 = vshll.u32 %v10919_v32, 16  ;;  %v1256_v19 = vshrl.u32 %v10919_v32, 16  ;;  %v687_v23 = vrot.slane %v685_v27, 1  ;;  %v10981_v53 = vcombine.low %v382_v45, %v10973_v46 }
  0xa6   : > { %v1289_v27 = vrot.slane %v1287_v48, 1  ;;  %v388_v48 = vld [vmem:[%s10685_s20 + $0xa8] sm:$0xf] }
  0xa7   : > { %v1260_v20 = vrot.slane %v1258_v5, 1  ;;  %v688_v54 = vsel %vm568_vm0, %v683_v38, %v687_v23  ;;  %v704_v3 = vshll.u32 %v10981_v53, 16  ;;  %v11031_v38 = vld [vmem:[%s10685_s20 + $0xa0] sm:$0xf] }
  0xa9   : > { %v1261_v31 = vor.u32 %v1260_v20, %v1256_v19  ;;  %v706_v19 = vrot.slane %v704_v3, 1 }
  0xaa   : > { %1741 = vmatmul.mubr.bf16.gmra.mrb[24].mxu0 %v10821_v42  ;;  %v671_v42 = vor.u32 %v670_v61, %v666_v59  ;;  %v1273_v61 = vor.u32 %v1272_v26, %v1268_v49 }
  0xab   : > { %1748 = vmatprep.mubr.bf16.mxu0 %v1242_v30  ;;  %v697_v30 = vshll.u32 %v10963_v33, 16 }
  0xac   : > { %2207 = vmatmul.mubr.bf16.gmra.mrb[24].mxu1 %v10840_v60  ;;  %v380_v60 = vld [vmem:[%s10685_s20 + $0x78] sm:$0xf]  ;;  %v676_v58 = vsel %vm568_vm0, %v671_v42, %v675_v7  ;;  %v384_v7 = vld [vmem:[%s10685_s20 + $0x90] sm:$0xf]  ;;  %v1278_v11 = vsel %vm568_vm0, %v1273_v61, %v1277_v52  ;;  %v7657_v61 = vld [vmem:[%s10685_s20 + $0xb4] sm:$0xf] }
  0xad   : > { %2214 = vmatprep.mubr.bf16.mxu1 %v664_v0  ;;  %v10958_v28 = vcombine.low %v380_v60, %v10946_v16  ;;  %v10994_v0 = vld [vmem:[%s10685_s20 + $0xa0] sm:$0xf]  ;;  %v699_v5 = vrot.slane %v697_v30, 1  ;;  %v11041_v52 = vld [vmem:[%s10685_s20 + $0xb0] ss:$0 sps:$4 sm:$0x11]  }
  0xae   : > { %v11002_v42 = vcombine.low %v7653_v62, %v10994_v0  ;;  %v11053_v62 = vld [vmem:[%s10685_s20 + $0xb8] sm:$0xf] }
  0xaf   : > { %v692_v40 = vshll.u32 %v10958_v28, 16  ;;  %v690_v55 = vshrl.u32 %v10958_v28, 16 }
  0xb1   : > { %v694_v56 = vrot.slane %v692_v40, 1 }
  0xb2   : > { %1749 = vmatmul.mubr.bf16.gmra.mrb[28].mxu0 %v10857_v8  ;;  %v7651_v8 = vld [vmem:[%s10685_s20 + $0x90] sm:$0xf] }
  0xb3   : > { %1756 = vmatprep.mubr.bf16.mxu0 %v1254_v18  ;;  %v10976_v47 = vcombine.low %v7651_v8, %v10967_v34  ;;  %v695_v4 = vor.u32 %v694_v56, %v690_v55  ;;  %v702_v18 = vshrl.u32 %v10981_v53, 16  ;;  %v7655_v8 = vld [vmem:[%s10685_s20 + $0xa8] sm:$0xf]  ;;  %v721_v56 = vshll.u32 %v11022_v12, 16 }
  0xb4   : > { %2215 = vmatmul.mubr.bf16.gmra.mrb[28].mxu1 %v10859_v10  ;;  %v1266_v10 = vsel %vm568_vm0, %v1261_v31, %v1265_v29  ;;  %v1294_v29 = vshll.u32 %v11002_v42, 16  ;;  %v11038_v26 = vcombine.low %v7655_v8, %v11027_v37  ;;  %v11078_v8 = vld [vmem:[%s10685_s20 + $0xc4] sm:$0xf] }
  0xb5   : > { %2222 = vmatprep.mubr.bf16.mxu1 %v676_v58  ;;  %v1282_v59 = vshll.u32 %v10976_v47, 16  ;;  %v1280_v14 = vshrl.u32 %v10976_v47, 16  ;;  %v11013_v58 = vld [vmem:[%s10685_s20 + $0xa4] ss:$0 sps:$4 sm:$0x11]   ;;  %v700_v24 = vsel %vm568_vm0, %v695_v4, %v699_v5  ;;  %v707_v40 = vor.u32 %v706_v19, %v702_v18 }
  0xb6   : > { %v1299_v49 = vshll.u32 %v11013_v58, 16  ;;  %v1296_v55 = vrot.slane %v1294_v29, 1 }
  0xb7   : > { %v1284_v60 = vrot.slane %v1282_v59, 1  ;;  %v11049_v59 = vld [vmem:[%s10685_s20 + $0xa4] ss:$0 sps:$4 sm:$0x11]  }
  0xb8   : > { %v1301_v18 = vrot.slane %v1299_v49, 1  ;;  %v11089_v49 = vld [vmem:[%s13344_s2 + $0x200] sm:$0xff]  }
  0xb9   : > { %v1285_v31 = vor.u32 %v1284_v60, %v1280_v14  ;;  %v11064_v14 = vld [vmem:[%s10685_s20 + $0xbc] ss:$0 sps:$4 sm:$0x11]   ;;  %13372 = vst [vmem:[#allocation15_spill] sm:$0xff] %v11089_v49  ;;  %9222 = vmatprep.subr.bf16.mxu1 %v11089_v49 }
  0xba   : > { %1757 = vmatmul.mubr.bf16.gmra.mrb[32].mxu0 %v10889_v36  ;;  %v10997_v36 = vld [vmem:[%s10685_s20 + $0x8c] ss:$0 sps:$4 sm:$0x11]  }
  0xbb   : > { %1764 = vmatprep.mubr.bf16.mxu0 %v1266_v10  ;;  %v709_v20 = vshll.u32 %v10997_v36, 16  ;;  %v1292_v10 = vshrl.u32 %v11002_v42, 16 }
  0xbc   : > { %2223 = vmatmul.mubr.bf16.gmra.mrb[32].mxu1 %v10893_v39  ;;  %v11006_v39 = vld [vmem:[%s10685_s20 + $0x94] sm:$0xf] }
  0xbd   : > { %2230 = vmatprep.mubr.bf16.mxu1 %v688_v54  ;;  %v11018_v25 = vcombine.low %v384_v7, %v11006_v39  ;;  %v711_v45 = vrot.slane %v709_v20, 1  ;;  %v1290_v54 = vsel %vm568_vm0, %v1285_v31, %v1289_v27  ;;  %v11060_v7 = vld [vmem:[%s10685_s20 + $0xac] sm:$0xf]  ;;  %v11070_v20 = vcombine.low %v7657_v61, %v11053_v62  ;;  %v7659_v31 = vld [vmem:[%s10685_s20 + $0xc0] sm:$0xf] }
  0xbe   : > { %v1311_v27 = vshll.u32 %v11041_v52, 16  ;;  %v11074_v29 = vcombine.low %v388_v48, %v11060_v7  ;;  %v11094_v61 = vcombine.low %v7659_v31, %v11078_v8  ;;  %v11099_v48 = vld [vmem:[%s10685_s20 + $0xc8] ss:$0 sps:$4 sm:$0x11]   ;;  %v11107_v31 = vld [vmem:[%s10685_s20 + $0xb8] sm:$0xf] }
  0xbf   : > { %v712_v3 = vsel %vm568_vm0, %v707_v40, %v711_v45  ;;  %v714_v4 = vshrl.u32 %v11018_v25, 16  ;;  %v11082_v40 = vld [vmem:[%s10685_s20 + $0xb0] ss:$0 sps:$4 sm:$0x11]   ;;  %v1304_v45 = vshrl.u32 %v11038_v26, 16  ;;  %13374 = vst [vmem:[#allocation17_spill] sm:$0xff] %v11107_v31 }
  0xc0   : > { %13371 = vst [vmem:[#allocation14_spill] sm:$0xff] %v11082_v40  ;;  %13373 = vst [vmem:[#allocation16_spill] sm:$0xff] %v11094_v61  ;;  %v1316_v23 = vshrl.u32 %v11070_v20, 16 }
  0xc2   : > { %1765 = vmatmul.mubr.bf16.gmra.mrb[36].mxu0 %v10919_v32  ;;  %v386_v32 = vld [vmem:[%s10685_s20 + $0x9c] sm:$0xf] }
  0xc3   : > { %1772 = vmatprep.mubr.bf16.mxu0 %v1278_v11  ;;  %v11046_v30 = vcombine.low %v386_v32, %v11031_v38  ;;  %v1306_v11 = vshll.u32 %v11038_v26, 16 }
  0xc4   : > { %2231 = vmatmul.mubr.bf16.gmra.mrb[36].mxu1 %v10925_v63  ;;  %v716_v63 = vshll.u32 %v11018_v25, 16 }
  0xc5   : > { %2238 = vmatprep.mubr.bf16.mxu1 %v700_v24  ;;  %v728_v19 = vshll.u32 %v11046_v30, 16  ;;  %v723_v24 = vrot.slane %v721_v56, 1  ;;  %v1318_v56 = vshll.u32 %v11070_v20, 16 }
  0xc6   : > { %v718_v5 = vrot.slane %v716_v63, 1  ;;  %v726_v63 = vshrl.u32 %v11046_v30, 16 }
  0xc7   : > { %v1320_v49 = vrot.slane %v1318_v56, 1  ;;  %v11121_v56 = vld [vmem:[%s10685_s20 + $0xbc] ss:$0 sps:$4 sm:$0x11]  }
  0xc8   : > { %v719_v32 = vor.u32 %v718_v5, %v714_v4  ;;  %v1323_v4 = vshll.u32 %v11064_v14, 16  ;;  %v740_v5 = vshll.u32 %v11074_v29, 16 }
  0xca   : > { %1773 = vmatmul.mubr.bf16.gmra.mrb[40].mxu0 %v10942_v15  ;;  %v1297_v15 = vor.u32 %v1296_v55, %v1292_v10  ;;  %v1308_v10 = vrot.slane %v1306_v11, 1  ;;  %v730_v55 = vrot.slane %v728_v19, 1  ;;  %v724_v11 = vsel %vm568_vm0, %v719_v32, %v723_v24 }
  0xcb   : > { %1780 = vmatprep.mubr.bf16.mxu0 %v1290_v54  ;;  %v1325_v24 = vrot.slane %v1323_v4, 1  ;;  %v738_v32 = vshrl.u32 %v11074_v29, 16  ;;  %v1425_v4 = vrot.slane %v10865_v17, 1 }
  0xcc   : > { %2239 = vmatmul.mubr.bf16.gmra.mrb[40].mxu1 %v10958_v28  ;;  %v733_v28 = vshll.u32 %v11049_v59, 16  ;;  %v1302_v54 = vsel %vm568_vm0, %v1297_v15, %v1301_v18  ;;  %v745_v18 = vshll.u32 %v11082_v40, 16  ;;  %v1309_v19 = vor.u32 %v1308_v10, %v1304_v45  ;;  %v7684_v10 = vld [vmem:[%s10685_s20 + $0x60] sm:$0xe] }
  0xcd   : > { %2246 = vmatprep.mubr.bf16.mxu1 %v712_v3  ;;  %v1313_v3 = vrot.slane %v1311_v27, 1  ;;  %v390_v27 = vld [vmem:[%s10685_s20 + $0xb4] sm:$0xf]  ;;  %v731_v60 = vor.u32 %v730_v55, %v726_v63  ;;  %v1335_v45 = vshll.u32 %v11099_v48, 16  ;;  %v7732_v55 = vcombine.low %v7684_v10, %v10847_v1  ;;  %v416_v1 = vld [vmem:[%s10685_s20 + $0x60] sm:$0xe] }
  0xce   : > { %v735_v15 = vrot.slane %v733_v28, 1  ;;  %v742_v28 = vrot.slane %v740_v5, 1  ;;  %v11117_v63 = vcombine.low %v390_v27, %v11107_v31  ;;  %v7733_v27 = vcombine.low %v7685_v35, %v10875_v22  ;;  %v7686_v31 = vld [vmem:[%s10685_s20 + $0x78] sm:$0xe] }
  0xcf   : > { %v1424_v43 = vrot.slane %v7732_v55, 1  ;;  %v1431_v35 = vrot.slane %v10928_v2, 1  ;;  %v7621_v22 = vcombine.low %v416_v1, %v10880_v13  ;;  %v854_v13 = vrot.slane %v10937_v9, 1 }
  0xd0   : > { %v736_v40 = vsel %vm568_vm0, %v731_v60, %v735_v15  ;;  %v752_v17 = vshll.u32 %v11117_v63, 16  ;;  %v7734_v60 = vcombine.low %v7686_v31, %v10908_v50  ;;  %v757_v15 = vshll.u32 %v11121_v56, 16 }
  0xd1   : > { %v743_v31 = vor.u32 %v742_v28, %v738_v32  ;;  %v850_v55 = vrot.slane %v7621_v22, 1  ;;  %v7688_v32 = vld [vmem:[%s10685_s20 + $0x90] sm:$0xe]  ;;  %v1437_v28 = vrot.slane %v10988_v57, 1  ;;  %v860_v57 = vrot.slane %v10997_v36, 1 }
  0xd2   : > { %1781 = vmatmul.mubr.bf16.gmra.mrb[44].mxu0 %v10976_v47  ;;  %v1330_v47 = vshll.u32 %v11094_v61, 16  ;;  %v754_v2 = vrot.slane %v752_v17, 1  ;;  %v7736_v1 = vcombine.low %v7688_v32, %v10967_v34  ;;  %v418_v17 = vld [vmem:[%s10685_s20 + $0x78] sm:$0xe]  ;;  %v759_v34 = vrot.slane %v757_v15, 1 }
  0xd3   : > { %1788 = vmatprep.mubr.bf16.mxu0 %v1302_v54  ;;  %v747_v54 = vrot.slane %v745_v18, 1  ;;  %v11127_v18 = vrot.slane %v1335_v45, 1  ;;  %v1430_v45 = vrot.slane %v7734_v60, 1  ;;  %v7623_v60 = vcombine.low %v418_v17, %v10946_v16  ;;  %v10232_v16 = vld [vmem:[%s10685_s20 + $0x4] sm:$0xf] }
  0xd4   : > { %2247 = vmatmul.mubr.bf16.gmra.mrb[44].mxu1 %v10981_v53  ;;  %v1328_v53 = vshrl.u32 %v11094_v61, 16  ;;  %v1332_v5 = vrot.slane %v1330_v47, 1  ;;  %v750_v61 = vshrl.u32 %v11117_v63, 16  ;;  %v1427_v47 = vrot.slane %v7733_v27, 1  ;;  %v7679_v32 = vld [vmem:[%s10685_s20 + $0x24] sm:$0xe] }
  0xd5   : > { %2254 = vmatprep.mubr.bf16.mxu1 %v724_v11  ;;  %v1314_v11 = vsel %vm568_vm0, %v1309_v19, %v1313_v3  ;;  %v11136_v3 = vsel %vm825_vm1, %v1424_v43, %v1425_v4  ;;  %v1428_v19 = vrot.slane %v10898_v41, 1  ;;  %v1321_v43 = vor.u32 %v1320_v49, %v1316_v23  ;;  %v7677_v4 = vld [vmem:[%s10685_s20 + $0xc] sm:$0xe]  ;;  %v7692_v17 = vld [vmem:[%s10685_s20 + $0xc0] sm:$0xe] }
  0xd6   : > { %v851_v41 = vrot.slane %v10901_v44, 1  ;;  %v11154_v23 = vsel %vm825_vm1, %v1430_v45, %v1431_v35  ;;  %v1436_v22 = vrot.slane %v7736_v1, 1  ;;  %v755_v36 = vor.u32 %v754_v2, %v750_v61  ;;  %v420_v61 = vld [vmem:[%s10685_s20 + $0x90] sm:$0xe] }
  0xd7   : > { %v11148_v10 = vsel %vm825_vm1, %v1427_v47, %v1428_v19  ;;  %v748_v19 = vsel %vm568_vm0, %v743_v31, %v747_v54  ;;  %v419_v47 = vld [vmem:[%s10685_s20 + $0x84] sm:$0xe]  ;;  %v863_v2 = vrot.slane %v11022_v12, 1  ;;  %v1446_v1 = vrot.slane %v11064_v14, 1 }
  0xd8   : > { %v11157_v44 = vsel %vm825_vm1, %v850_v55, %v851_v41  ;;  %v1440_v41 = vrot.slane %v11013_v58, 1  ;;  %v760_v12 = vsel %vm568_vm0, %v755_v36, %v759_v34 }
  0xda   : > { %1789 = vmatmul.mubr.bf16.gmra.mrb[48].mxu0 %v11002_v42  ;;  %v417_v42 = vld [vmem:[%s10685_s20 + $0x6c] sm:$0xe] }
  0xdb   : > { %1796 = vmatprep.mubr.bf16.mxu0 %v1314_v11  ;;  %v7622_v50 = vcombine.low %v417_v42, %v10914_v51  ;;  %v7687_v51 = vld [vmem:[%s10685_s20 + $0x84] sm:$0xe]  ;;  %v1326_v11 = vsel %vm568_vm0, %v1321_v43, %v1325_v24  ;;  %v1333_v24 = vor.u32 %v1332_v5, %v1328_v53  ;;  %v10231_v42 = vld [vmem:[%s10685_s20 + $0x10] sm:$0xf]  ;;  %v11184_v53 = vsel %vm825_vm1, %v1436_v22, %v1437_v28  ;;  %v7689_v5 = vld [vmem:[%s10685_s20 + $0x9c] sm:$0xe] }
  0xdc   : > { %2255 = vmatmul.mubr.bf16.gmra.mrb[48].mxu1 %v11018_v25  ;;  %v408_v25 = vld [vmem:[%s10685_s20] sm:$0xe]  ;;  %v7735_v27 = vcombine.low %v7687_v51, %v10934_v6  ;;  %v7624_v6 = vcombine.low %v419_v47, %v10973_v46  ;;  %v7725_v54 = vcombine.low %v7677_v4, %v10231_v42  ;;  %v7737_v45 = vcombine.low %v7689_v5, %v10994_v0  ;;  %v10233_v42 = vld [vmem:[%s10685_s20 + $0x1c] sm:$0xf] }
  0xdd   : > { %2262 = vmatprep.mubr.bf16.mxu1 %v736_v40  ;;  %v853_v49 = vrot.slane %v7622_v50, 1  ;;  %v1434_v40 = vrot.slane %v10952_v21, 1  ;;  %v857_v21 = vrot.slane %v10963_v33, 1  ;;  %v7613_v43 = vcombine.low %v408_v25, %v10232_v16  ;;  %v7690_v50 = vld [vmem:[%s10685_s20 + $0xa8] sm:$0xe] }
  0xde   : > { %v1433_v35 = vrot.slane %v7735_v27, 1  ;;  %v856_v33 = vrot.slane %v7623_v60, 1  ;;  %v859_v46 = vrot.slane %v7624_v6, 1  ;;  %v7738_v55 = vcombine.low %v7690_v50, %v11027_v37  ;;  %v421_v25 = vld [vmem:[%s10685_s20 + $0x9c] sm:$0xe] }
  0xdf   : > { %v11165_v9 = vsel %vm825_vm1, %v853_v49, %v854_v13  ;;  %v7625_v13 = vcombine.low %v420_v61, %v11006_v39  ;;  %v1439_v4 = vrot.slane %v7737_v45, 1  ;;  %v866_v0 = vrot.slane %v11049_v59, 1  ;;  %v7678_v59 = vld [vmem:[%s10685_s20 + $0x18] sm:$0xe]  ;;  %v409_v60 = vld [vmem:[%s10685_s20 + $0xc] sm:$0xe] }
  0xe0   : > { %v11188_v15 = vsel %vm825_vm1, %v856_v33, %v857_v21  ;;  %v11196_v31 = vsel %vm825_vm1, %v859_v46, %v860_v57  ;;  %v1338_v58 = vsel %vm568_vm0, %v1333_v24, %v11127_v18  ;;  %v7626_v51 = vcombine.low %v421_v25, %v11031_v38  ;;  %v10234_v16 = vld [vmem:[%s10685_s20 + $0x28] sm:$0xf]  ;;  %v13377_v33 = vld [vmem:[#allocation12_spill] sm:$0xff]  ;;  %v13380_v61 = vld [vmem:[#allocation13_spill] sm:$0xff] }
  0xe1   : > { %v862_v49 = vrot.slane %v7625_v13, 1  ;;  %v826_v37 = vrot.slane %v7613_v43, 1  ;;  %v11207_v39 = vsel %vm825_vm1, %v1439_v4, %v1440_v41  ;;  %v7740_v47 = vcombine.low %v7692_v17, %v11078_v8  ;;  %v410_v8 = vld [vmem:[%s10685_s20 + $0x18] sm:$0xe]  ;;  %v10235_v41 = vld [vmem:[%s10685_s20 + $0x10] sm:$0xf] }
  0xe2   : > { %1797 = vmatmul.mubr.bf16.gmra.mrb[52].mxu0 %v11038_v26  ;;  %v11181_v26 = vsel %vm825_vm1, %v1433_v35, %v1434_v40  ;;  %v1403_v40 = vrot.slane %v7725_v54, 1  ;;  %v865_v38 = vrot.slane %v7626_v51, 1  ;;  %v423_v35 = vld [vmem:[%s10685_s20 + $0xb4] sm:$0xe]  ;;  %v7726_v54 = vcombine.low %v7678_v59, %v10233_v42  ;;  %v411_v17 = vld [vmem:[%s10685_s20 + $0x24] sm:$0xe] }
  0xe3   : > { %1804 = vmatprep.mubr.bf16.mxu0 %v1326_v11  ;;  %v11217_v28 = vsel %vm825_vm1, %v862_v49, %v863_v2  ;;  %v7691_v11 = vld [vmem:[%s10685_s20 + $0xb4] sm:$0xe]  ;;  %v1448_v22 = vrot.slane %v7740_v47, 1  ;;  %v7727_v43 = vcombine.low %v7679_v32, %v10234_v16  ;;  %v13378_v36 = vrot.slane %v13377_v33, 1  ;;  %v10236_v2 = vld [vmem:[%s10685_s20 + $0x1c] sm:$0xf] }
  0xe4   : > { %2263 = vmatmul.mubr.bf16.gmra.mrb[52].mxu1 %v11046_v30  ;;  %v1443_v30 = vrot.slane %v11041_v52, 1  ;;  %v1442_v52 = vrot.slane %v7738_v55, 1  ;;  %v7739_v27 = vcombine.low %v7691_v11, %v11053_v62  ;;  %v11228_v21 = vsel %vm825_vm1, %v865_v38, %v866_v0  ;;  %v13375_v62 = vld [vmem:[#allocation14_spill] sm:$0xff]  ;;  %v10239_v59 = vld [vmem:[%s10685_s20 + $0x14] ss:$0 sps:$4 sm:$0x11]  }
  0xe5   : > { %2270 = vmatprep.mubr.bf16.mxu1 %v748_v19  ;;  %v422_v19 = vld [vmem:[%s10685_s20 + $0xa8] sm:$0xe]  ;;  %v869_v24 = vrot.slane %v13375_v62, 1  ;;  %v1405_v46 = vsel %vm825_vm1, %v1403_v40, %v13378_v36  ;;  %v7614_v50 = vcombine.low %v409_v60, %v10235_v41  ;;  %v13381_v55 = vrot.slane %v13380_v61, 1  ;;  %v7681_v38 = vld [vmem:[%s10685_s20 + $0x3c] sm:$0xe] }
  0xe6   : > { %v11214_v18 = vsel %vm825_vm1, %v1442_v52, %v1443_v30  ;;  %v7627_v57 = vcombine.low %v422_v19, %v11060_v7  ;;  %v1445_v14 = vrot.slane %v7739_v27, 1  ;;  %v13379_v30 = vld [vmem:[#allocation16_spill] sm:$0xff]  ;;  %v7615_v4 = vcombine.low %v410_v8, %v10236_v2  ;;  %v10238_v51 = vld [vmem:[%s10685_s20 + $0x2c] ss:$0 sps:$4 sm:$0x11]   ;;  %v9926_v33 = vld [vmem:[%s13344_s2 + $0x1d0] sm:$0xff]  }
  0xe7   : > { %v828_v13 = vsel %vm825_vm1, %v826_v37, %v13381_v55  ;;  %v1406_v0 = vrot.slane %v7726_v54, 1  ;;  %v1409_v49 = vrot.slane %v7727_v43, 1  ;;  %v1410_v40 = vrot.slane %v10238_v51, 1  ;;  %v7680_v37 = vld [vmem:[%s10685_s20 + $0x30] sm:$0xe]  ;;  %v9920_v62 = vld [vmem:[%s13344_s2 + $0x1c8] sm:$0xff]  }
  0xe8   : > { %v868_v6 = vrot.slane %v7627_v57, 1  ;;  %v11240_v7 = vsel %vm825_vm1, %v1445_v14, %v1446_v1  ;;  %v830_v32 = vrot.slane %v10239_v59, 1  ;;  %v832_v11 = vrot.slane %v7615_v4, 1  ;;  %v10240_v27 = vld [vmem:[%s10685_s20 + $0x20] ss:$0 sps:$4 sm:$0x11]  }
  0xe9   : > { %v833_v1 = vrot.slane %v10240_v27, 1  ;;  %v10241_v19 = vld [vmem:[%s10685_s20 + $0x34] sm:$0xf]  ;;  %v412_v47 = vld [vmem:[%s10685_s20 + $0x30] sm:$0xe]  ;;  %v1411_v57 = vsel %vm825_vm1, %v1409_v49, %v1410_v40  ;;  %v9942_v42 = vld [vmem:[%s13344_s2 + $0x208] sm:$0xff]  }
  0xea   : > { %1805 = vmatmul.mubr.bf16.gmra.mrb[56].mxu0 %v11070_v20  ;;  %v1449_v20 = vrot.slane %v11099_v48, 1  ;;  %v872_v48 = vrot.slane %v11121_v56, 1  ;;  %v11249_v5 = vsel %vm825_vm1, %v868_v6, %v869_v24  ;;  %v7728_v60 = vcombine.low %v7680_v37, %v10241_v19  ;;  %v10242_v24 = vld [vmem:[%s10685_s20 + $0x40] sm:$0xf]  ;;  %v9922_v8 = vld [vmem:[%s13344_s2 + $0x188] sm:$0xff]   ;;  %v13382_v4 = vld [vmem:[#allocation15_spill] sm:$0xff] }
  0xeb   : > { %1812 = vmatprep.mubr.bf16.mxu0 %v1338_v58  ;;  %v10237_v58 = vld [vmem:[%s10685_s20 + $0x20] ss:$0 sps:$4 sm:$0x11]   ;;  %v7729_v14 = vcombine.low %v7681_v38, %v10242_v24  ;;  %v834_v6 = vsel %vm825_vm1, %v832_v11, %v833_v1  ;;  %v10245_v16 = vld [vmem:[%s10685_s20 + $0x38] ss:$0 sps:$4 sm:$0x11]  }
  0xec   : > { %2271 = vmatmul.mubr.bf16.gmra.mrb[56].mxu1 %v11074_v29  ;;  %v13376_v29 = vld [vmem:[#allocation17_spill] sm:$0xff]  ;;  %v11246_v56 = vsel %vm825_vm1, %v1448_v22, %v1449_v20  ;;  %v1407_v52 = vrot.slane %v10237_v58, 1  ;;  %v1412_v54 = vrot.slane %v7728_v60, 1  ;;  %v1413_v43 = vrot.slane %v10245_v16, 1  ;;  %v7682_v41 = vld [vmem:[%s10685_s20 + $0x48] sm:$0xe] }
  0xed   : > { %2278 = vmatprep.mubr.bf16.mxu1 %v760_v12  ;;  %v7628_v34 = vcombine.low %v423_v35, %v13376_v29  ;;  %v829_v12 = vrot.slane %v7614_v50, 1  ;;  %v9916_v20 = vld [vmem:[%s13344_s2 + $0x180] sm:$0xff]   ;;  %v10244_v29 = vld [vmem:[%s10685_s20 + $0x34] sm:$0xf]  ;;  %v1415_v36 = vrot.slane %v7729_v14, 1  ;;  %v9932_v11 = vld [vmem:[%s13344_s2 + $0x1d8] sm:$0xff]  }
  0xee   : > { %v10248_v55 = vld [vmem:[%s10685_s20 + $0x38] ss:$0 sps:$4 sm:$0x11]   ;;  %v7683_v2 = vld [vmem:[%s10685_s20 + $0x54] sm:$0xe]  ;;  %v1414_v49 = vsel %vm825_vm1, %v1412_v54, %v1413_v43 }
  0xef   : > { %v871_v45 = vrot.slane %v7628_v34, 1  ;;  %v831_v35 = vsel %vm825_vm1, %v829_v12, %v830_v32  ;;  %v7617_v34 = vcombine.low %v412_v47, %v10244_v29  ;;  %v413_v58 = vld [vmem:[%s10685_s20 + $0x3c] sm:$0xe]  ;;  %v10249_v51 = vld [vmem:[%s10685_s20 + $0x4c] sm:$0xf]  ;;  %v9928_v37 = vld [vmem:[%s13344_s2 + $0x190] sm:$0xff]  }
  0xf0   : > { %v7730_v40 = vcombine.low %v7682_v41, %v10249_v51  ;;  %v414_v12 = vld [vmem:[%s10685_s20 + $0x48] sm:$0xe]  ;;  %v10250_v32 = vld [vmem:[%s10685_s20 + $0x58] sm:$0xf]  ;;  %v10251_v1 = vld [vmem:[%s10685_s20 + $0x40] sm:$0xf] }
  0xf1   : > { %v11258_v25 = vsel %vm825_vm1, %v871_v45, %v872_v48  ;;  %v10243_v48 = vld [vmem:[%s10685_s20 + $0x28] sm:$0xf]  ;;  %v7731_v38 = vcombine.low %v7683_v2, %v10250_v32  ;;  %v9950_v60 = vld [vmem:[%s13344_s2 + $0x218] sm:$0xff]   ;;  %v10255_v29 = vld [vmem:[%s10685_s20 + $0x44] ss:$0 sps:$4 sm:$0x11]  }
  0xf2   : > { %1813 = vmatmul.mubr.bf16.gmra.mrb[60].mxu0 %v13379_v30  ;;  %v7616_v22 = vcombine.low %v411_v17, %v10243_v48  ;;  %v10247_v30 = vld [vmem:[%s10685_s20 + $0x2c] ss:$0 sps:$4 sm:$0x11]   ;;  %v7618_v17 = vcombine.low %v413_v58, %v10251_v1  ;;  %v1418_v47 = vrot.slane %v7730_v40, 1  ;;  %v9934_v24 = vld [vmem:[%s13344_s2 + $0x198] sm:$0xff]   ;;  %v9965_v51 = vld [vmem:[%s13344_s2 + $0x230] sm:$0xff]  }
  0xf3   : > { %9142 = vmatprep.mubr.bf16.mxu0 %v1405_v46  ;;  %v10246_v46 = vld [vmem:[%s10685_s20 + $0x44] ss:$0 sps:$4 sm:$0x11]   ;;  %v836_v61 = vrot.slane %v10247_v30, 1  ;;  %v1421_v14 = vrot.slane %v7731_v38, 1  ;;  %v9962_v32 = vld [vmem:[%s13344_s2 + $0x1f8] sm:$0xff]  }
  0xf4   : > { %2279 = vmatmul.mubr.bf16.gmra.mrb[60].mxu1 %v11117_v63  ;;  %v1408_v63 = vsel %vm825_vm1, %v1406_v0, %v1407_v52  ;;  %v1416_v45 = vrot.slane %v10246_v46, 1  ;;  %v835_v50 = vrot.slane %v7616_v22, 1  ;;  %v838_v0 = vrot.slane %v7617_v34, 1  ;;  %v9949_v52 = vld [vmem:[%s13344_s2 + $0x210] sm:$0xff]   ;;  %v9938_v22 = vld [vmem:[%s13344_s2 + $0x1e0] sm:$0xff]  }
  0xf5   : > { %9190 = vmatprep.mubr.bf16.mxu1 %v828_v13  ;;  %v839_v13 = vrot.slane %v10248_v55, 1  ;;  %v842_v34 = vrot.slane %v10255_v29, 1  ;;  %v10256_v54 = vld [vmem:[%s10685_s20 + $0x50] ss:$0 sps:$4 sm:$0x11]   ;;  %v9958_v55 = vld [vmem:[%s13344_s2 + $0x228] sm:$0xff]  }
  0xf6   : > { %v1417_v59 = vsel %vm825_vm1, %v1415_v36, %v1416_v45  ;;  %v837_v27 = vsel %vm825_vm1, %v835_v50, %v836_v61  ;;  %v845_v16 = vrot.slane %v10256_v54, 1  ;;  %v415_v43 = vld [vmem:[%s10685_s20 + $0x54] sm:$0xe]  ;;  %v9940_v36 = vld [vmem:[%s13344_s2 + $0x1a0] sm:$0xff]   ;;  %v9946_v45 = vld [vmem:[%s13344_s2 + $0x1e8] sm:$0xff]  }
  0xf7   : > { %v10257_v50 = vld [vmem:[%s10685_s20 + $0x58] sm:$0xf]  ;;  %v11372_v38 = vld [vmem:[%s10685_s20 + $0x20] ss:$0 sps:$4 sm:$0x11]  }
  0xf8   : > { %v7620_v30 = vcombine.low %v415_v43, %v10257_v50  ;;  %v7837_v2 = vld [vmem:[%s10685_s20 + $0x18] sm:$0xf]  ;;  %v7840_v1 = vld [vmem:[%s10685_s20 + $0x28] sm:$0xf]  ;;  %v7888_v54 = vld [vmem:[%s10685_s20 + $0x3c] sm:$0xe] }
  0xfa   : > { %9143 = vmatmul.mubr.bf16.vlgmr.msra.gmra.mrb[64].mxu0 %v1408_v63  ;;  %v840_v63 = vsel %vm825_vm1, %v838_v0, %v839_v13  ;;  %v9948_v13 = vld [vmem:[%s13344_s2 + $0x1a8] sm:$0xff]   ;;  %v9954_v0 = vld [vmem:[%s13344_s2 + $0x1f0] sm:$0xff]   ;;  %v847_v58 = vrot.slane %v7620_v30, 1 }
  0xfb   : > { %8583 = vmatpush3.bf16.msra.mxu0 %v9916_v20  ;;  %9146 = vmatprep.mubr.bf16.mxu0 %v1411_v57  ;;  %v10252_v20 = vld [vmem:[%s10685_s20 + $0x4c] sm:$0xf]  ;;  %v10253_v57 = vld [vmem:[%s10685_s20 + $0x50] ss:$0 sps:$4 sm:$0x11]  }
  0xfc   : > { %9191 = vmatmul.mubr.bf16.vlgmr.msra.gmra.mrb[64].mxu1 %v831_v35  ;;  %8584 = vmatprep.subr.bf16.mxu0 %v9920_v62  ;;  %v7619_v19 = vcombine.low %v414_v12, %v10252_v20  ;;  %v1419_v62 = vrot.slane %v10253_v57, 1  ;;  %v10254_v35 = vld [vmem:[%s10685_s20 + $0x5c] ss:$0 sps:$4 sm:$0x11]   ;;  %v9956_v12 = vld [vmem:[%s13344_s2 + $0x1b0] sm:$0xff]  }
  0xfd   : > { %9194 = vmatprep.mubr.bf16.mxu1 %v834_v6  ;;  %9223 = vmatpush3.bf16.msra.mxu1 %v13382_v4  ;;  %v1422_v48 = vrot.slane %v10254_v35, 1  ;;  %v841_v6 = vrot.slane %v7618_v17, 1  ;;  %v7838_v4 = vld [vmem:[%s10685_s20 + $0x1c] sm:$0xf]  ;;  %v7886_v17 = vld [vmem:[%s10685_s20 + $0x24] sm:$0xe] }
  0xfe   : > { %9224 = vmatprep.subr.bf16.mxu1 %v9942_v42  ;;  %v11361_v40 = vcombine.low %v7837_v2, %v7838_v4  ;;  %v9966_v20 = vld [vmem:[%s13344_s2 + $0x238] sm:$0xff]   ;;  %v7842_v57 = vld [vmem:[%s10685_s20 + $0x34] sm:$0xf] }
  0xff   : > { %8585 = vmatpush3.bf16.msra.mxu0 %v9922_v8  ;;  %v9957_v8 = vld [vmem:[%s13344_s2 + $0x220] sm:$0xff]   ;;  %v1423_v46 = vsel %vm825_vm1, %v1421_v14, %v1422_v48  ;;  %v843_v41 = vsel %vm825_vm1, %v841_v6, %v842_v34  ;;  %v7934_v14 = vcombine.low %v7886_v17, %v7840_v1  ;;  %v11400_v48 = vld [vmem:[%s10685_s20 + $0x38] ss:$0 sps:$4 sm:$0x11]  }
 0x100   : > { %8586 = vmatprep.subr.bf16.mxu0 %v9926_v33  ;;  %v1420_v33 = vsel %vm825_vm1, %v1418_v47, %v1419_v62  ;;  %v7841_v47 = vld [vmem:[%s10685_s20 + $0x30] sm:$0xf]  ;;  %v2665_v62 = vshll.u32 %v11372_v38, 16  ;;  %v2658_v35 = vshrl.u32 %v11361_v40, 16 }
 0x101   : > { %9225 = vmatpush3.bf16.msra.mxu1 %v9942_v42  ;;  %v844_v42 = vrot.slane %v7619_v19, 1  ;;  %v2660_v19 = vshll.u32 %v11361_v40, 16  ;;  %v11404_v29 = vcombine.low %v7841_v47, %v7842_v57  ;;  %v11464_v47 = vld [vmem:[%s10685_s20 + $0x70] sm:$0xf] }
 0x102   : > { %9147 = vmatmul.mubr.bf16.gmra.mrb[68].mxu0 %v1414_v49  ;;  %9226 = vmatprep.subr.bf16.mxu1 %v9949_v52 }
 0x103   : > { %9150 = vmatprep.mubr.bf16.mxu0 %v1417_v59  ;;  %8587 = vmatpush3.bf16.msra.mxu0 %v9928_v37  ;;  %v846_v61 = vsel %vm825_vm1, %v844_v42, %v845_v16  ;;  %v7885_v37 = vld [vmem:[%s10685_s20 + $0x18] sm:$0xe]  ;;  %v7839_v59 = vld [vmem:[%s10685_s20 + $0x24] sm:$0xf]  ;;  %v7844_v42 = vld [vmem:[%s10685_s20 + $0x40] sm:$0xf] }
 0x104   : > { %9195 = vmatmul.mubr.bf16.gmra.mrb[68].mxu1 %v837_v27  ;;  %8588 = vmatprep.subr.bf16.mxu0 %v9932_v11  ;;  %v7933_v27 = vcombine.low %v7885_v37, %v7838_v4  ;;  %v11410_v16 = vld [vmem:[%s10685_s20 + $0x44] ss:$0 sps:$4 sm:$0x11]   ;;  %v11412_v43 = vrot.slane %v2660_v19, 1  ;;  %v7936_v50 = vcombine.low %v7888_v54, %v7844_v42  ;;  %v2682_v30 = vshrl.u32 %v11404_v29, 16 }
 0x105   : > { %9198 = vmatprep.mubr.bf16.mxu1 %v840_v63  ;;  %9227 = vmatpush3.bf16.msra.mxu1 %v9949_v52  ;;  %v10258_v52 = vld [vmem:[%s10685_s20 + $0x5c] ss:$0 sps:$4 sm:$0x11]   ;;  %v2684_v2 = vshll.u32 %v11404_v29, 16  ;;  %v7846_v4 = vld [vmem:[%s10685_s20 + $0x4c] sm:$0xf] }
 0x106   : > { %9228 = vmatprep.subr.bf16.mxu1 %v9950_v60  ;;  %v848_v49 = vrot.slane %v10258_v52, 1  ;;  %v9964_v63 = vld [vmem:[%s13344_s2 + $0x1b8] sm:$0xff]   ;;  %v7889_v52 = vld [vmem:[%s10685_s20 + $0x48] sm:$0xe]  ;;  %v7890_v37 = vld [vmem:[%s10685_s20 + $0x54] sm:$0xe] }
 0x107   : > { %8589 = vmatpush3.bf16.msra.mxu0 %v9934_v24  ;;  %v11393_v24 = vld [vmem:[%s10685_s20 + $0x2c] ss:$0 sps:$4 sm:$0x11]  }
 0x108   : > { %8590 = vmatprep.subr.bf16.mxu0 %v9938_v22  ;;  %v849_v11 = vsel %vm825_vm1, %v847_v58, %v848_v49  ;;  %v2677_v6 = vshll.u32 %v11393_v24, 16  ;;  %v2923_v58 = vrot.slane %v11410_v16, 1  ;;  %v7845_v49 = vld [vmem:[%s10685_s20 + $0x48] sm:$0xf] }
 0x109   : > { %9229 = vmatpush3.bf16.msra.mxu1 %v9950_v60  ;;  %v11385_v60 = vcombine.low %v7839_v59, %v7840_v1  ;;  %v7937_v59 = vcombine.low %v7889_v52, %v7846_v4  ;;  %v2686_v1 = vrot.slane %v2684_v2, 1  ;;  %v11460_v19 = vcombine.low %v7845_v49, %v7846_v4  ;;  %v11478_v2 = vld [vmem:[%s10685_s20 + $0x74] ss:$0 sps:$4 sm:$0x11]   ;;  %v7893_v49 = vld [vmem:[%s10685_s20 + $0x78] sm:$0xe] }
 0x10a   : > { %9151 = vmatmul.mubr.bf16.gmra.mrb[72].mxu0 %v1420_v33  ;;  %9230 = vmatprep.subr.bf16.mxu1 %v9957_v8  ;;  %v11416_v33 = vrot.slane %v7934_v14, 1  ;;  %v7847_v52 = vld [vmem:[%s10685_s20 + $0x54] sm:$0xf] }
 0x10b   : > { %9154 = vmatprep.mubr.bf16.mxu0 %v1423_v46  ;;  %8591 = vmatpush3.bf16.msra.mxu0 %v9940_v36  ;;  %v2672_v22 = vshll.u32 %v11385_v60, 16  ;;  %v2917_v36 = vrot.slane %v11393_v24, 1  ;;  %v7843_v46 = vld [vmem:[%s10685_s20 + $0x3c] sm:$0xf]  ;;  %v2708_v4 = vshll.u32 %v11460_v19, 16 }
 0x10c   : > { %9199 = vmatmul.mubr.bf16.gmra.mrb[72].mxu1 %v843_v41  ;;  %8592 = vmatprep.subr.bf16.mxu0 %v9946_v45  ;;  %v2670_v45 = vshrl.u32 %v11385_v60, 16  ;;  %v2920_v41 = vrot.slane %v11400_v48, 1 }
 0x10d   : > { %9202 = vmatprep.mubr.bf16.mxu1 %v846_v61  ;;  %9231 = vmatpush3.bf16.msra.mxu1 %v9957_v8  ;;  %v11414_v8 = vrot.slane %v2665_v62, 1  ;;  %v11424_v61 = vrot.slane %v2672_v22, 1  ;;  %v2925_v62 = vrot.slane %v7937_v59, 1  ;;  %v11490_v59 = vld [vmem:[%s10685_s20 + $0x80] ss:$0 sps:$4 sm:$0x11]  }
 0x10e   : > { %9232 = vmatprep.subr.bf16.mxu1 %v9958_v55 }
 0x10f   : > { %8593 = vmatpush3.bf16.msra.mxu0 %v9948_v13 }
 0x110   : > { %8594 = vmatprep.subr.bf16.mxu0 %v9954_v0  ;;  %v11433_v0 = vcombine.low %v7843_v46, %v7844_v42 }
 0x111   : > { %9233 = vmatpush3.bf16.msra.mxu1 %v9958_v55  ;;  %v11426_v55 = vrot.slane %v2677_v6, 1 }
 0x112   : > { %9155 = vmatmul.mubr.bf16.gmra.mrb[76].mxu0 %v11136_v3  ;;  %9234 = vmatprep.subr.bf16.mxu1 %v9965_v51  ;;  %v7887_v3 = vld [vmem:[%s10685_s20 + $0x30] sm:$0xe]  ;;  %v2694_v6 = vshrl.u32 %v11433_v0, 16 }
 0x113   : > { %9158 = vmatprep.mubr.bf16.mxu0 %v11148_v10  ;;  %8595 = vmatpush3.bf16.msra.mxu0 %v9956_v12  ;;  %v11397_v10 = vrot.slane %v7933_v27, 1  ;;  %v7935_v34 = vcombine.low %v7887_v3, %v7842_v57  ;;  %v11443_v12 = vrot.slane %v7936_v50, 1  ;;  %v7891_v27 = vld [vmem:[%s10685_s20 + $0x60] sm:$0xe]  ;;  %v7892_v57 = vld [vmem:[%s10685_s20 + $0x6c] sm:$0xe] }
 0x114   : > { %9203 = vmatmul.mubr.bf16.gmra.mrb[76].mxu1 %v849_v11  ;;  %8596 = vmatprep.subr.bf16.mxu0 %v9962_v32  ;;  %v11449_v32 = vld [vmem:[%s10685_s20 + $0x5c] ss:$0 sps:$4 sm:$0x11]   ;;  %v11452_v11 = vld [vmem:[%s10685_s20 + $0x64] sm:$0xf]  ;;  %v7940_v54 = vcombine.low %v7892_v57, %v11464_v47 }
 0x115   : > { %9206 = vmatprep.mubr.bf16.mxu1 %v11157_v44  ;;  %9235 = vmatpush3.bf16.msra.mxu1 %v9965_v51  ;;  %v2914_v44 = vrot.slane %v11372_v38, 1  ;;  %v11428_v13 = vrot.slane %v7935_v34, 1  ;;  %v7848_v51 = vld [vmem:[%s10685_s20 + $0x58] sm:$0xf]  ;;  %v2706_v34 = vshrl.u32 %v11460_v19, 16  ;;  %v2687_v38 = vor.u32 %v2686_v1, %v2682_v30 }
 0x116   : > { %9236 = vmatprep.subr.bf16.mxu1 %v9966_v20  ;;  %v7938_v17 = vcombine.low %v7890_v37, %v7848_v51  ;;  %v11560_v1 = vld [vmem:[%s10685_s20 + $0x8c] ss:$0 sps:$4 sm:$0x11]  }
 0x117   : > { %8597 = vmatpush3.bf16.msra.mxu0 %v9964_v63  ;;  %v2701_v63 = vshll.u32 %v11410_v16, 16 }
 0x118   : > { %v2928_v22 = vrot.slane %v7938_v17, 1  ;;  %v11499_v17 = vcombine.low %v7847_v52, %v7848_v51 }
 0x119   : > { %9237 = vmatpush3.bf16.msra.mxu1 %v9966_v20  ;;  %v11458_v20 = vld [vmem:[%s10685_s20 + $0x68] ss:$0 sps:$4 sm:$0x11]  }
 0x11a   : > { %9159 = vmatmul.mubr.bf16.gmra.mrb[80].mxu0 %v11154_v23  ;;  %v2689_v23 = vshll.u32 %v11400_v48, 16  ;;  %v2932_v50 = vrot.slane %v11458_v20, 1  ;;  %v2720_v57 = vshll.u32 %v11499_v17, 16 }
 0x11b   : > { %9162 = vmatprep.mubr.bf16.mxu0 %v11181_v26  ;;  %v11446_v26 = vld [vmem:[%s10685_s20 + $0x50] ss:$0 sps:$4 sm:$0x11]  }
 0x11c   : > { %9207 = vmatmul.mubr.bf16.gmra.mrb[80].mxu1 %v11165_v9  ;;  %v2696_v9 = vshll.u32 %v11433_v0, 16  ;;  %v2691_v3 = vrot.slane %v2689_v23, 1  ;;  %v2926_v14 = vrot.slane %v11446_v26, 1  ;;  %v11482_v23 = vld [vmem:[%s10685_s20 + $0x7c] sm:$0xf]  ;;  %v2713_v37 = vshll.u32 %v11446_v26, 16 }
 0x11d   : > { %9210 = vmatprep.mubr.bf16.mxu1 %v11188_v15  ;;  %v7939_v15 = vcombine.low %v7891_v27, %v11452_v11  ;;  %v2663_v27 = vor.u32 %v11412_v43, %v2658_v35  ;;  %v2725_v35 = vshll.u32 %v11449_v32, 16  ;;  %v2675_v43 = vor.u32 %v11424_v61, %v2670_v45  ;;  %v7849_v45 = vld [vmem:[%s10685_s20 + $0x60] sm:$0xf] }
 0x11e   : > { %v2698_v42 = vrot.slane %v2696_v9, 1  ;;  %v2935_v9 = vrot.slane %v11478_v2, 1  ;;  %v2715_v26 = vrot.slane %v2713_v37, 1  ;;  %v2692_v24 = vsel %vm568_vm0, %v2687_v38, %v2691_v3 }
 0x11f   : > { %v2931_v46 = vrot.slane %v7939_v15, 1  ;;  %v2737_v38 = vshll.u32 %v11458_v20, 16 }
 0x120   : > { %v2699_v48 = vor.u32 %v2698_v42, %v2694_v6  ;;  %v11566_v6 = vld [vmem:[%s10685_s20 + $0x98] ss:$0 sps:$4 sm:$0x11]  }
 0x122   : > { %9163 = vmatmul.mubr.bf16.gmra.mrb[84].mxu0 %v11184_v53  ;;  %v2929_v53 = vrot.slane %v11449_v32, 1 }
 0x123   : > { %9166 = vmatprep.mubr.bf16.mxu0 %v11207_v39  ;;  %v2703_v39 = vrot.slane %v2701_v63, 1  ;;  %v2710_v63 = vrot.slane %v2708_v4, 1 }
 0x124   : > { %9211 = vmatmul.mubr.bf16.gmra.mrb[84].mxu1 %v11196_v31  ;;  %v11486_v31 = vrot.slane %v7940_v54, 1  ;;  %v2930_v16 = vsel %vm825_vm1, %v2928_v22, %v2929_v53 }
 0x125   : > { %9214 = vmatprep.mubr.bf16.mxu1 %v11217_v28  ;;  %v7941_v28 = vcombine.low %v7893_v49, %v11482_v23  ;;  %v2711_v30 = vor.u32 %v2710_v63, %v2706_v34 }
 0x126   : > { %v2936_v53 = vsel %vm825_vm1, %v11486_v31, %v2935_v9 }
 0x127   : > { %v11503_v15 = vrot.slane %v7941_v28, 1  ;;  %v2716_v22 = vsel %vm568_vm0, %v2711_v30, %v2715_v26  ;;  %v2944_v26 = vrot.slane %v11566_v6, 1  ;;  %v7853_v30 = vld [vmem:[%s10685_s20 + $0x78] sm:$0xf] }
 0x12a   : > { %9167 = vmatmul.mubr.bf16.gmra.mrb[88].mxu0 %v11214_v18  ;;  %v2938_v18 = vrot.slane %v11490_v59, 1 }
 0x12b   : > { %9170 = vmatprep.mubr.bf16.mxu0 %v11240_v7  ;;  %v2718_v7 = vshrl.u32 %v11499_v17, 16 }
 0x12c   : > { %9215 = vmatmul.mubr.bf16.gmra.mrb[88].mxu1 %v11228_v21  ;;  %v2668_v21 = vsel %vm568_vm0, %v2663_v27, %v11414_v8  ;;  %v2680_v8 = vsel %vm568_vm0, %v2675_v43, %v11426_v55  ;;  %v2941_v27 = vrot.slane %v11560_v1, 1 }
 0x12d   : > { %9218 = vmatprep.mubr.bf16.mxu1 %v11249_v5  ;;  %v2915_v5 = vsel %vm825_vm1, %v11397_v10, %v2914_v44  ;;  %v2924_v10 = vsel %vm825_vm1, %v11443_v12, %v2923_v58  ;;  %v11541_v44 = vld [vmem:[%s10685_s20 + $0x88] sm:$0xf]  ;;  %v7895_v58 = vld [vmem:[%s10685_s20 + $0x90] sm:$0xe]  ;;  %v11557_v12 = vcombine.low %v7849_v45, %v11452_v11  ;;  %v2727_v11 = vrot.slane %v2725_v35, 1 }
 0x12e   : > { %v7897_v35 = vld [vmem:[%s10685_s20 + $0xa8] sm:$0xe]  ;;  %v11614_v45 = vld [vmem:[%s10685_s20 + $0xb0] ss:$0 sps:$4 sm:$0x11]  }
 0x12f   : > { %v2732_v52 = vshll.u32 %v11557_v12, 16 }
 0x132   : > { %9171 = vmatmul.mubr.bf16.gmra.mrb[92].mxu0 %v11246_v56  ;;  %v2918_v56 = vsel %vm825_vm1, %v11416_v33, %v2917_v36  ;;  %v7894_v33 = vld [vmem:[%s10685_s20 + $0x84] sm:$0xe]  ;;  %v2704_v36 = vsel %vm568_vm0, %v2699_v48, %v2703_v39 }
 0x133   : > { %3202 = vmatprep.mubr.bf16.mxu0 %v2668_v21 }
 0x134   : > { %9219 = vmatmul.mubr.bf16.gmra.mrb[92].mxu1 %v11258_v25  ;;  %v2921_v25 = vsel %vm825_vm1, %v11428_v13, %v2920_v41  ;;  %v7942_v41 = vcombine.low %v7894_v33, %v11541_v44  ;;  %v11553_v13 = vld [vmem:[%s10685_s20 + $0x94] sm:$0xf] }
 0x135   : > { %9238 = vmatprep.mubr.bf16.mxu1 %v2915_v5  ;;  %v7943_v4 = vcombine.low %v7895_v58, %v11553_v13 }
 0x136   : > { %v2940_v55 = vrot.slane %v7942_v41, 1 }
 0x137   : > { %v2943_v63 = vrot.slane %v7943_v4, 1 }
 0x13a   : > { %3203 = vmatmul.mubr.bf16.vlgmr.msra.gmra.mrb[96].mxu0 %v11361_v40  ;;  %v2927_v40 = vsel %vm825_vm1, %v2925_v62, %v2926_v14 }
 0x13b   : > { %3210 = vmatprep.mubr.bf16.mxu0 %v2680_v8 }
 0x13c   : > { %9239 = vmatmul.mubr.bf16.vlgmr.msra.gmra.mrb[64].mxu1 %v2918_v56  ;;  %v2730_v56 = vshrl.u32 %v11557_v12, 16 }
 0x13d   : > { %9242 = vmatprep.mubr.bf16.mxu1 %v2921_v25  ;;  %v2734_v25 = vrot.slane %v2732_v52, 1 }
 0x142   : > { %3211 = vmatmul.mubr.bf16.gmra.mrb[100].mxu0 %v11385_v60  ;;  %v2933_v60 = vsel %vm825_vm1, %v2931_v46, %v2932_v50  ;;  %v7851_v46 = vld [vmem:[%s10685_s20 + $0x6c] sm:$0xf]  ;;  %v2939_v50 = vsel %vm825_vm1, %v11503_v15, %v2938_v18  ;;  %v7896_v15 = vld [vmem:[%s10685_s20 + $0x9c] sm:$0xe] }
 0x143   : > { %3218 = vmatprep.mubr.bf16.mxu0 %v2692_v24  ;;  %v11591_v18 = vcombine.low %v7851_v46, %v11464_v47  ;;  %v2942_v47 = vsel %vm825_vm1, %v2940_v55, %v2941_v27  ;;  %v2739_v55 = vrot.slane %v2737_v38, 1  ;;  %v7899_v46 = vld [vmem:[%s10685_s20 + $0xc0] sm:$0xe]  ;;  %v2749_v27 = vshll.u32 %v11478_v2, 16 }
 0x144   : > { %9243 = vmatmul.mubr.bf16.gmra.mrb[68].mxu1 %v2924_v10  ;;  %v11604_v10 = vld [vmem:[%s10685_s20 + $0xa4] ss:$0 sps:$4 sm:$0x11]  }
 0x145   : > { %9246 = vmatprep.mubr.bf16.mxu1 %v2927_v40 }
 0x14a   : > { %3219 = vmatmul.mubr.bf16.gmra.mrb[104].mxu0 %v11404_v29  ;;  %v2722_v29 = vrot.slane %v2720_v57, 1  ;;  %v11594_v57 = vld [vmem:[%s10685_s20 + $0xac] sm:$0xf] }
 0x14b   : > { %3226 = vmatprep.mubr.bf16.mxu0 %v2704_v36  ;;  %v7945_v20 = vcombine.low %v7897_v35, %v11594_v57 }
 0x14c   : > { %9247 = vmatmul.mubr.bf16.gmra.mrb[72].mxu1 %v2930_v16  ;;  %v2723_v37 = vor.u32 %v2722_v29, %v2718_v7  ;;  %v2945_v16 = vsel %vm825_vm1, %v2943_v63, %v2944_v26  ;;  %v2947_v29 = vrot.slane %v11604_v10, 1  ;;  %v11641_v63 = vld [vmem:[%s10685_s20 + $0xbc] ss:$0 sps:$4 sm:$0x11]  }
 0x14d   : > { %v8326_v61 = vpop.f32.mrb[0].mxu0  ;;  %9250 = vmatprep.mubr.bf16.mxu1 %v2933_v60 }
 0x14e   : > { %v8327_v51 = vpop.f32.mrb[1].mxu0  ;;  %v2728_v8 = vsel %vm568_vm0, %v2723_v37, %v2727_v11  ;;  %v2742_v37 = vshrl.u32 %v11591_v18, 16 }
 0x14f   : > { %v8329_v32 = vpop.f32.mrb[2].mxu0  ;;  %v8462_v3 = vpop.f32.mrb[0].mxu1  ;;  %v11562_v62 = vadd.f32 %v8327_v51, %v8326_v61  ;;  %v2735_v61 = vor.u32 %v2734_v25, %v2730_v56  ;;  %v7855_v25 = vld [vmem:[%s10685_s20 + $0x84] sm:$0xf] }
 0x150   : > { %v8330_v14 = vpop.f32.mrb[3].mxu0  ;;  %v8463_v34 = vpop.f32.mrb[1].mxu1 }
 0x151   : > { %v11570_v42 = vadd.f32 %v8463_v34, %v8462_v3  ;;  %v8465_v54 = vpop.f32.mrb[2].mxu1  ;;  %v11572_v39 = vadd.f32 %v8330_v14, %v8329_v32  ;;  %v11623_v32 = vld [vmem:[%s10685_s20 + $0xb8] sm:$0xf]  ;;  %v2949_v14 = vrot.slane %v7945_v20, 1  ;;  %v7898_v34 = vld [vmem:[%s10685_s20 + $0xb4] sm:$0xe] }
 0x152   : > { %3227 = vmatmul.mubr.bf16.gmra.mrb[108].mxu0 %v11433_v0  ;;  %v8466_v49 = vpop.f32.mrb[3].mxu1  ;;  %v11585_v0 = vld [vmem:[%s10685_s20 + $0xa0] sm:$0xf]  ;;  %v7946_v26 = vcombine.low %v7898_v34, %v11623_v32  ;;  %v2761_v34 = vshll.u32 %v11490_v59, 16  ;;  %v7857_v59 = vld [vmem:[%s10685_s20 + $0x90] sm:$0xf] }
 0x153   : > { %3234 = vmatprep.mubr.bf16.mxu0 %v2716_v22  ;;  %v11580_v31 = vadd.f32 %v8466_v49, %v8465_v54  ;;  %v7944_v40 = vcombine.low %v7896_v15, %v11585_v0  ;;  %v2950_v22 = vrot.slane %v11614_v45, 1  ;;  %v11631_v54 = vld [vmem:[%s10685_s20 + $0xc4] sm:$0xf]  ;;  %v2740_v49 = vsel %vm568_vm0, %v2735_v61, %v2739_v55  ;;  %v7900_v61 = vld [vmem:[%s10685_s20 + $0xcc] sm:$0xe] }
 0x154   : > { %9251 = vmatmul.mubr.bf16.gmra.mrb[76].mxu1 %v2936_v53  ;;  %v11628_v53 = vcombine.low %v7853_v30, %v11482_v23  ;;  %v7947_v2 = vcombine.low %v7899_v46, %v11631_v54  ;;  %v11665_v55 = vcombine.low %v7855_v25, %v11541_v44 }
 0x155   : > { %v8332_v28 = vpop.f32.mrb[4].mxu0  ;;  %9254 = vmatprep.mubr.bf16.mxu1 %v2939_v50  ;;  %v2946_v51 = vrot.slane %v7944_v40, 1 }
 0x156   : > { %v8333_v9 = vpop.f32.mrb[5].mxu0 }
 0x157   : > { %v8335_v21 = vpop.f32.mrb[6].mxu0  ;;  %v8468_v7 = vpop.f32.mrb[4].mxu1  ;;  %v11597_v5 = vadd.f32 %v8333_v9, %v8332_v28  ;;  %v2948_v23 = vsel %vm825_vm1, %v2946_v51, %v2947_v29 }
 0x158   : > { %v8336_v43 = vpop.f32.mrb[7].mxu0  ;;  %v8469_v24 = vpop.f32.mrb[5].mxu1 }
 0x159   : > { %v11607_v48 = vadd.f32 %v8469_v24, %v8468_v7  ;;  %v8471_v33 = vpop.f32.mrb[6].mxu1  ;;  %v11609_v36 = vadd.f32 %v8336_v43, %v8335_v21  ;;  %v2951_v7 = vsel %vm825_vm1, %v2949_v14, %v2950_v22  ;;  %v11651_v43 = vld [vmem:[%s10685_s20 + $0xc8] ss:$0 sps:$4 sm:$0x11]   ;;  %v2751_v24 = vrot.slane %v2749_v27, 1 }
 0x15a   : > { %3235 = vmatmul.mubr.bf16.gmra.mrb[112].mxu0 %v11460_v19  ;;  %v8472_v41 = vpop.f32.mrb[7].mxu1  ;;  %v2744_v19 = vshll.u32 %v11591_v18, 16  ;;  %v2956_v30 = vrot.slane %v11651_v43, 1  ;;  %v2754_v14 = vshrl.u32 %v11628_v53, 16 }
 0x15b   : > { %3242 = vmatprep.mubr.bf16.mxu0 %v2728_v8  ;;  %v11617_v60 = vadd.f32 %v8472_v41, %v8471_v33  ;;  %v2953_v33 = vrot.slane %v11641_v63, 1  ;;  %v2955_v41 = vrot.slane %v7947_v2, 1 }
 0x15c   : > { %9255 = vmatmul.mubr.bf16.gmra.mrb[80].mxu1 %v2942_v47  ;;  %v2746_v28 = vrot.slane %v2744_v19, 1  ;;  %v2756_v47 = vshll.u32 %v11628_v53, 16 }
 0x15d   : > { %v8338_v58 = vpop.f32.mrb[8].mxu0  ;;  %9258 = vmatprep.mubr.bf16.mxu1 %v2945_v16  ;;  %v11660_v16 = vld [vmem:[%s10685_s20 + $0xd0] sm:$0xf] }
 0x15e   : > { %v8339_v3 = vpop.f32.mrb[9].mxu0  ;;  %v2747_v38 = vor.u32 %v2746_v28, %v2742_v37  ;;  %v2758_v22 = vrot.slane %v2756_v47, 1  ;;  %v7948_v44 = vcombine.low %v7900_v61, %v11660_v16  ;;  %v2957_v28 = vsel %vm825_vm1, %v2955_v41, %v2956_v30 }
 0x15f   : > { %v8341_v11 = vpop.f32.mrb[10].mxu0  ;;  %v8474_v50 = vpop.f32.mrb[8].mxu1  ;;  %v11634_v4 = vadd.f32 %v8339_v3, %v8338_v58  ;;  %v2773_v41 = vshll.u32 %v11560_v1, 16 }
 0x160   : > { %v8342_v52 = vpop.f32.mrb[11].mxu0  ;;  %v8475_v9 = vpop.f32.mrb[9].mxu1  ;;  %v2752_v3 = vsel %vm568_vm0, %v2747_v38, %v2751_v24  ;;  %v2958_v2 = vrot.slane %v7948_v44, 1 }
 0x161   : > { %v11644_v15 = vadd.f32 %v8475_v9, %v8474_v50  ;;  %v8477_v21 = vpop.f32.mrb[10].mxu1  ;;  %v11646_v35 = vadd.f32 %v8342_v52, %v8341_v11  ;;  %v11674_v50 = vld [vmem:[%s10685_s20 + $0xd4] ss:$0 sps:$4 sm:$0x11]  }
 0x162   : > { %3243 = vmatmul.mubr.bf16.gmra.mrb[116].mxu0 %v11499_v17  ;;  %v8478_v8 = vpop.f32.mrb[11].mxu1  ;;  %v2952_v17 = vrot.slane %v7946_v26, 1  ;;  %v2763_v26 = vrot.slane %v2761_v34, 1  ;;  %v2775_v34 = vrot.slane %v2773_v41, 1 }
 0x163   : > { %3250 = vmatprep.mubr.bf16.mxu0 %v2740_v49  ;;  %v11654_v56 = vadd.f32 %v8478_v8, %v8477_v21  ;;  %v2768_v21 = vshll.u32 %v11665_v55, 16  ;;  %v2959_v8 = vrot.slane %v11674_v50, 1 }
 0x164   : > { %9259 = vmatmul.mubr.bf16.gmra.mrb[84].mxu1 %v2948_v23  ;;  %v2954_v46 = vsel %vm825_vm1, %v2952_v17, %v2953_v33  ;;  %v2759_v23 = vor.u32 %v2758_v22, %v2754_v14  ;;  %v2766_v33 = vshrl.u32 %v11665_v55, 16  ;;  %v7859_v14 = vld [vmem:[%s10685_s20 + $0x9c] sm:$0xf] }
 0x165   : > { %v8344_v40 = vpop.f32.mrb[12].mxu0  ;;  %9262 = vmatprep.mubr.bf16.mxu1 %v2951_v7  ;;  %v2960_v61 = vsel %vm825_vm1, %v2958_v2, %v2959_v8  ;;  %v11707_v44 = vcombine.low %v7859_v14, %v11585_v0 }
 0x166   : > { %v8345_v20 = vpop.f32.mrb[13].mxu0  ;;  %v2764_v17 = vsel %vm568_vm0, %v2759_v23, %v2763_v26 }
 0x167   : > { %v8347_v19 = vpop.f32.mrb[14].mxu0  ;;  %v8480_v58 = vpop.f32.mrb[12].mxu1  ;;  %v11667_v51 = vadd.f32 %v8345_v20, %v8344_v40  ;;  %v2770_v20 = vrot.slane %v2768_v21, 1  ;;  %v2785_v21 = vshll.u32 %v11566_v6, 16  ;;  %v2790_v14 = vshrl.u32 %v11707_v44, 16 }
 0x168   : > { %v8348_v29 = vpop.f32.mrb[15].mxu0  ;;  %v8481_v11 = vpop.f32.mrb[13].mxu1 }
 0x169   : > { %v11677_v52 = vadd.f32 %v8481_v11, %v8480_v58  ;;  %v8483_v49 = vpop.f32.mrb[14].mxu1  ;;  %v11679_v37 = vadd.f32 %v8348_v29, %v8347_v19  ;;  %v2771_v22 = vor.u32 %v2770_v20, %v2766_v33  ;;  %v2792_v33 = vshll.u32 %v11707_v44, 16 }
 0x16a   : > { %3251 = vmatmul.mubr.bf16.gmra.mrb[120].mxu0 %v11557_v12  ;;  %v8484_v27 = vpop.f32.mrb[15].mxu1  ;;  %v11689_v12 = vcombine.low %v7857_v59, %v11553_v13 }
 0x16b   : > { %3258 = vmatprep.mubr.bf16.mxu0 %v2752_v3  ;;  %v11683_v9 = vadd.f32 %v8484_v27, %v8483_v49  ;;  %v2776_v59 = vsel %vm568_vm0, %v2771_v22, %v2775_v34  ;;  %v2794_v22 = vrot.slane %v2792_v33, 1  ;;  %v2797_v34 = vshll.u32 %v11604_v10, 16 }
 0x16c   : > { %9263 = vmatmul.mubr.bf16.gmra.mrb[88].mxu1 %v2954_v46  ;;  %v2780_v1 = vshll.u32 %v11689_v12, 16  ;;  %v2778_v23 = vshrl.u32 %v11689_v12, 16 }
 0x16d   : > { %v8350_v7 = vpop.f32.mrb[16].mxu0  ;;  %9266 = vmatprep.mubr.bf16.mxu1 %v2957_v28 }
 0x16e   : > { %v8351_v25 = vpop.f32.mrb[17].mxu0  ;;  %v2782_v26 = vrot.slane %v2780_v1, 1 }
 0x16f   : > { %v8353_v38 = vpop.f32.mrb[18].mxu0  ;;  %v8486_v24 = vpop.f32.mrb[16].mxu1  ;;  %v11691_v47 = vadd.f32 %v8351_v25, %v8350_v7 }
 0x170   : > { %v8354_v40 = vpop.f32.mrb[19].mxu0  ;;  %v8487_v30 = vpop.f32.mrb[17].mxu1 }
 0x171   : > { %v11697_v19 = vadd.f32 %v8487_v30, %v8486_v24  ;;  %v8489_v13 = vpop.f32.mrb[18].mxu1  ;;  %v11699_v58 = vadd.f32 %v8354_v40, %v8353_v38  ;;  %v7861_v24 = vld [vmem:[%s10685_s20 + $0xa8] sm:$0xf]  ;;  %v2783_v40 = vor.u32 %v2782_v26, %v2778_v23  ;;  %v2799_v23 = vrot.slane %v2797_v34, 1 }
 0x172   : > { %3259 = vmatmul.mubr.bf16.gmra.mrb[124].mxu0 %v11591_v18  ;;  %v8490_v29 = vpop.f32.mrb[19].mxu1  ;;  %v11724_v6 = vcombine.low %v7861_v24, %v11594_v57 }
 0x173   : > { %3266 = vmatprep.mubr.bf16.mxu0 %v2764_v17  ;;  %v11702_v3 = vadd.f32 %v8490_v29, %v8489_v13  ;;  %v2787_v17 = vrot.slane %v2785_v21, 1 }
 0x174   : > { %9267 = vmatmul.mubr.bf16.gmra.mrb[92].mxu1 %v2960_v61  ;;  %v2804_v26 = vshll.u32 %v11724_v6, 16 }
 0x175   : > { %v8356_v11 = vpop.f32.mrb[20].mxu0  ;;  %v2788_v29 = vsel %vm568_vm0, %v2783_v40, %v2787_v17  ;;  %v2802_v17 = vshrl.u32 %v11724_v6, 16 }
 0x176   : > { %v8357_v46 = vpop.f32.mrb[21].mxu0  ;;  %v2806_v33 = vrot.slane %v2804_v26, 1 }
 0x177   : > { %v8359_v49 = vpop.f32.mrb[22].mxu0  ;;  %v8492_v28 = vpop.f32.mrb[20].mxu1  ;;  %v11709_v27 = vadd.f32 %v8357_v46, %v8356_v11 }
 0x178   : > { %v8360_v18 = vpop.f32.mrb[23].mxu0  ;;  %v8493_v7 = vpop.f32.mrb[21].mxu1 }
 0x179   : > { %v11714_v2 = vadd.f32 %v8493_v7, %v8492_v28  ;;  %v8495_v8 = vpop.f32.mrb[22].mxu1  ;;  %v11716_v25 = vadd.f32 %v8360_v18, %v8359_v49  ;;  %v7863_v18 = vld [vmem:[%s10685_s20 + $0xb4] sm:$0xf] }
 0x17a   : > { %3267 = vmatmul.mubr.bf16.gmra.mrb[128].mxu0 %v11628_v53  ;;  %v8496_v0 = vpop.f32.mrb[23].mxu1  ;;  %v11741_v10 = vcombine.low %v7863_v18, %v11623_v32 }
 0x17b   : > { %3274 = vmatprep.mubr.bf16.mxu0 %v2776_v59  ;;  %v11719_v38 = vadd.f32 %v8496_v0, %v8495_v8  ;;  %v2795_v59 = vor.u32 %v2794_v22, %v2790_v14  ;;  %v7865_v14 = vld [vmem:[%s10685_s20 + $0xc0] sm:$0xf]  ;;  %v2807_v22 = vor.u32 %v2806_v33, %v2802_v17 }
 0x17d   : > { %v8362_v20 = vpop.f32.mrb[24].mxu0  ;;  %v2800_v40 = vsel %vm568_vm0, %v2795_v59, %v2799_v23 }
 0x17e   : > { %v8363_v41 = vpop.f32.mrb[25].mxu0 }
 0x17f   : > { %v8365_v30 = vpop.f32.mrb[26].mxu0  ;;  %v8498_v61 = vpop.f32.mrb[24].mxu1  ;;  %v11726_v13 = vadd.f32 %v8363_v41, %v8362_v20  ;;  %v2809_v20 = vshll.u32 %v11614_v45, 16  ;;  %v11758_v45 = vcombine.low %v7865_v14, %v11631_v54  ;;  %v7867_v14 = vld [vmem:[%s10685_s20 + $0xcc] sm:$0xf]  ;;  %s10322_s20 = sshll.u32 %s10397_s29, 4  ;;  %s10323_s20 = int_to_ptr.vmem [resolvable:$false] %s10322_s20 }
 0x180   : > { %v8366_v53 = vpop.f32.mrb[27].mxu0  ;;  %v8499_v1 = vpop.f32.mrb[25].mxu1  ;;  %s10324_s19 = scalar_lea.vmem %s10323_s20, 8192  ;;  %p10325_p13 = scmp.lt.s32.totalorder %s13295_s26, %s10323_s20 }
 0x181   : > { %v11731_v11 = vadd.f32 %v8499_v1, %v8498_v61  ;;  %v8501_v46 = vpop.f32.mrb[26].mxu1  ;;  %v11733_v49 = vadd.f32 %v8366_v53, %v8365_v30  ;;  %v2811_v34 = vrot.slane %v2809_v20, 1  ;;  %v2816_v1 = vshll.u32 %v11741_v10, 16 }
 0x182   : > { %3275 = vmatmul.mubr.bf16.gmra.mrb[132].mxu0 %v11665_v55  ;;  %v8502_v57 = vpop.f32.mrb[27].mxu1 }
 0x183   : > { %3282 = vmatprep.mubr.bf16.mxu0 %v2788_v29  ;;  %v11736_v28 = vadd.f32 %v8502_v57, %v8501_v46  ;;  %v11767_v26 = vsel %vm568_vm0, %v2807_v22, %v2811_v34 }
 0x185   : > { %v8368_v21 = vpop.f32.mrb[28].mxu0 }
 0x186   : > { %v8369_v7 = vpop.f32.mrb[29].mxu0 }
 0x187   : > { %v8371_v8 = vpop.f32.mrb[30].mxu0  ;;  %v8504_v0 = vpop.f32.mrb[28].mxu1  ;;  %v11743_v24 = vadd.f32 %v8369_v7, %v8368_v21  ;;  %v2814_v21 = vshrl.u32 %v11741_v10, 16  ;;  %v11770_v7 = vrot.slane %v2816_v1, 1  ;;  %v10015_v1 = vld [vmem:[#allocation6 + $0x100] sm:$0xff]  }
 0x188   : > { %v8372_v55 = vpop.f32.mrb[31].mxu0  ;;  %v8505_v41 = vpop.f32.mrb[29].mxu1  ;;  %8718 = vmatprep.subr.bf16.mxu0 %v10015_v1  ;;  %v10020_v1 = vld [vmem:[#allocation6 + $0x148] sm:$0xff]  }
 0x189   : > { %v11748_v30 = vadd.f32 %v8505_v41, %v8504_v0  ;;  %v8507_v61 = vpop.f32.mrb[30].mxu1  ;;  %v11750_v53 = vadd.f32 %v8372_v55, %v8371_v8  ;;  %v2821_v8 = vshll.u32 %v11641_v63, 16  ;;  %v10396_v55 = vmov 0  }
 0x18a   : > { %3283 = vmatmul.mubr.bf16.gmra.mrb[136].mxu0 %v11689_v12  ;;  %v8508_v32 = vpop.f32.mrb[31].mxu1  ;;  %309 = vst [vmem:[#allocation2 + $0xc] sm:$0xf] %v10396_v55  ;;  %306 = vst [vmem:[#allocation2] sm:$0xf] %v10396_v55  ;;  %v2819_v41 = vor.u32 %v11770_v7, %v2814_v21  ;;  %v2833_v7 = vshll.u32 %v11651_v43, 16 }
 0x18b   : > { %3290 = vmatprep.mubr.bf16.mxu0 %v2800_v40  ;;  %v11753_v29 = vadd.f32 %v8508_v32, %v8507_v61  ;;  %307 = vst [vmem:[#allocation2 + $0x4] sm:$0xf] %v10396_v55  ;;  %308 = vst [vmem:[#allocation2 + $0x8] sm:$0x1] %v10396_v55  ;;  %v2823_v61 = vrot.slane %v2821_v8, 1  ;;  %v2828_v32 = vshll.u32 %v11758_v45, 16 }
 0x18c   : > { %310 = vst [vmem:[#allocation2 + $0x10] sm:$0xf] %v10396_v55  ;;  %311 = vst [vmem:[#allocation2 + $0x14] sm:$0x1] %v10396_v55  ;;  %v2835_v43 = vrot.slane %v2833_v7, 1  ;;  %v2845_v7 = vshll.u32 %v11674_v50, 16 }
 0x18d   : > { %v8374_v46 = vpop.f32.mrb[32].mxu0  ;;  %312 = vst [vmem:[#allocation2 + $0x18] sm:$0xf] %v10396_v55  ;;  %313 = vst [vmem:[#allocation2 + $0x1c] sm:$0xf] %v10396_v55  ;;  %v2824_v63 = vsel %vm568_vm0, %v2819_v41, %v2823_v61  ;;  %v2830_v21 = vrot.slane %v2828_v32, 1 }
 0x18e   : > { %v8375_v57 = vpop.f32.mrb[33].mxu0  ;;  %314 = vst [vmem:[#allocation2 + $0x20] sm:$0x1] %v10396_v55  ;;  %315 = vst [vmem:[#allocation2 + $0x24] sm:$0xf] %v10396_v55  ;;  %v10019_v41 = vld [vmem:[#allocation6 + $0xc8] sm:$0xff]  }
 0x18f   : > { %v11760_v18 = vadd.f32 %v8375_v57, %v8374_v46  ;;  %v11762_v59 = vpop.f32.mrb[34].mxu0  ;;  %v11764_v23 = vpop.f32.mrb[32].mxu1  ;;  %316 = vst [vmem:[#allocation2 + $0x28] sm:$0xf] %v10396_v55  ;;  %317 = vst [vmem:[#allocation2 + $0x2c] sm:$0x1] %v10396_v55 }
 0x190   : > { %v8378_v12 = vpop.f32.mrb[35].mxu0  ;;  %v8511_v0 = vpop.f32.mrb[33].mxu1  ;;  %318 = vst [vmem:[#allocation2 + $0x30] sm:$0xf] %v10396_v55  ;;  %319 = vst [vmem:[#allocation2 + $0x34] sm:$0xf] %v10396_v55 }
 0x191   : > { %320 = vst [vmem:[#allocation2 + $0x38] sm:$0x1] %v10396_v55  ;;  %321 = vst [vmem:[#allocation2 + $0x3c] sm:$0xf] %v10396_v55  ;;  %v11774_v54 = vadd.f32 %v8378_v12, %v11762_v59  ;;  %v11777_v40 = vadd.f32 %v8511_v0, %v11764_v23  ;;  %v8513_v17 = vpop.f32.mrb[34].mxu1  ;;  %v2826_v57 = vshrl.u32 %v11758_v45, 16  ;;  %v11794_v12 = vcombine.low %v7867_v14, %v11660_v16 }
 0x192   : > { %322 = vst [vmem:[#allocation2 + $0x40] sm:$0xf] %v10396_v55  ;;  %323 = vst [vmem:[#allocation2 + $0x44] sm:$0x1] %v10396_v55  ;;  %3291 = vmatmul.mubr.bf16.gmra.mrb[140].mxu0 %v11707_v44  ;;  %v8514_v33 = vpop.f32.mrb[35].mxu1  ;;  %v10016_v23 = vld [vmem:[#allocation6 + $0xc0] sm:$0xff]  }
 0x193   : > { %324 = vst [vmem:[#allocation2 + $0x48] sm:$0xf] %v10396_v55  ;;  %325 = vst [vmem:[#allocation2 + $0x4c] sm:$0xf] %v10396_v55  ;;  %3298 = vmatprep.mubr.bf16.mxu0 %v11767_v26  ;;  %v11781_v20 = vadd.f32 %v8514_v33, %v8513_v17  ;;  %8719 = vmatpush3.bf16.msra.mxu0 %v10016_v23  ;;  %v10017_v33 = vld [vmem:[#allocation6 + $0x140] sm:$0xff]   ;;  %v10018_v16 = vld [vmem:[#allocation6 + $0x108] sm:$0xff]   ;;  %v2831_v61 = vor.u32 %v2830_v21, %v2826_v57 }
 0x194   : > { %326 = vst [vmem:[#allocation2 + $0x50] sm:$0x1] %v10396_v55  ;;  %327 = vst [vmem:[#allocation2 + $0x54] sm:$0xf] %v10396_v55  ;;  %9270 = vmatprep.subr.bf16.mxu1 %v10017_v33  ;;  %v2840_v32 = vshll.u32 %v11794_v12, 16  ;;  %8720 = vmatprep.subr.bf16.mxu0 %v10018_v16  ;;  %v2838_v57 = vshrl.u32 %v11794_v12, 16 }
 0x195   : > { %328 = vst [vmem:[#allocation2 + $0x58] sm:$0xf] %v10396_v55  ;;  %329 = vst [vmem:[#allocation2 + $0x5c] sm:$0x1] %v10396_v55  ;;  %v8380_v22 = vpop.f32.mrb[36].mxu0  ;;  %9271 = vmatpush3.bf16.msra.mxu1 %v10017_v33 }
 0x196   : > { %330 = vst [vmem:[#allocation2 + $0x60] sm:$0xf] %v10396_v55  ;;  %331 = vst [vmem:[#allocation2 + $0x64] sm:$0xf] %v10396_v55  ;;  %v8381_v34 = vpop.f32.mrb[37].mxu0  ;;  %9272 = vmatprep.subr.bf16.mxu1 %v10020_v1  ;;  %v2842_v21 = vrot.slane %v2840_v32, 1 }
 0x197   : > { %332 = vst [vmem:[#allocation2 + $0x68] sm:$0x1] %v10396_v55  ;;  %333 = vst [vmem:[#allocation2 + $0x6c] sm:$0xf] %v10396_v55  ;;  %v11790_v46 = vadd.f32 %v8381_v34, %v8380_v22  ;;  %v8383_v44 = vpop.f32.mrb[38].mxu0  ;;  %v8516_v59 = vpop.f32.mrb[36].mxu1  ;;  %8721 = vmatpush3.bf16.msra.mxu0 %v10019_v41 }
 0x198   : > { %334 = vst [vmem:[#allocation2 + $0x70] sm:$0xf] %v10396_v55  ;;  %335 = vst [vmem:[#allocation2 + $0x74] sm:$0x1] %v10396_v55  ;;  %v8384_v26 = vpop.f32.mrb[39].mxu0  ;;  %v8517_v8 = vpop.f32.mrb[37].mxu1  ;;  %v2843_v50 = vor.u32 %v2842_v21, %v2838_v57 }
 0x199   : > { %336 = vst [vmem:[#allocation2 + $0x78] sm:$0xf] %v10396_v55  ;;  %337 = vst [vmem:[#allocation2 + $0x7c] sm:$0xf] %v10396_v55  ;;  %v11798_v0 = vadd.f32 %v8384_v26, %v8383_v44  ;;  %v8519_v17 = vpop.f32.mrb[38].mxu1  ;;  %9273 = vmatpush3.bf16.msra.mxu1 %v10020_v1  ;;  %v2847_v32 = vrot.slane %v2845_v7, 1 }
 0x19a   : > { %338 = vst [vmem:[#allocation2 + $0x80] sm:$0x1] %v10396_v55  ;;  %339 = vst [vmem:[#allocation2 + $0x84] sm:$0xf] %v10396_v55  ;;  %3299 = vmatmul.mubr.bf16.gmra.mrb[144].mxu0 %v11724_v6  ;;  %v8520_v22 = vpop.f32.mrb[39].mxu1  ;;  %v10029_v7 = vld [vmem:[#allocation6 + $0x160] sm:$0xff]  }
 0x19b   : > { %340 = vst [vmem:[#allocation2 + $0x88] sm:$0xf] %v10396_v55  ;;  %341 = vst [vmem:[#allocation2 + $0x8c] sm:$0x1] %v10396_v55  ;;  %3306 = vmatprep.mubr.bf16.mxu0 %v2824_v63  ;;  %v11803_v14 = vadd.f32 %v8520_v22, %v8519_v17  ;;  %v10022_v63 = vld [vmem:[#allocation6 + $0xd0] sm:$0xff]   ;;  %v2836_v17 = vsel %vm568_vm0, %v2831_v61, %v2835_v43  ;;  %v10025_v43 = vld [vmem:[#allocation6 + $0xd8] sm:$0xff]  }
 0x19c   : > { %342 = vst [vmem:[#allocation2 + $0x90] sm:$0xf] %v10396_v55  ;;  %343 = vst [vmem:[#allocation2 + $0x94] sm:$0xf] %v10396_v55 }
 0x19d   : > { %344 = vst [vmem:[#allocation2 + $0x98] sm:$0x1] %v10396_v55  ;;  %345 = vst [vmem:[#allocation2 + $0x9c] sm:$0xf] %v10396_v55  ;;  %v8386_v34 = vpop.f32.mrb[40].mxu0 }
 0x19e   : > { %346 = vst [vmem:[#allocation2 + $0xa0] sm:$0xf] %v10396_v55  ;;  %347 = vst [vmem:[#allocation2 + $0xa4] sm:$0x1] %v10396_v55  ;;  %v8387_v44 = vpop.f32.mrb[41].mxu0 }
 0x19f   : > { %348 = vst [vmem:[#allocation2 + $0xa8] sm:$0xf] %v10396_v55  ;;  %349 = vst [vmem:[#allocation2 + $0xac] sm:$0xf] %v10396_v55  ;;  %v11806_v23 = vadd.f32 %v8387_v44, %v8386_v34  ;;  %v8389_v6 = vpop.f32.mrb[42].mxu0  ;;  %v8522_v26 = vpop.f32.mrb[40].mxu1 }
 0x1a0   : > { %350 = vst [vmem:[#allocation2 + $0xb0] sm:$0x1] %v10396_v55  ;;  %351 = vst [vmem:[#allocation2 + $0xb4] sm:$0xf] %v10396_v55  ;;  %v8523_v33 = vpop.f32.mrb[41].mxu1  ;;  %v10023_v34 = vld [vmem:[#allocation6 + $0x150] sm:$0xff]  }
 0x1a1   : > { %352 = vst [vmem:[#allocation2 + $0xb8] sm:$0xf] %v10396_v55  ;;  %353 = vst [vmem:[#allocation2 + $0xbc] sm:$0x1] %v10396_v55  ;;  %v11813_v16 = vadd.f32 %v8523_v33, %v8522_v26  ;;  %v8525_v41 = vpop.f32.mrb[42].mxu1  ;;  %9274 = vmatprep.subr.bf16.mxu1 %v10023_v34  ;;  %v10027_v26 = vld [vmem:[#allocation6 + $0x120] sm:$0xff]  }
 0x1a2   : > { %354 = vst [vmem:[#allocation2 + $0xc0] sm:$0xf] %v10396_v55  ;;  %355 = vst [vmem:[#allocation2 + $0xc4] sm:$0xf] %v10396_v55  ;;  %3307 = vmatmul.mubr.bf16.gmra.mrb[148].mxu0 %v11741_v10  ;;  %v8526_v44 = vpop.f32.mrb[43].mxu1  ;;  %9275 = vmatpush3.bf16.msra.mxu1 %v10023_v34  ;;  %v10028_v33 = vld [vmem:[#allocation6 + $0xe0] sm:$0xff]  }
 0x1a3   : > { %356 = vst [vmem:[#allocation2 + $0xc8] sm:$0x1] %v10396_v55  ;;  %357 = vst [vmem:[#allocation2 + $0xcc] sm:$0xf] %v10396_v55  ;;  %3314 = vmatprep.mubr.bf16.mxu0 %v2836_v17  ;;  %v11816_v61 = vadd.f32 %v8526_v44, %v8525_v41  ;;  %v2848_v41 = vsel %vm568_vm0, %v2843_v50, %v2847_v32  ;;  %v10032_v32 = vld [vmem:[#allocation6 + $0x168] sm:$0xff]  }
 0x1a4   : > { %358 = vst [vmem:[#allocation2 + $0xd0] sm:$0xf] %v10396_v55  ;;  %359 = vst [vmem:[#allocation2 + $0xd4] sm:$0x1] %v10396_v55  ;;  %v11800_v55 = vadd.f32 %v8517_v8, %v8516_v59  ;;  %v10021_v59 = vld [vmem:[#allocation6 + $0x110] sm:$0xff]   ;;  %v8390_v8 = vpop.f32.mrb[43].mxu0 }
 0x1a5   : > { %13383 = vst [vmem:[#allocation14_spill] sm:$0xff] %v11806_v23  ;;  %8722 = vmatprep.subr.bf16.mxu0 %v10021_v59  ;;  %v11811_v22 = vadd.f32 %v8390_v8, %v8389_v6  ;;  %v10024_v23 = vld [vmem:[#allocation6 + $0x118] sm:$0xff]   ;;  %13384 = vst [vmem:[#allocation17_spill] sm:$0xff] %v11816_v61  ;;  %v8392_v1 = vpop.f32.mrb[44].mxu0 }
 0x1a6   : > { %8723 = vmatpush3.bf16.msra.mxu0 %v10022_v63  ;;  %v10026_v59 = vld [vmem:[#allocation6 + $0x158] sm:$0xff]   ;;  %v8393_v6 = vpop.f32.mrb[45].mxu0 }
 0x1a7   : > { %8724 = vmatprep.subr.bf16.mxu0 %v10024_v23  ;;  %v11818_v63 = vadd.f32 %v8393_v6, %v8392_v1  ;;  %v8395_v8 = vpop.f32.mrb[46].mxu0  ;;  %v8528_v10 = vpop.f32.mrb[44].mxu1  ;;  %9276 = vmatprep.subr.bf16.mxu1 %v10026_v59  ;;  %v10031_v6 = vld [vmem:[#allocation6 + $0xe8] sm:$0xff]  }
 0x1a8   : > { %v8396_v17 = vpop.f32.mrb[47].mxu0  ;;  %v8529_v44 = vpop.f32.mrb[45].mxu1  ;;  %9277 = vmatpush3.bf16.msra.mxu1 %v10026_v59 }
 0x1a9   : > { %v11821_v57 = vadd.f32 %v8396_v17, %v8395_v8  ;;  %v11823_v23 = vadd.f32 %v8529_v44, %v8528_v10  ;;  %v8531_v21 = vpop.f32.mrb[46].mxu1  ;;  %9278 = vmatprep.subr.bf16.mxu1 %v10029_v7 }
 0x1aa   : > { %8725 = vmatpush3.bf16.msra.mxu0 %v10025_v43  ;;  %v8532_v34 = vpop.f32.mrb[47].mxu1  ;;  %v10030_v43 = vld [vmem:[#allocation6 + $0x128] sm:$0xff]  }
 0x1ab   : > { %8726 = vmatprep.subr.bf16.mxu0 %v10027_v26  ;;  %3315 = vmatmul.mubr.bf16.gmra.mrb[152].mxu0 %v11758_v45  ;;  %v11826_v1 = vadd.f32 %v8532_v34, %v8531_v21  ;;  %v10033_v26 = vld [vmem:[#allocation6 + $0x130] sm:$0xff]  }
 0x1ac   : > { %3322 = vmatprep.mubr.bf16.mxu0 %v2848_v41  ;;  %9279 = vmatpush3.bf16.msra.mxu1 %v10029_v7  ;;  %v10034_v45 = vld [vmem:[#allocation6 + $0xf0] sm:$0xff]  }
 0x1ad   : > { %v8398_v50 = vpop.f32.mrb[48].mxu0  ;;  %9280 = vmatprep.subr.bf16.mxu1 %v10032_v32  ;;  %v10035_v34 = vld [vmem:[#allocation6 + $0x170] sm:$0xff]  }
 0x1ae   : > { %8727 = vmatpush3.bf16.msra.mxu0 %v10028_v33  ;;  %v8399_v59 = vpop.f32.mrb[49].mxu0 }
 0x1af   : > { %8728 = vmatprep.subr.bf16.mxu0 %v10030_v43  ;;  %v11828_v8 = vadd.f32 %v8399_v59, %v8398_v50  ;;  %v8401_v10 = vpop.f32.mrb[50].mxu0  ;;  %v8534_v33 = vpop.f32.mrb[48].mxu1  ;;  %v10040_v59 = vld [vmem:[#allocation6 + $0xf8] sm:$0xff]  }
 0x1b0   : > { %v8402_v17 = vpop.f32.mrb[51].mxu0  ;;  %v8535_v44 = vpop.f32.mrb[49].mxu1  ;;  %9281 = vmatpush3.bf16.msra.mxu1 %v10032_v32 }
 0x1b1   : > { %13385 = vst [vmem:[#allocation12_spill] sm:$0xff] %v11828_v8  ;;  %v11830_v41 = vadd.f32 %v8402_v17, %v8401_v10  ;;  %v11832_v21 = vadd.f32 %v8535_v44, %v8534_v33  ;;  %v8537_v7 = vpop.f32.mrb[50].mxu1  ;;  %9282 = vmatprep.subr.bf16.mxu1 %v10035_v34 }
 0x1b2   : > { %8729 = vmatpush3.bf16.msra.mxu0 %v10031_v6  ;;  %v8538_v43 = vpop.f32.mrb[51].mxu1  ;;  %v10039_v6 = vld [vmem:[#allocation6 + $0x138] sm:$0xff]  }
 0x1b3   : > { %8730 = vmatprep.subr.bf16.mxu0 %v10033_v26  ;;  %13386 = vst [vmem:[#allocation16_spill] sm:$0xff] %v11830_v41  ;;  %13387 = vst [vmem:[#allocation13_spill] sm:$0xff] %v11832_v21  ;;  %3323 = vmatmul.mubr.bf16.gmra.mrb[156].mxu0 %v11794_v12  ;;  %v11835_v50 = vadd.f32 %v8538_v43, %v8537_v7  ;;  %v10041_v43 = vld [vmem:[#allocation6 + $0x178] sm:$0xff]  }
 0x1b4   : > { %9283 = vmatpush3.bf16.msra.mxu1 %v10035_v34 }
 0x1b5   : > { %13388 = vst [vmem:[#allocation15_spill] sm:$0xff] %v11835_v50  ;;  %v8404_v8 = vpop.f32.mrb[52].mxu0  ;;  %9284 = vmatprep.subr.bf16.mxu1 %v10041_v43 }
 0x1b6   : > { %8731 = vmatpush3.bf16.msra.mxu0 %v10034_v45  ;;  %v8405_v32 = vpop.f32.mrb[53].mxu0 }
 0x1b7   : > { %8732 = vmatprep.subr.bf16.mxu0 %v10039_v6  ;;  %v11837_v26 = vadd.f32 %v8405_v32, %v8404_v8  ;;  %v8407_v10 = vpop.f32.mrb[54].mxu0  ;;  %v8540_v33 = vpop.f32.mrb[52].mxu1 }
 0x1b8   : > { %v8408_v17 = vpop.f32.mrb[55].mxu0  ;;  %v8541_v45 = vpop.f32.mrb[53].mxu1  ;;  %9285 = vmatpush3.bf16.msra.mxu1 %v10041_v43 }
 0x1b9   : > { %13389 = vst [vmem:[#allocation18_spill] sm:$0xff] %v11837_v26  ;;  %v11839_v44 = vadd.f32 %v8408_v17, %v8407_v10  ;;  %v11841_v12 = vadd.f32 %v8541_v45, %v8540_v33  ;;  %v8543_v41 = vpop.f32.mrb[54].mxu1 }
 0x1ba   : > { %8733 = vmatpush3.bf16.msra.mxu0 %v10040_v59  ;;  %v8544_v7 = vpop.f32.mrb[55].mxu1 }
 0x1bb   : > { %13390 = vst [vmem:[#allocation19_spill] sm:$0xff] %v11839_v44  ;;  %13391 = vst [vmem:[#allocation20_spill] sm:$0xff] %v11841_v12  ;;  %v11843_v50 = vadd.f32 %v8544_v7, %v8543_v41 }
 0x1bd   : > { %13392 = vst [vmem:[#allocation21_spill] sm:$0xff] %v11843_v50  ;;  %v8410_v34 = vpop.f32.mrb[56].mxu0 }
 0x1be   : > { %v8411_v6 = vpop.f32.mrb[57].mxu0 }
 0x1bf   : > { %v11845_v59 = vadd.f32 %v8411_v6, %v8410_v34  ;;  %v8413_v8 = vpop.f32.mrb[58].mxu0  ;;  %v8546_v32 = vpop.f32.mrb[56].mxu1 }
 0x1c0   : > { %v8414_v21 = vpop.f32.mrb[59].mxu0  ;;  %v8547_v26 = vpop.f32.mrb[57].mxu1 }
 0x1c1   : > { %13393 = vst [vmem:[#allocation22_spill] sm:$0xff] %v11845_v59  ;;  %v11847_v61 = vadd.f32 %v8414_v21, %v8413_v8  ;;  %v11849_v10 = vadd.f32 %v8547_v26, %v8546_v32  ;;  %v8549_v33 = vpop.f32.mrb[58].mxu1 }
 0x1c2   : > { %v8550_v17 = vpop.f32.mrb[59].mxu1 }
 0x1c3   : > { %13394 = vst [vmem:[#allocation23_spill] sm:$0xff] %v11847_v61  ;;  %v11851_v45 = vadd.f32 %v8550_v17, %v8549_v33 }
 0x1c5   : > { %13395 = vst [vmem:[#allocation24_spill] sm:$0xff] %v11851_v45  ;;  %v8416_v41 = vpop.f32.mrb[60].mxu0 }
 0x1c6   : > { %v8417_v7 = vpop.f32.mrb[61].mxu0 }
 0x1c7   : > { %v11853_v50 = vadd.f32 %v8417_v7, %v8416_v41  ;;  %v8419_v43 = vpop.f32.mrb[62].mxu0  ;;  %v8552_v44 = vpop.f32.mrb[60].mxu1 }
 0x1c8   : > { %v8420_v34 = vpop.f32.mrb[63].mxu0  ;;  %v8553_v6 = vpop.f32.mrb[61].mxu1 }
 0x1c9   : > { %v11855_v59 = vadd.f32 %v8420_v34, %v8419_v43  ;;  %v11857_v12 = vadd.f32 %v8553_v6, %v8552_v44  ;;  %v8555_v21 = vpop.f32.mrb[62].mxu1 }
 0x1ca   : > { %v8556_v8 = vpop.f32.mrb[63].mxu1 }
 0x1cb   : > { %v11859_v26 = vadd.f32 %v8556_v8, %v8555_v21 }
 0x1cd   : > { %v9144_v32 = vpop.f32.mrb[64].mxu0 }
 0x1ce   : > { %v1864_v33 = vadd.f32 %v9144_v32, %v11597_v5  ;;  %v1855_v17 = vpop.f32.mrb[65].mxu0 }
 0x1cf   : > { %v1856_v45 = vadd.f32 %v11562_v62, %v1855_v17  ;;  %v9145_v41 = vpop.f32.mrb[66].mxu0 }
 0x1d0   : > { %v11864_v7 = vadd.f32 %v11607_v48, %v1864_v33  ;;  %v1867_v61 = vadd.f32 %v9145_v41, %v11609_v36  ;;  %v1858_v43 = vpop.f32.mrb[67].mxu0 }
 0x1d1   : > { %v11868_v44 = vadd.f32 %v11570_v42, %v1856_v45  ;;  %v1859_v34 = vadd.f32 %v11572_v39, %v1858_v43 }
 0x1d2   : > { %v11872_v6 = vadd.f32 %v11617_v60, %v1867_v61 }
 0x1d3   : > { %v11875_v5 = vadd.f32 %v11580_v31, %v1859_v34 }
 0x1d5   : > { %v9148_v21 = vpop.f32.mrb[68].mxu0 }
 0x1d6   : > { %v1880_v62 = vadd.f32 %v9148_v21, %v11667_v51  ;;  %v1871_v8 = vpop.f32.mrb[69].mxu0 }
 0x1d7   : > { %v1872_v48 = vadd.f32 %v11634_v4, %v1871_v8  ;;  %v9149_v32 = vpop.f32.mrb[70].mxu0 }
 0x1d8   : > { %v11880_v36 = vadd.f32 %v11677_v52, %v1880_v62  ;;  %v1883_v42 = vadd.f32 %v9149_v32, %v11679_v37  ;;  %v1874_v45 = vpop.f32.mrb[71].mxu0 }
 0x1d9   : > { %v11884_v39 = vadd.f32 %v11644_v15, %v1872_v48  ;;  %v1875_v60 = vadd.f32 %v11646_v35, %v1874_v45 }
 0x1da   : > { %v11888_v31 = vadd.f32 %v11683_v9, %v1883_v42 }
 0x1db   : > { %v11891_v51 = vadd.f32 %v11654_v56, %v1875_v60 }
 0x1dd   : > { %v9152_v61 = vpop.f32.mrb[72].mxu0 }
 0x1de   : > { %v1896_v4 = vadd.f32 %v9152_v61, %v11709_v27  ;;  %v1887_v33 = vpop.f32.mrb[73].mxu0 }
 0x1df   : > { %v1888_v52 = vadd.f32 %v11691_v47, %v1887_v33  ;;  %v9153_v17 = vpop.f32.mrb[74].mxu0 }
 0x1e0   : > { %v11896_v37 = vadd.f32 %v11714_v2, %v1896_v4  ;;  %v1899_v15 = vadd.f32 %v9153_v17, %v11716_v25  ;;  %v1890_v41 = vpop.f32.mrb[75].mxu0 }
 0x1e1   : > { %v11900_v35 = vadd.f32 %v11697_v19, %v1888_v52  ;;  %v1891_v9 = vadd.f32 %v11699_v58, %v1890_v41  ;;  %v13397_v52 = vld [vmem:[#allocation17_spill] sm:$0xff] }
 0x1e2   : > { %v11904_v56 = vadd.f32 %v11719_v38, %v1899_v15  ;;  %v13398_v15 = vld [vmem:[#allocation18_spill] sm:$0xff] }
 0x1e3   : > { %v11907_v27 = vadd.f32 %v11702_v3, %v1891_v9 }
 0x1e5   : > { %v9156_v43 = vpop.f32.mrb[76].mxu0 }
 0x1e6   : > { %v1912_v47 = vadd.f32 %v9156_v43, %v11743_v24  ;;  %v1903_v34 = vpop.f32.mrb[77].mxu0 }
 0x1e7   : > { %v1904_v2 = vadd.f32 %v11726_v13, %v1903_v34  ;;  %v9157_v21 = vpop.f32.mrb[78].mxu0 }
 0x1e8   : > { %v11912_v25 = vadd.f32 %v11748_v30, %v1912_v47  ;;  %v1915_v19 = vadd.f32 %v9157_v21, %v11750_v53  ;;  %v1906_v62 = vpop.f32.mrb[79].mxu0 }
 0x1e9   : > { %v11916_v58 = vadd.f32 %v11731_v11, %v1904_v2  ;;  %v1907_v38 = vadd.f32 %v11733_v49, %v1906_v62 }
 0x1ea   : > { %v11920_v3 = vadd.f32 %v11753_v29, %v1915_v19 }
 0x1eb   : > { %v11923_v24 = vadd.f32 %v11736_v28, %v1907_v38  ;;  %v13405_v38 = vld [vmem:[#allocation21_spill] sm:$0xff] }
 0x1ed   : > { %v9160_v8 = vpop.f32.mrb[80].mxu0 }
 0x1ee   : > { %v1928_v13 = vadd.f32 %v9160_v8, %v11790_v46  ;;  %v1919_v48 = vpop.f32.mrb[81].mxu0 }
 0x1ef   : > { %v1920_v30 = vadd.f32 %v11760_v18, %v1919_v48  ;;  %v9161_v32 = vpop.f32.mrb[82].mxu0 }
 0x1f0   : > { %v11928_v53 = vadd.f32 %v11800_v55, %v1928_v13  ;;  %v1931_v11 = vadd.f32 %v9161_v32, %v11798_v0  ;;  %v1922_v42 = vpop.f32.mrb[83].mxu0  ;;  %v13396_v55 = vld [vmem:[#allocation14_spill] sm:$0xff]  ;;  %v13407_v13 = vld [vmem:[#allocation15_spill] sm:$0xff] }
 0x1f1   : > { %v11932_v49 = vadd.f32 %v11777_v40, %v1920_v30  ;;  %v1923_v29 = vadd.f32 %v11774_v54, %v1922_v42  ;;  %v13408_v42 = vld [vmem:[#allocation22_spill] sm:$0xff] }
 0x1f2   : > { %v11936_v28 = vadd.f32 %v11803_v14, %v1931_v11 }
 0x1f3   : > { %v11939_v46 = vadd.f32 %v11781_v20, %v1923_v29 }
 0x1f5   : > { %v9164_v45 = vpop.f32.mrb[84].mxu0 }
 0x1f6   : > { %v1944_v18 = vadd.f32 %v9164_v45, %v11818_v63  ;;  %v1935_v60 = vpop.f32.mrb[85].mxu0 }
 0x1f7   : > { %v1936_v61 = vadd.f32 %v13396_v55, %v1935_v60  ;;  %v9165_v4 = vpop.f32.mrb[86].mxu0 }
 0x1f8   : > { %v11944_v0 = vadd.f32 %v11823_v23, %v1944_v18  ;;  %v1947_v40 = vadd.f32 %v9165_v4, %v11821_v57  ;;  %v1938_v33 = vpop.f32.mrb[87].mxu0  ;;  %v13399_v23 = vld [vmem:[#allocation12_spill] sm:$0xff]  ;;  %v13411_v4 = vld [vmem:[#allocation23_spill] sm:$0xff] }
 0x1f9   : > { %v11948_v54 = vadd.f32 %v11813_v16, %v1936_v61  ;;  %v1939_v14 = vadd.f32 %v11811_v22, %v1938_v33  ;;  %v13400_v57 = vld [vmem:[#allocation20_spill] sm:$0xff]  ;;  %v13402_v16 = vld [vmem:[#allocation19_spill] sm:$0xff]  ;;  %v13403_v22 = vld [vmem:[#allocation13_spill] sm:$0xff] }
 0x1fa   : > { %v11952_v20 = vadd.f32 %v11826_v1, %v1947_v40  ;;  %v13404_v1 = vld [vmem:[#allocation16_spill] sm:$0xff] }
 0x1fb   : > { %v11955_v63 = vadd.f32 %v13397_v52, %v1939_v14  ;;  %v13413_v14 = vld [vmem:[#allocation24_spill] sm:$0xff] }
 0x1fd   : > { %v9168_v17 = vpop.f32.mrb[88].mxu0 }
 0x1fe   : > { %v1960_v41 = vadd.f32 %v9168_v17, %v13398_v15  ;;  %v1951_v9 = vpop.f32.mrb[89].mxu0  ;;  %v11989_v15 = vld [vmem:[#allocation6 + $0x80] sm:$0xff]  }
 0x1ff   : > { %v1952_v43 = vadd.f32 %v13399_v23, %v1951_v9  ;;  %v9169_v47 = vpop.f32.mrb[90].mxu0  ;;  %9318 = vmatprep.subr.bf16.mxu1 %v11989_v15 }
 0x200   : > { %v11960_v34 = vadd.f32 %v13400_v57, %v1960_v41  ;;  %v1963_v2 = vadd.f32 %v9169_v47, %v13402_v16  ;;  %v1954_v21 = vpop.f32.mrb[91].mxu0 }
 0x201   : > { %v11964_v19 = vadd.f32 %v13403_v22, %v1952_v43  ;;  %v1955_v62 = vadd.f32 %v13404_v1, %v1954_v21 }
 0x202   : > { %13401 = vst [vmem:[#allocation14_spill] sm:$0xff] %v11960_v34  ;;  %v11968_v8 = vadd.f32 %v13405_v38, %v1963_v2 }
 0x203   : > { %v11971_v48 = vadd.f32 %v13407_v13, %v1955_v62 }
 0x204   : > { %13406 = vst [vmem:[#allocation17_spill] sm:$0xff] %v11968_v8  ;;  %v10084_v8 = vld [vmem:[#allocation6] sm:$0xff]  }
 0x205   : > { %v9172_v30 = vpop.f32.mrb[92].mxu0 }
 0x206   : > { %v1976_v32 = vadd.f32 %v9172_v30, %v11853_v50  ;;  %v1967_v11 = vpop.f32.mrb[93].mxu0 }
 0x207   : > { %v1968_v29 = vadd.f32 %v13408_v42, %v1967_v11  ;;  %v9173_v45 = vpop.f32.mrb[94].mxu0 }
 0x208   : > { %v11976_v18 = vadd.f32 %v11857_v12, %v1976_v32  ;;  %v1979_v60 = vadd.f32 %v9173_v45, %v11855_v59  ;;  %v1970_v55 = vpop.f32.mrb[95].mxu0 }
 0x209   : > { %v11980_v61 = vadd.f32 %v11849_v10, %v1968_v29  ;;  %v1971_v40 = vadd.f32 %v13411_v4, %v1970_v55 }
 0x20a   : > { %13409 = vst [vmem:[#allocation18_spill] sm:$0xff] %v11976_v18  ;;  %v11984_v33 = vadd.f32 %v11859_v26, %v1979_v60  ;;  %v11996_v26 = vld [vmem:[%s13345_s3] ss:$0 sm:$0xff] }
 0x20b   : > { %13410 = vst [vmem:[#allocation12_spill] sm:$0xff] %v11980_v61  ;;  %v11987_v50 = vadd.f32 %v13413_v14, %v1971_v40 }
 0x20c   : > { %13412 = vst [vmem:[#allocation20_spill] sm:$0xff] %v11984_v33 }
 0x20d   : > { %13414 = vst [vmem:[#allocation19_spill] sm:$0xff] %v11987_v50  ;;  %v8598_v52 = vpop.f32.mrb[96].mxu0 }
 0x20e   : > { %v8599_v17 = vpop.f32.mrb[97].mxu0 }
 0x20f   : > { %v8600_v12 = vadd.f32 %v8599_v17, %v8598_v52  ;;  %v9240_v41 = vpop.f32.mrb[64].mxu1  ;;  %v8601_v9 = vpop.f32.mrb[98].mxu0 }
 0x210   : > { %v3365_v59 = vpop.f32.mrb[65].mxu1  ;;  %v8602_v23 = vpop.f32.mrb[99].mxu0 }
 0x211   : > { %v9420_v10 = vadd.f32 %v8600_v12, %v11868_v44  ;;  %v8603_v43 = vadd.f32 %v8602_v23, %v8601_v9  ;;  %v9241_v47 = vpop.f32.mrb[66].mxu1 }
 0x212   : > { %v3368_v57 = vpop.f32.mrb[67].mxu1 }
 0x213   : > { %v9421_v16 = vadd.f32 %v9420_v10, %v3365_v59  ;;  %v9428_v2 = vadd.f32 %v8603_v43, %v11875_v5  ;;  %v4018_v43 = vld [vmem:[#allocation2 + $0xc] sm:$0xf] }
 0x215   : > { %v3531_v21 = vadd.f32 %v9421_v16, %v11996_v26  ;;  %v9429_v22 = vadd.f32 %v9428_v2, %v3368_v57  ;;  %v8604_v1 = vpop.f32.mrb[100].mxu0 }
 0x216   : > { %v8605_v62 = vpop.f32.mrb[101].mxu0 }
 0x217   : > { %v3563_v38 = vmax.f32 %v3531_v21, 0.0  ;;  %v3532_v13 = vadd.f32 %v9429_v22, %v11996_v26  ;;  %v8606_v44 = vadd.f32 %v8605_v62, %v8604_v1  ;;  %v12001_v30 = vpop.f32.mrb[68].mxu1  ;;  %v8607_v32 = vpop.f32.mrb[102].mxu0 }
 0x218   : > { %v3381_v11 = vpop.f32.mrb[69].mxu1  ;;  %v8608_v42 = vpop.f32.mrb[103].mxu0 }
 0x219   : > { %v8277_v29 = vpack.c.bf16 %v3563_v38, %v3563_v38  ;;  %v3564_v45 = vmax.f32 %v3532_v13, 0.0  ;;  %v9416_v60 = vadd.f32 %v8606_v44, %v11864_v7  ;;  %v8609_v55 = vadd.f32 %v8608_v42, %v8607_v32  ;;  %v12004_v5 = vpop.f32.mrb[70].mxu1  ;;  %v10110_v13 = vld [vmem:[#allocation2 + $0x8] ss:$0 sps:$4 sm:$0x11]  }
 0x21a   : > { %v3384_v4 = vpop.f32.mrb[71].mxu1 }
 0x21b   : > { %v3695_v40 = vshrl.u32 %v8277_v29, 16  ;;  %v8278_v14 = vpack.c.bf16 %v3564_v45, %v3564_v45  ;;  %v9417_v52 = vadd.f32 %v9416_v60, %v9240_v41  ;;  %v9424_v17 = vadd.f32 %v8609_v55, %v11872_v6 }
 0x21c   : > { %v3698_v9 = vshll.u32 %v8277_v29, 16 }
 0x21d   : > { %v3697_v12 = vrot.slane %v3695_v40, 7  ;;  %v3703_v59 = vshrl.u32 %v8278_v14, 16  ;;  %v3533_v23 = vadd.f32 %v9417_v52, %v11996_v26  ;;  %v8610_v7 = vpop.f32.mrb[104].mxu0  ;;  %v9425_v57 = vadd.f32 %v9424_v17, %v9241_v47  ;;  %v4024_v47 = vld [vmem:[#allocation2 + $0x14] sm:$0x1] }
 0x21e   : > { %v8611_v16 = vpop.f32.mrb[105].mxu0  ;;  %v3706_v21 = vshll.u32 %v8278_v14, 16 }
 0x21f   : > { %v3700_v41 = vor.u32 %v3698_v9, %v3697_v12  ;;  %v3705_v6 = vrot.slane %v3703_v59, 7  ;;  %v3565_v22 = vmax.f32 %v3533_v23, 0.0  ;;  %v12018_v1 = vpop.f32.mrb[72].mxu1  ;;  %v8613_v62 = vpop.f32.mrb[106].mxu0  ;;  %v3701_v38 = vrot.slane %v3697_v12, 4 }
 0x220   : > { %v3534_v44 = vadd.f32 %v9425_v57, %v11996_v26  ;;  %v8612_v32 = vadd.f32 %v8611_v16, %v8610_v7  ;;  %v12027_v42 = vpop.f32.mrb[73].mxu1  ;;  %v8614_v29 = vpop.f32.mrb[107].mxu0 }
 0x221   : > { %v4019_v45 = vsel %vm12009_vm7, %v3700_v41, %v4018_v43  ;;  %v3708_v60 = vor.u32 %v3706_v21, %v3705_v6  ;;  %v3710_v55 = vrot.slane %v3705_v6, 4  ;;  %v8279_v40 = vpack.c.bf16 %v3565_v22, %v3565_v22  ;;  %v12031_v14 = vpop.f32.mrb[74].mxu1 }
 0x222   : > { %4020 = vst [vmem:[#allocation2 + $0xc] sm:$0xf] %v4019_v45  ;;  %v3566_v52 = vmax.f32 %v3534_v44, 0.0  ;;  %v9436_v17 = vadd.f32 %v8612_v32, %v11884_v39  ;;  %v8615_v12 = vadd.f32 %v8614_v29, %v8613_v62  ;;  %v12034_v9 = vpop.f32.mrb[75].mxu1  ;;  %v4027_v39 = vld [vmem:[#allocation2 + $0x18] sm:$0xf] }
 0x223   : > { %v3709_v59 = vsel %vm12014_vm8, %v3701_v38, %v3708_v60  ;;  %v4025_v23 = vsel %vm12022_vm9, %v3710_v55, %v4024_v47  ;;  %v3712_v7 = vshrl.u32 %v8279_v40, 16  ;;  %v3715_v6 = vshll.u32 %v8279_v40, 16 }
 0x224   : > { %4021 = vst [vmem:[#allocation2 + $0x10] sm:$0xf] %v3709_v59  ;;  %4026 = vst [vmem:[#allocation2 + $0x14] sm:$0x1] %v4025_v23  ;;  %v8280_v43 = vpack.c.bf16 %v3566_v52, %v3566_v52  ;;  %v9437_v57 = vadd.f32 %v9436_v17, %v3381_v11  ;;  %v9444_v16 = vadd.f32 %v8615_v12, %v11891_v51  ;;  %v4031_v59 = vld [vmem:[#allocation2 + $0x20] sm:$0x1] }
 0x225   : > { %v3714_v41 = vrot.slane %v3712_v7, 7  ;;  %v8616_v21 = vpop.f32.mrb[108].mxu0 }
 0x226   : > { %v3720_v22 = vshrl.u32 %v8280_v43, 16  ;;  %v3535_v62 = vadd.f32 %v9437_v57, %v11996_v26  ;;  %v9445_v44 = vadd.f32 %v9444_v16, %v3384_v4  ;;  %v8617_v32 = vpop.f32.mrb[109].mxu0  ;;  %v3723_v55 = vshll.u32 %v8280_v43, 16 }
 0x227   : > { %v3717_v38 = vor.u32 %v3715_v6, %v3714_v41  ;;  %v8618_v29 = vadd.f32 %v8617_v32, %v8616_v21  ;;  %v12042_v45 = vpop.f32.mrb[76].mxu1  ;;  %v8619_v47 = vpop.f32.mrb[110].mxu0  ;;  %v3718_v17 = vrot.slane %v3714_v41, 4 }
 0x228   : > { %v3722_v60 = vrot.slane %v3720_v22, 7  ;;  %v3567_v52 = vmax.f32 %v3535_v62, 0.0  ;;  %v3536_v11 = vadd.f32 %v9445_v44, %v11996_v26  ;;  %v12045_v51 = vpop.f32.mrb[77].mxu1  ;;  %v8620_v40 = vpop.f32.mrb[111].mxu0 }
 0x229   : > { %v4028_v12 = vsel %vm12009_vm7, %v3717_v38, %v4027_v39  ;;  %v9432_v4 = vadd.f32 %v8618_v29, %v11880_v36  ;;  %v8621_v23 = vadd.f32 %v8620_v40, %v8619_v47  ;;  %v12050_v7 = vpop.f32.mrb[78].mxu1  ;;  %v4708_v62 = vld [vmem:[#allocation2 + $0xc] sm:$0xf]  ;;  %v10083_v47 = vld [vmem:[#allocation6 + $0x40] sm:$0xff]  }
 0x22a   : > { %4029 = vst [vmem:[#allocation2 + $0x18] sm:$0xf] %v4028_v12  ;;  %v3725_v57 = vor.u32 %v3723_v55, %v3722_v60  ;;  %v3727_v16 = vrot.slane %v3722_v60, 4  ;;  %v8281_v43 = vpack.c.bf16 %v3567_v52, %v3567_v52  ;;  %v3568_v6 = vmax.f32 %v3536_v11, 0.0  ;;  %v12052_v21 = vpop.f32.mrb[79].mxu1  ;;  %8854 = vmatprep.subr.bf16.mxu0 %v10083_v47 }
 0x22b   : > { %v9433_v22 = vadd.f32 %v9432_v4, %v12001_v30  ;;  %v9440_v41 = vadd.f32 %v8621_v23, %v11888_v31  ;;  %v4709_v44 = vld [vmem:[#allocation2 + $0x10] sm:$0xf]  ;;  %v10037_v29 = vld [vmem:[#allocation2 + $0x14] ss:$0 sps:$4 sm:$0x11]  }
 0x22c   : > { %v3726_v39 = vsel %vm12014_vm8, %v3718_v17, %v3725_v57  ;;  %v4032_v36 = vsel %vm12022_vm9, %v3727_v16, %v4031_v59  ;;  %v3729_v32 = vshrl.u32 %v8281_v43, 16  ;;  %v3732_v38 = vshll.u32 %v8281_v43, 16  ;;  %v4756_v52 = vld [vmem:[#allocation2 + $0xc] sm:$0xe]  ;;  %v4034_v17 = vld [vmem:[#allocation2 + $0x24] sm:$0xf] }
 0x22d   : > { %4030 = vst [vmem:[#allocation2 + $0x1c] sm:$0xf] %v3726_v39  ;;  %4033 = vst [vmem:[#allocation2 + $0x20] sm:$0x1] %v4032_v36  ;;  %v8282_v60 = vpack.c.bf16 %v3568_v6, %v3568_v6  ;;  %v3537_v55 = vadd.f32 %v9433_v22, %v11996_v26  ;;  %v9441_v30 = vadd.f32 %v9440_v41, %v12004_v5  ;;  %v8622_v31 = vpop.f32.mrb[112].mxu0  ;;  %v5173_v59 = vrot.slane %v10037_v29, 1 }
 0x22e   : > { %v12062_v11 = vcombine.low %v4708_v62, %v4709_v44  ;;  %v3731_v40 = vrot.slane %v3729_v32, 7  ;;  %v8623_v12 = vpop.f32.mrb[113].mxu0  ;;  %v8134_v4 = vcombine.low %v4756_v52, %v4709_v44  ;;  %v4924_v23 = vshll.u32 %v10037_v29, 16 }
 0x22f   : > { %v3737_v57 = vshrl.u32 %v8282_v60, 16  ;;  %v3740_v16 = vshll.u32 %v8282_v60, 16  ;;  %v3569_v43 = vmax.f32 %v3537_v55, 0.0  ;;  %v3538_v6 = vadd.f32 %v9441_v30, %v11996_v26  ;;  %v12065_v39 = vpop.f32.mrb[80].mxu1  ;;  %v8625_v22 = vpop.f32.mrb[114].mxu0 }
 0x230   : > { %v3734_v5 = vor.u32 %v3732_v38, %v3731_v40  ;;  %v3735_v41 = vrot.slane %v3731_v40, 4  ;;  %v8624_v36 = vadd.f32 %v8623_v12, %v8622_v31  ;;  %v12067_v62 = vpop.f32.mrb[81].mxu1  ;;  %v8626_v32 = vpop.f32.mrb[115].mxu0  ;;  %v5172_v33 = vrot.slane %v8134_v4, 1  ;;  %v4038_v55 = vld [vmem:[#allocation2 + $0x2c] sm:$0x1] }
 0x231   : > { %v3739_v18 = vrot.slane %v3737_v57, 7  ;;  %v8283_v44 = vpack.c.bf16 %v3569_v43, %v3569_v43  ;;  %v3570_v52 = vmax.f32 %v3538_v6, 0.0  ;;  %v8627_v29 = vadd.f32 %v8626_v32, %v8625_v22  ;;  %v12069_v47 = vpop.f32.mrb[82].mxu1 }
 0x232   : > { %v4035_v60 = vsel %vm12009_vm7, %v3734_v5, %v4034_v17  ;;  %v9452_v30 = vadd.f32 %v8624_v36, %v11900_v35  ;;  %v12074_v50 = vpop.f32.mrb[83].mxu1  ;;  %v5174_v38 = vsel %vm825_vm1, %v5172_v33, %v5173_v59  ;;  %v4917_v31 = vshrl.u32 %v12062_v11, 16  ;;  %v4041_v36 = vld [vmem:[#allocation2 + $0x30] sm:$0xf] }
 0x233   : > { %4036 = vst [vmem:[#allocation2 + $0x24] sm:$0xf] %v4035_v60  ;;  %v3742_v40 = vor.u32 %v3740_v16, %v3739_v18  ;;  %v3744_v12 = vrot.slane %v3739_v18, 4  ;;  %v3746_v4 = vshrl.u32 %v8283_v44, 16  ;;  %v3749_v57 = vshll.u32 %v8283_v44, 16  ;;  %9286 = vmatprep.mubr.bf16.mxu1 %v5174_v38 }
 0x234   : > { %v8284_v43 = vpack.c.bf16 %v3570_v52, %v3570_v52  ;;  %v9453_v6 = vadd.f32 %v9452_v30, %v12027_v42  ;;  %v9460_v17 = vadd.f32 %v8627_v29, %v11907_v27  ;;  %v4919_v22 = vshll.u32 %v12062_v11, 16  ;;  %v4711_v18 = vld [vmem:[#allocation2 + $0x1c] sm:$0xf] }
 0x235   : > { %v3743_v35 = vsel %vm12014_vm8, %v3735_v41, %v3742_v40  ;;  %v4039_v33 = vsel %vm12022_vm9, %v3744_v12, %v4038_v55  ;;  %v3748_v59 = vrot.slane %v3746_v4, 7  ;;  %v8628_v5 = vpop.f32.mrb[116].mxu0  ;;  %v4926_v16 = vrot.slane %v4924_v23, 1  ;;  %v4757_v40 = vld [vmem:[#allocation2 + $0x18] sm:$0xe] }
 0x236   : > { %4037 = vst [vmem:[#allocation2 + $0x28] sm:$0xf] %v3743_v35  ;;  %4040 = vst [vmem:[#allocation2 + $0x2c] sm:$0x1] %v4039_v33  ;;  %v3754_v32 = vshrl.u32 %v8284_v43, 16  ;;  %v3757_v44 = vshll.u32 %v8284_v43, 16  ;;  %v3539_v42 = vadd.f32 %v9453_v6, %v11996_v26  ;;  %v9461_v27 = vadd.f32 %v9460_v17, %v12034_v9 }
 0x237   : > { %v8629_v52 = vpop.f32.mrb[117].mxu0  ;;  %v3751_v29 = vor.u32 %v3749_v57, %v3748_v59  ;;  %v3752_v60 = vrot.slane %v3748_v59, 4  ;;  %v4921_v41 = vrot.slane %v4919_v22, 1  ;;  %v12087_v38 = vpop.f32.mrb[84].mxu1  ;;  %v4045_v12 = vld [vmem:[#allocation2 + $0x38] sm:$0x1]  ;;  %v8135_v6 = vcombine.low %v4757_v40, %v4711_v18 }
 0x238   : > { %v8630_v30 = vadd.f32 %v8629_v52, %v8628_v5  ;;  %v8631_v55 = vpop.f32.mrb[118].mxu0  ;;  %v3756_v23 = vrot.slane %v3754_v32, 7  ;;  %v3571_v4 = vmax.f32 %v3539_v42, 0.0  ;;  %v3540_v35 = vadd.f32 %v9461_v27, %v11996_v26  ;;  %v12090_v33 = vpop.f32.mrb[85].mxu1 }
 0x239   : > { %v8632_v43 = vpop.f32.mrb[119].mxu0  ;;  %v4042_v9 = vsel %vm12009_vm7, %v3751_v29, %v4041_v36  ;;  %v4922_v57 = vor.u32 %v4921_v41, %v4917_v31  ;;  %v12095_v59 = vpop.f32.mrb[86].mxu1  ;;  %v10042_v5 = vld [vmem:[#allocation2 + $0x20] ss:$0 sps:$4 sm:$0x11]   ;;  %v5175_v36 = vrot.slane %v8135_v6, 1 }
 0x23a   : > { %v9448_v17 = vadd.f32 %v8630_v30, %v11896_v37  ;;  %v8633_v22 = vadd.f32 %v8632_v43, %v8631_v55  ;;  %4043 = vst [vmem:[#allocation2 + $0x30] sm:$0xf] %v4042_v9  ;;  %v3759_v32 = vor.u32 %v3757_v44, %v3756_v23  ;;  %v3761_v52 = vrot.slane %v3756_v23, 4  ;;  %v12097_v27 = vpop.f32.mrb[87].mxu1  ;;  %v10089_v37 = vld [vmem:[#allocation6 + $0x48] sm:$0xff]  }
 0x23b   : > { %v8285_v42 = vpack.c.bf16 %v3571_v4, %v3571_v4  ;;  %v3572_v61 = vmax.f32 %v3540_v35, 0.0  ;;  %v4927_v40 = vsel %vm568_vm0, %v4922_v57, %v4926_v16  ;;  %v4710_v55 = vld [vmem:[#allocation2 + $0x18] sm:$0xf]  ;;  %v4712_v23 = vld [vmem:[#allocation2 + $0x24] sm:$0xf]  ;;  %v5176_v35 = vrot.slane %v10042_v5, 1 }
 0x23c   : > { %v9449_v34 = vadd.f32 %v9448_v17, %v12018_v1  ;;  %v9456_v31 = vadd.f32 %v8633_v22, %v11904_v56  ;;  %v3760_v29 = vsel %vm12014_vm8, %v3752_v60, %v3759_v32  ;;  %v4046_v44 = vsel %vm12022_vm9, %v3761_v52, %v4045_v12  ;;  %5461 = vmatprep.mubr.bf16.mxu0 %v4927_v40  ;;  %v4048_v16 = vld [vmem:[#allocation2 + $0x3c] sm:$0xf]  ;;  %v10070_v22 = vld [vmem:[#allocation6 + $0x88] sm:$0xff]   ;;  %v10091_v40 = vld [vmem:[#allocation6 + $0x50] sm:$0xff]  }
 0x23d   : > { %v3763_v41 = vshrl.u32 %v8285_v42, 16  ;;  %v3766_v30 = vshll.u32 %v8285_v42, 16  ;;  %4044 = vst [vmem:[#allocation2 + $0x34] sm:$0xf] %v3760_v29  ;;  %4047 = vst [vmem:[#allocation2 + $0x38] sm:$0x1] %v4046_v44  ;;  %v8286_v4 = vpack.c.bf16 %v3572_v61, %v3572_v61  ;;  %5462 = vmatmul.mubr.bf16.vlgmr.msra.gmra.mrb[160].mxu0 %v12062_v11  ;;  %v12111_v6 = vcombine.low %v4710_v55, %v4711_v18 }
 0x23e   : > { %v3541_v1 = vadd.f32 %v9449_v34, %v11996_v26  ;;  %v9457_v56 = vadd.f32 %v9456_v31, %v12031_v14  ;;  %v8634_v60 = vpop.f32.mrb[120].mxu0  ;;  %v12109_v43 = vld [vmem:[#allocation2 + $0x28] sm:$0xf]  ;;  %v4936_v9 = vshll.u32 %v10042_v5, 16  ;;  %8855 = vmatpush3.bf16.msra.mxu0 %v10084_v8  ;;  %v10090_v61 = vld [vmem:[#allocation6 + $0x8] sm:$0xff]   ;;  %v5177_v5 = vsel %vm825_vm1, %v5175_v36, %v5176_v35 }
 0x23f   : > { %v3765_v12 = vrot.slane %v3763_v41, 7  ;;  %v8635_v57 = vpop.f32.mrb[121].mxu0  ;;  %v12114_v17 = vcombine.low %v4712_v23, %v12109_v43  ;;  %v3771_v34 = vshrl.u32 %v8286_v4, 16  ;;  %v3774_v32 = vshll.u32 %v8286_v4, 16  ;;  %v12117_v52 = vpop.f32.mrb[88].mxu1  ;;  %8856 = vmatprep.subr.bf16.mxu0 %v10089_v37  ;;  %9287 = vmatmul.mubr.bf16.vlgmr.msra.gmra.mrb[96].mxu1 %v5177_v5 }
 0x240   : > { %v3573_v11 = vmax.f32 %v3541_v1, 0.0  ;;  %v3542_v14 = vadd.f32 %v9457_v56, %v11996_v26  ;;  %13421 = vst [vmem:[#allocation13_spill] sm:$0xff] %v12117_v52  ;;  %v8637_v42 = vpop.f32.mrb[122].mxu0  ;;  %v4929_v29 = vshrl.u32 %v12111_v6, 16  ;;  %v12121_v44 = vpop.f32.mrb[89].mxu1  ;;  %v4931_v4 = vshll.u32 %v12111_v6, 16  ;;  %9319 = vmatpush3.bf16.msra.mxu1 %v11989_v15 }
 0x241   : > { %v3768_v18 = vor.u32 %v3766_v30, %v3765_v12  ;;  %v3769_v31 = vrot.slane %v3765_v12, 4  ;;  %13422 = vst [vmem:[#allocation16_spill] sm:$0xff] %v12121_v44  ;;  %v8638_v8 = vpop.f32.mrb[123].mxu0  ;;  %v3773_v41 = vrot.slane %v3771_v34, 7  ;;  %v12124_v1 = vpop.f32.mrb[90].mxu1  ;;  %v4938_v56 = vrot.slane %v4936_v9, 1  ;;  %9320 = vmatprep.subr.bf16.mxu1 %v10070_v22 }
 0x242   : > { %v8287_v55 = vpack.c.bf16 %v3573_v11, %v3573_v11  ;;  %v3574_v23 = vmax.f32 %v3542_v14, 0.0  ;;  %13423 = vst [vmem:[#allocation21_spill] sm:$0xff] %v12124_v1  ;;  %v4052_v30 = vld [vmem:[#allocation2 + $0x44] sm:$0x1]  ;;  %v8636_v12 = vadd.f32 %v8635_v57, %v8634_v60  ;;  %v8639_v36 = vadd.f32 %v8638_v8, %v8637_v42  ;;  %v12128_v35 = vpop.f32.mrb[91].mxu1  ;;  %v12131_v52 = vld [vmem:[#allocation6 + $0x90] sm:$0xff]   ;;  %8857 = vmatpush3.bf16.msra.mxu0 %v10090_v61 }
 0x243   : > { %v4049_v37 = vsel %vm12009_vm7, %v3768_v18, %v4048_v16  ;;  %v10092_v34 = vld [vmem:[#allocation6 + $0x10] sm:$0xff]   ;;  %v3776_v11 = vor.u32 %v3774_v32, %v3773_v41  ;;  %v3778_v14 = vrot.slane %v3773_v41, 4  ;;  %v4758_v44 = vld [vmem:[#allocation2 + $0x24] sm:$0xe]  ;;  %8858 = vmatprep.subr.bf16.mxu0 %v10091_v40  ;;  %v10097_v16 = vld [vmem:[#allocation6 + $0x58] sm:$0xff]   ;;  %v4933_v60 = vrot.slane %v4931_v4, 1 }
 0x244   : > { %4050 = vst [vmem:[#allocation2 + $0x3c] sm:$0xf] %v4049_v37  ;;  %v3780_v5 = vshrl.u32 %v8287_v55, 16  ;;  %v3783_v1 = vshll.u32 %v8287_v55, 16  ;;  %v8288_v9 = vpack.c.bf16 %v3574_v23, %v3574_v23  ;;  %v9468_v57 = vadd.f32 %v8636_v12, %v11916_v58  ;;  %v4055_v40 = vld [vmem:[#allocation2 + $0x48] sm:$0xf]  ;;  %9321 = vmatpush3.bf16.msra.mxu1 %v10070_v22 }
 0x245   : > { %v9476_v42 = vadd.f32 %v8639_v36, %v11923_v24  ;;  %v12135_v15 = vld [vmem:[#allocation2 + $0x2c] ss:$0 sps:$4 sm:$0x11]   ;;  %v3777_v61 = vsel %vm12014_vm8, %v3769_v31, %v3776_v11  ;;  %v4053_v32 = vsel %vm12022_vm9, %v3778_v14, %v4052_v30  ;;  %v8136_v8 = vcombine.low %v4758_v44, %v12109_v43  ;;  %v8640_v41 = vpop.f32.mrb[124].mxu0  ;;  %9322 = vmatprep.subr.bf16.mxu1 %v12131_v52  ;;  %v10078_v44 = vld [vmem:[#allocation6 + $0x98] sm:$0xff]  }
 0x246   : > { %v3782_v18 = vrot.slane %v3780_v5, 7  ;;  %4051 = vst [vmem:[#allocation2 + $0x40] sm:$0xf] %v3777_v61  ;;  %4054 = vst [vmem:[#allocation2 + $0x44] sm:$0x1] %v4053_v32  ;;  %v3788_v55 = vshrl.u32 %v8288_v9, 16  ;;  %v4934_v58 = vor.u32 %v4933_v60, %v4929_v29  ;;  %v9469_v24 = vadd.f32 %v9468_v57, %v12045_v51  ;;  %8859 = vmatpush3.bf16.msra.mxu0 %v10092_v34 }
 0x247   : > { %v3791_v23 = vshll.u32 %v8288_v9, 16  ;;  %v8641_v4 = vpop.f32.mrb[125].mxu0  ;;  %v9477_v12 = vadd.f32 %v9476_v42, %v12052_v21  ;;  %v5178_v30 = vrot.slane %v8136_v8, 1  ;;  %v12144_v36 = vpop.f32.mrb[92].mxu1  ;;  %8860 = vmatprep.subr.bf16.mxu0 %v10097_v16  ;;  %v5179_v22 = vrot.slane %v12135_v15, 1  ;;  %v10098_v14 = vld [vmem:[#allocation6 + $0x18] sm:$0xff]  }
 0x248   : > { %v3785_v37 = vor.u32 %v3783_v1, %v3782_v18  ;;  %v3786_v31 = vrot.slane %v3782_v18, 4  ;;  %v8643_v43 = vpop.f32.mrb[126].mxu0  ;;  %v3790_v11 = vrot.slane %v3788_v55, 7  ;;  %v4939_v29 = vsel %vm568_vm0, %v4934_v58, %v4938_v56  ;;  %v12150_v34 = vpop.f32.mrb[93].mxu1  ;;  %v4059_v5 = vld [vmem:[#allocation2 + $0x50] sm:$0x1]  ;;  %9323 = vmatpush3.bf16.msra.mxu1 %v12131_v52 }
 0x249   : > { %v3543_v51 = vadd.f32 %v9469_v24, %v11996_v26  ;;  %v8644_v1 = vpop.f32.mrb[127].mxu0  ;;  %5469 = vmatprep.mubr.bf16.mxu0 %v4939_v29  ;;  %v3544_v9 = vadd.f32 %v9477_v12, %v11996_v26  ;;  %v4941_v16 = vshrl.u32 %v12114_v17, 16  ;;  %v4943_v60 = vshll.u32 %v12114_v17, 16  ;;  %v12157_v56 = vpop.f32.mrb[94].mxu1  ;;  %v10099_v57 = vld [vmem:[#allocation6 + $0x60] sm:$0xff]   ;;  %9324 = vmatprep.subr.bf16.mxu1 %v10078_v44 }
 0x24a   : > { %v4056_v21 = vsel %vm12009_vm7, %v3785_v37, %v4055_v40  ;;  %v3793_v42 = vor.u32 %v3791_v23, %v3790_v11  ;;  %v3795_v61 = vrot.slane %v3790_v11, 4  ;;  %5470 = vmatmul.mubr.bf16.gmra.mrb[164].mxu0 %v12111_v6  ;;  %v5180_v18 = vsel %vm825_vm1, %v5178_v30, %v5179_v22  ;;  %v12161_v8 = vpop.f32.mrb[95].mxu1  ;;  %v4715_v37 = vld [vmem:[#allocation2 + $0x34] sm:$0xf]  ;;  %v10082_v12 = vld [vmem:[#allocation6 + $0xa0] sm:$0xff]  }
 0x24b   : > { %4057 = vst [vmem:[#allocation2 + $0x48] sm:$0xf] %v4056_v21  ;;  %v3575_v32 = vmax.f32 %v3543_v51, 0.0  ;;  %v3576_v40 = vmax.f32 %v3544_v9, 0.0  ;;  %9290 = vmatprep.mubr.bf16.mxu1 %v5180_v18  ;;  %v4945_v55 = vrot.slane %v4943_v60, 1  ;;  %v4948_v58 = vshll.u32 %v12135_v15, 16  ;;  %8861 = vmatpush3.bf16.msra.mxu0 %v10098_v14 }
 0x24c   : > { %v8642_v24 = vadd.f32 %v8641_v4, %v8640_v41  ;;  %v3794_v23 = vsel %vm12014_vm8, %v3786_v31, %v3793_v42  ;;  %v4060_v6 = vsel %vm12022_vm9, %v3795_v61, %v4059_v5  ;;  %v8645_v11 = vadd.f32 %v8644_v1, %v8643_v43  ;;  %v12169_v29 = vld [vmem:[#allocation2 + $0x38] ss:$0 sps:$4 sm:$0x11]   ;;  %v10105_v51 = vld [vmem:[#allocation6 + $0x68] sm:$0xff]   ;;  %v4714_v21 = vld [vmem:[#allocation2 + $0x30] sm:$0xf]  ;;  %8862 = vmatprep.subr.bf16.mxu0 %v10099_v57 }
 0x24d   : > { %v8289_v30 = vpack.c.bf16 %v3575_v32, %v3575_v32  ;;  %v10100_v52 = vld [vmem:[#allocation6 + $0x20] sm:$0xff]   ;;  %4058 = vst [vmem:[#allocation2 + $0x4c] sm:$0xf] %v3794_v23  ;;  %4061 = vst [vmem:[#allocation2 + $0x50] sm:$0x1] %v4060_v6  ;;  %v8290_v15 = vpack.c.bf16 %v3576_v40, %v3576_v40  ;;  %v4946_v41 = vor.u32 %v4945_v55, %v4941_v16  ;;  %v4950_v4 = vrot.slane %v4948_v58, 1 }
 0x24e   : > { %v9464_v22 = vadd.f32 %v8642_v24, %v11912_v25  ;;  %v12172_v9 = vpop.f32.mrb[128].mxu0  ;;  %v9472_v43 = vadd.f32 %v8645_v11, %v11920_v3  ;;  %v12175_v1 = vcombine.low %v4714_v21, %v4715_v37  ;;  %9325 = vmatpush3.bf16.msra.mxu1 %v10078_v44  ;;  %v4759_v32 = vld [vmem:[#allocation2 + $0x30] sm:$0xe]  ;;  %v10088_v18 = vld [vmem:[#allocation6 + $0xa8] sm:$0xff]   ;;  %v5182_v3 = vrot.slane %v12169_v29, 1 }
 0x24f   : > { %v3797_v31 = vshrl.u32 %v8289_v30, 16  ;;  %v3800_v5 = vshll.u32 %v8289_v30, 16  ;;  %v8647_v14 = vpop.f32.mrb[129].mxu0  ;;  %v3805_v60 = vshrl.u32 %v8290_v15, 16  ;;  %v3808_v42 = vshll.u32 %v8290_v15, 16  ;;  %9326 = vmatprep.subr.bf16.mxu1 %v10082_v12  ;;  %8863 = vmatpush3.bf16.msra.mxu0 %v10100_v52  ;;  %v10106_v44 = vld [vmem:[#allocation6 + $0x28] sm:$0xff]  }
 0x250   : > { %v4951_v61 = vsel %vm568_vm0, %v4946_v41, %v4950_v4  ;;  %v9465_v16 = vadd.f32 %v9464_v22, %v12042_v45  ;;  %v8649_v25 = vpop.f32.mrb[130].mxu0  ;;  %v9473_v57 = vadd.f32 %v9472_v43, %v12050_v7  ;;  %v8137_v55 = vcombine.low %v4759_v32, %v4715_v37  ;;  %v4062_v24 = vld [vmem:[#allocation2 + $0x54] sm:$0xf]  ;;  %8864 = vmatprep.subr.bf16.mxu0 %v10105_v51  ;;  %v4066_v41 = vld [vmem:[#allocation2 + $0x5c] sm:$0x1]  ;;  %v10107_v52 = vld [vmem:[#allocation6 + $0x70] sm:$0xff]  }
 0x251   : > { %v3799_v40 = vrot.slane %v3797_v31, 7  ;;  %5477 = vmatprep.mubr.bf16.mxu0 %v4951_v61  ;;  %v8650_v58 = vpop.f32.mrb[131].mxu0  ;;  %v3807_v23 = vrot.slane %v3805_v60, 7  ;;  %v4953_v45 = vshrl.u32 %v12175_v1, 16  ;;  %v4955_v30 = vshll.u32 %v12175_v1, 16  ;;  %v10096_v43 = vld [vmem:[#allocation6 + $0xb0] sm:$0xff]  }
 0x252   : > { %v3545_v6 = vadd.f32 %v9465_v16, %v11996_v26  ;;  %5478 = vmatmul.mubr.bf16.gmra.mrb[168].mxu0 %v12114_v17  ;;  %v3546_v7 = vadd.f32 %v9473_v57, %v11996_v26  ;;  %v5181_v37 = vrot.slane %v8137_v55, 1  ;;  %9327 = vmatpush3.bf16.msra.mxu1 %v10082_v12  ;;  %v10108_v60 = vld [vmem:[#allocation6 + $0x30] sm:$0xff]   ;;  %v10115_v61 = vld [vmem:[#allocation6 + $0x78] sm:$0xff]   ;;  %v4960_v17 = vshll.u32 %v12169_v29, 16  ;;  %v4717_v32 = vld [vmem:[#allocation2 + $0x40] sm:$0xf] }
 0x253   : > { %v3802_v11 = vor.u32 %v3800_v5, %v3799_v40  ;;  %v3803_v15 = vrot.slane %v3799_v40, 4  ;;  %v3810_v4 = vor.u32 %v3808_v42, %v3807_v23  ;;  %v3812_v22 = vrot.slane %v3807_v23, 4  ;;  %9328 = vmatprep.subr.bf16.mxu1 %v10088_v18  ;;  %8865 = vmatpush3.bf16.msra.mxu0 %v10106_v44  ;;  %v4716_v55 = vld [vmem:[#allocation2 + $0x3c] sm:$0xf] }
 0x254   : > { %v3577_v21 = vmax.f32 %v3545_v6, 0.0  ;;  %v4957_v31 = vrot.slane %v4955_v30, 1  ;;  %v3578_v5 = vmax.f32 %v3546_v7, 0.0  ;;  %v5183_v16 = vsel %vm825_vm1, %v5181_v37, %v5182_v3  ;;  %v12194_v23 = vld [vmem:[#allocation2 + $0x44] ss:$0 sps:$4 sm:$0x11]   ;;  %8866 = vmatprep.subr.bf16.mxu0 %v10107_v52 }
 0x255   : > { %v4063_v51 = vsel %vm12009_vm7, %v3802_v11, %v4062_v24  ;;  %v3811_v12 = vsel %vm12014_vm8, %v3803_v15, %v3810_v4  ;;  %v4067_v42 = vsel %vm12022_vm9, %v3812_v22, %v4066_v41  ;;  %9291 = vmatmul.mubr.bf16.gmra.mrb[100].mxu1 %v5183_v16  ;;  %v8652_v24 = vpop.f32.mrb[132].mxu0  ;;  %v4962_v29 = vrot.slane %v4960_v17, 1  ;;  %v4760_v30 = vld [vmem:[#allocation2 + $0x3c] sm:$0xe]  ;;  %v10104_v4 = vld [vmem:[#allocation6 + $0xb8] sm:$0xff]  }
 0x256   : > { %4064 = vst [vmem:[#allocation2 + $0x54] sm:$0xf] %v4063_v51  ;;  %v8291_v40 = vpack.c.bf16 %v3577_v21, %v3577_v21  ;;  %v4958_v57 = vor.u32 %v4957_v31, %v4953_v45  ;;  %4065 = vst [vmem:[#allocation2 + $0x58] sm:$0xf] %v3811_v12  ;;  %v8292_v3 = vpack.c.bf16 %v3578_v5, %v3578_v5  ;;  %v8653_v11 = vpop.f32.mrb[133].mxu0  ;;  %9329 = vmatpush3.bf16.msra.mxu1 %v10088_v18 }
 0x257   : > { %4068 = vst [vmem:[#allocation2 + $0x5c] sm:$0x1] %v4067_v42  ;;  %v8648_v44 = vadd.f32 %v8647_v14, %v12172_v9  ;;  %v8651_v6 = vadd.f32 %v8650_v58, %v8649_v25  ;;  %v12197_v7 = vcombine.low %v4716_v55, %v4717_v32  ;;  %v8138_v45 = vcombine.low %v4760_v30, %v4717_v32  ;;  %v8655_v37 = vpop.f32.mrb[134].mxu0  ;;  %v10120_v14 = vld [vmem:[#allocation6 + $0x38] sm:$0xff]   ;;  %v4069_v5 = vld [vmem:[#allocation2 + $0x60] sm:$0xf] }
 0x258   : > { %v3814_v15 = vshrl.u32 %v8291_v40, 16  ;;  %v3817_v41 = vshll.u32 %v8291_v40, 16  ;;  %9330 = vmatprep.subr.bf16.mxu1 %v10096_v43  ;;  %v3822_v22 = vshrl.u32 %v8292_v3, 16  ;;  %v3825_v21 = vshll.u32 %v8292_v3, 16  ;;  %v8656_v9 = vpop.f32.mrb[135].mxu0  ;;  %8867 = vmatpush3.bf16.msra.mxu0 %v10108_v60 }
 0x259   : > { %v4963_v31 = vsel %vm568_vm0, %v4958_v57, %v4962_v29  ;;  %v9484_v51 = vadd.f32 %v8648_v44, %v11932_v49  ;;  %v9492_v18 = vadd.f32 %v8651_v6, %v11939_v46  ;;  %v5184_v58 = vrot.slane %v8138_v45, 1  ;;  %8868 = vmatprep.subr.bf16.mxu0 %v10115_v61  ;;  %v4073_v42 = vld [vmem:[#allocation2 + $0x68] sm:$0x1]  ;;  %v10114_v61 = vld [vmem:[#allocation6 + $0x1c0] sm:$0xff]   ;;  %v4719_v6 = vld [vmem:[#allocation2 + $0x4c] sm:$0xf] }
 0x25a   : > { %v3816_v25 = vrot.slane %v3814_v15, 7  ;;  %5485 = vmatprep.mubr.bf16.mxu0 %v4963_v31  ;;  %v5185_v52 = vrot.slane %v12194_v23, 1  ;;  %v3824_v16 = vrot.slane %v3822_v22, 7  ;;  %v4965_v32 = vshrl.u32 %v12197_v7, 16  ;;  %9331 = vmatpush3.bf16.msra.mxu1 %v10096_v43 }
 0x25b   : > { %v9485_v17 = vadd.f32 %v9484_v51, %v12067_v62  ;;  %5486 = vmatmul.mubr.bf16.gmra.mrb[172].mxu0 %v12175_v1  ;;  %v4967_v49 = vshll.u32 %v12197_v7, 16  ;;  %v9493_v46 = vadd.f32 %v9492_v18, %v12074_v50  ;;  %9332 = vmatprep.subr.bf16.mxu1 %v10104_v4  ;;  %v10055_v3 = vld [vmem:[#allocation2 + $0x50] ss:$0 sps:$4 sm:$0x11]   ;;  %v4972_v44 = vshll.u32 %v12194_v23, 16 }
 0x25c   : > { %v3819_v60 = vor.u32 %v3817_v41, %v3816_v25  ;;  %v3820_v12 = vrot.slane %v3816_v25, 4  ;;  %v5186_v40 = vsel %vm825_vm1, %v5184_v58, %v5185_v52  ;;  %v3827_v57 = vor.u32 %v3825_v21, %v3824_v16  ;;  %8869 = vmatpush3.bf16.msra.mxu0 %v10120_v14  ;;  %v4718_v21 = vld [vmem:[#allocation2 + $0x48] sm:$0xf] }
 0x25d   : > { %v3829_v55 = vrot.slane %v3824_v16, 4  ;;  %v3547_v62 = vadd.f32 %v9485_v17, %v11996_v26  ;;  %9294 = vmatprep.mubr.bf16.mxu1 %v5186_v40  ;;  %v4969_v1 = vrot.slane %v4967_v49, 1  ;;  %v3548_v29 = vadd.f32 %v9493_v46, %v11996_v26  ;;  %v8658_v30 = vpop.f32.mrb[136].mxu0 }
 0x25e   : > { %v4070_v43 = vsel %vm12009_vm7, %v3819_v60, %v4069_v5  ;;  %v8654_v50 = vadd.f32 %v8653_v11, %v8652_v24  ;;  %v3828_v15 = vsel %vm12014_vm8, %v3820_v12, %v3827_v57  ;;  %v8659_v31 = vpop.f32.mrb[137].mxu0  ;;  %9333 = vmatpush3.bf16.msra.mxu1 %v10104_v4  ;;  %v4974_v14 = vrot.slane %v4972_v44, 1  ;;  %v4761_v11 = vld [vmem:[#allocation2 + $0x48] sm:$0xe] }
 0x25f   : > { %4071 = vst [vmem:[#allocation2 + $0x60] sm:$0xf] %v4070_v43  ;;  %v4074_v41 = vsel %vm12022_vm9, %v3829_v55, %v4073_v42  ;;  %v3579_v45 = vmax.f32 %v3547_v62, 0.0  ;;  %v4970_v22 = vor.u32 %v4969_v1, %v4965_v32  ;;  %4072 = vst [vmem:[#allocation2 + $0x64] sm:$0xf] %v3828_v15  ;;  %v3580_v51 = vmax.f32 %v3548_v29, 0.0  ;;  %8990 = vmatprep.subr.bf16.mxu1 %v10114_v61 }
 0x260   : > { %4075 = vst [vmem:[#allocation2 + $0x68] sm:$0x1] %v4074_v41  ;;  %v9480_v23 = vadd.f32 %v8654_v50, %v11928_v53  ;;  %v8657_v24 = vadd.f32 %v8656_v9, %v8655_v37  ;;  %v8661_v25 = vpop.f32.mrb[138].mxu0  ;;  %v12219_v58 = vcombine.low %v4718_v21, %v4719_v6  ;;  %v8139_v52 = vcombine.low %v4761_v11, %v4719_v6  ;;  %v4076_v9 = vld [vmem:[#allocation2 + $0x6c] sm:$0xf] }
 0x261   : > { %v8293_v18 = vpack.c.bf16 %v3579_v45, %v3579_v45  ;;  %v5188_v5 = vrot.slane %v10055_v3, 1  ;;  %v8662_v16 = vpop.f32.mrb[139].mxu0  ;;  %v8294_v17 = vpack.c.bf16 %v3580_v51, %v3580_v51  ;;  %v4975_v32 = vsel %vm568_vm0, %v4970_v22, %v4974_v14  ;;  %v12233_v43 = vld [vmem:[%s13345_s3] ss:$0 sm:$0xff]  ;;  %v4080_v6 = vld [vmem:[#allocation2 + $0x74] sm:$0x1] }
 0x262   : > { %v9481_v4 = vadd.f32 %v9480_v23, %v12065_v39  ;;  %v9488_v49 = vadd.f32 %v8657_v24, %v11936_v28  ;;  %5493 = vmatprep.mubr.bf16.mxu0 %v4975_v32  ;;  %v5187_v53 = vrot.slane %v8139_v52, 1  ;;  %v4977_v37 = vshrl.u32 %v12219_v58, 16  ;;  %v4721_v11 = vld [vmem:[#allocation2 + $0x58] sm:$0xf] }
 0x263   : > { %v3831_v60 = vshrl.u32 %v8293_v18, 16  ;;  %v3834_v12 = vshll.u32 %v8293_v18, 16  ;;  %v3839_v42 = vshrl.u32 %v8294_v17, 16  ;;  %v3842_v46 = vshll.u32 %v8294_v17, 16  ;;  %5494 = vmatmul.mubr.bf16.gmra.mrb[176].mxu0 %v12197_v7 }
 0x264   : > { %v3549_v40 = vadd.f32 %v9481_v4, %v11996_v26  ;;  %v9489_v61 = vadd.f32 %v9488_v49, %v12069_v47  ;;  %v5189_v39 = vsel %vm825_vm1, %v5187_v53, %v5188_v5  ;;  %v4979_v28 = vshll.u32 %v12219_v58, 16  ;;  %v12236_v7 = vld [vmem:[#allocation2 + $0x5c] ss:$0 sps:$4 sm:$0x11]  }
 0x265   : > { %v3833_v57 = vrot.slane %v3831_v60, 7  ;;  %v4984_v55 = vshll.u32 %v10055_v3, 16  ;;  %v3841_v62 = vrot.slane %v3839_v42, 7  ;;  %9295 = vmatmul.mubr.bf16.gmra.mrb[104].mxu1 %v5189_v39  ;;  %v8660_v26 = vadd.f32 %v8659_v31, %v8658_v30  ;;  %v8664_v47 = vpop.f32.mrb[140].mxu0  ;;  %v4083_v42 = vld [vmem:[#allocation2 + $0x78] sm:$0xf] }
 0x266   : > { %v3581_v1 = vmax.f32 %v3549_v40, 0.0  ;;  %v3550_v29 = vadd.f32 %v12233_v43, %v9489_v61  ;;  %v4981_v15 = vrot.slane %v4979_v28, 1  ;;  %v8665_v3 = vpop.f32.mrb[141].mxu0  ;;  %v8663_v31 = vadd.f32 %v8662_v16, %v8661_v25  ;;  %v4720_v25 = vld [vmem:[#allocation2 + $0x54] sm:$0xf] }
 0x267   : > { %v3836_v44 = vor.u32 %v3834_v12, %v3833_v57  ;;  %v3837_v50 = vrot.slane %v3833_v57, 4  ;;  %v4986_v41 = vrot.slane %v4984_v55, 1  ;;  %v3844_v45 = vor.u32 %v3842_v46, %v3841_v62  ;;  %v8667_v14 = vpop.f32.mrb[142].mxu0  ;;  %v4762_v16 = vld [vmem:[#allocation2 + $0x54] sm:$0xe] }
 0x268   : > { %v3846_v22 = vrot.slane %v3841_v62, 4  ;;  %v8295_v21 = vpack.c.bf16 %v3581_v1, %v3581_v1  ;;  %v3582_v51 = vmax.f32 %v3550_v29, 0.0  ;;  %v4982_v24 = vor.u32 %v4981_v15, %v4977_v37  ;;  %v8668_v18 = vpop.f32.mrb[143].mxu0 }
 0x269   : > { %v4077_v23 = vsel %vm12009_vm7, %v3836_v44, %v4076_v9  ;;  %v9500_v30 = vadd.f32 %v8660_v26, %v11948_v54  ;;  %v3845_v52 = vsel %vm12014_vm8, %v3837_v50, %v3844_v45  ;;  %v9508_v54 = vadd.f32 %v8663_v31, %v11955_v63  ;;  %v4087_v50 = vld [vmem:[#allocation2 + $0x80] sm:$0x1] }
 0x26a   : > { %4078 = vst [vmem:[#allocation2 + $0x6c] sm:$0xf] %v4077_v23  ;;  %v4081_v5 = vsel %vm12022_vm9, %v3846_v22, %v4080_v6  ;;  %v3848_v17 = vshrl.u32 %v8295_v21, 16  ;;  %v3851_v32 = vshll.u32 %v8295_v21, 16  ;;  %4079 = vst [vmem:[#allocation2 + $0x70] sm:$0xf] %v3845_v52  ;;  %v8296_v4 = vpack.c.bf16 %v3582_v51, %v3582_v51 }
 0x26b   : > { %4082 = vst [vmem:[#allocation2 + $0x74] sm:$0x1] %v4081_v5  ;;  %v4987_v49 = vsel %vm568_vm0, %v4982_v24, %v4986_v41  ;;  %v9501_v60 = vadd.f32 %v9500_v30, %v12090_v33  ;;  %v12248_v53 = vcombine.low %v4720_v25, %v4721_v11  ;;  %v8140_v37 = vcombine.low %v4762_v16, %v4721_v11  ;;  %v10061_v23 = vld [vmem:[#allocation2 + $0x68] ss:$0 sps:$4 sm:$0x11]  }
 0x26c   : > { %v3850_v12 = vrot.slane %v3848_v17, 7  ;;  %5501 = vmatprep.mubr.bf16.mxu0 %v4987_v49  ;;  %v5191_v9 = vrot.slane %v12236_v7, 1  ;;  %v3856_v46 = vshrl.u32 %v8296_v4, 16  ;;  %v3859_v40 = vshll.u32 %v8296_v4, 16  ;;  %v4723_v5 = vld [vmem:[#allocation2 + $0x64] sm:$0xf] }
 0x26d   : > { %v3551_v61 = vadd.f32 %v12233_v43, %v9501_v60  ;;  %5502 = vmatmul.mubr.bf16.gmra.mrb[180].mxu0 %v12219_v58  ;;  %v9509_v33 = vadd.f32 %v9508_v54, %v12097_v27  ;;  %v5190_v39 = vrot.slane %v8140_v37, 1  ;;  %v4989_v28 = vshrl.u32 %v12248_v53, 16  ;;  %v12255_v55 = vpop.f32.mrb[144].mxu0  ;;  %v4722_v54 = vld [vmem:[#allocation2 + $0x60] sm:$0xf] }
 0x26e   : > { %v3853_v57 = vor.u32 %v3851_v32, %v3850_v12  ;;  %v3854_v63 = vrot.slane %v3850_v12, 4  ;;  %v3858_v62 = vrot.slane %v3856_v46, 7  ;;  %v4991_v26 = vshll.u32 %v12248_v53, 16  ;;  %v12259_v44 = vpop.f32.mrb[145].mxu0  ;;  %v4090_v12 = vld [vmem:[#allocation2 + $0x84] sm:$0xf] }
 0x26f   : > { %v3583_v1 = vmax.f32 %v3551_v61, 0.0  ;;  %v3552_v29 = vadd.f32 %v12233_v43, %v9509_v33  ;;  %v5192_v27 = vsel %vm825_vm1, %v5190_v39, %v5191_v9  ;;  %v4996_v6 = vshll.u32 %v12236_v7, 16  ;;  %v12265_v41 = vpop.f32.mrb[146].mxu0 }
 0x270   : > { %v4084_v58 = vsel %vm12009_vm7, %v3853_v57, %v4083_v42  ;;  %v8666_v15 = vadd.f32 %v8665_v3, %v8664_v47  ;;  %v3861_v45 = vor.u32 %v3859_v40, %v3858_v62  ;;  %v3863_v22 = vrot.slane %v3858_v62, 4  ;;  %9298 = vmatprep.mubr.bf16.mxu1 %v5192_v27  ;;  %v8674_v24 = vpop.f32.mrb[147].mxu0 }
 0x271   : > { %4085 = vst [vmem:[#allocation2 + $0x78] sm:$0xf] %v4084_v58  ;;  %v8297_v21 = vpack.c.bf16 %v3583_v1, %v3583_v1  ;;  %v3584_v51 = vmax.f32 %v3552_v29, 0.0  ;;  %v4993_v30 = vrot.slane %v4991_v26, 1  ;;  %v4998_v31 = vrot.slane %v4996_v6, 1 }
 0x272   : > { %v9496_v11 = vadd.f32 %v8666_v15, %v11944_v0  ;;  %v8669_v52 = vadd.f32 %v8668_v18, %v8667_v14  ;;  %v3862_v7 = vsel %vm12014_vm8, %v3854_v63, %v3861_v45  ;;  %v4088_v47 = vsel %vm12022_vm9, %v3863_v22, %v4087_v50  ;;  %v4763_v0 = vld [vmem:[#allocation2 + $0x60] sm:$0xe]  ;;  %v4094_v26 = vld [vmem:[#allocation2 + $0x8c] sm:$0x1] }
 0x273   : > { %v3865_v3 = vshrl.u32 %v8297_v21, 16  ;;  %v3868_v17 = vshll.u32 %v8297_v21, 16  ;;  %4086 = vst [vmem:[#allocation2 + $0x7c] sm:$0xf] %v3862_v7  ;;  %4089 = vst [vmem:[#allocation2 + $0x80] sm:$0x1] %v4088_v47  ;;  %v8298_v32 = vpack.c.bf16 %v3584_v51, %v3584_v51  ;;  %v4994_v4 = vor.u32 %v4993_v30, %v4989_v28 }
 0x274   : > { %v9497_v49 = vadd.f32 %v9496_v11, %v12087_v38  ;;  %v9504_v60 = vadd.f32 %v8669_v52, %v11952_v20  ;;  %v12274_v18 = vcombine.low %v4722_v54, %v4723_v5  ;;  %v8141_v25 = vcombine.low %v4763_v0, %v4723_v5  ;;  %v10064_v22 = vld [vmem:[#allocation2 + $0x74] ss:$0 sps:$4 sm:$0x11]   ;;  %v4725_v11 = vld [vmem:[#allocation2 + $0x70] sm:$0xf] }
 0x275   : > { %v3867_v14 = vrot.slane %v3865_v3, 7  ;;  %v5194_v16 = vrot.slane %v10061_v23, 1  ;;  %v3873_v37 = vshrl.u32 %v8298_v32, 16  ;;  %v3876_v9 = vshll.u32 %v8298_v32, 16  ;;  %v12278_v40 = vpop.f32.mrb[148].mxu0 }
 0x276   : > { %v4999_v42 = vsel %vm568_vm0, %v4994_v4, %v4998_v31  ;;  %v3553_v46 = vadd.f32 %v12233_v43, %v9497_v49  ;;  %v9505_v20 = vadd.f32 %v9504_v60, %v12095_v59  ;;  %v5193_v33 = vrot.slane %v8141_v25, 1  ;;  %v12281_v57 = vpop.f32.mrb[149].mxu0  ;;  %v4097_v54 = vld [vmem:[#allocation2 + $0x90] sm:$0xf] }
 0x277   : > { %v3870_v61 = vor.u32 %v3868_v17, %v3867_v14  ;;  %v3871_v38 = vrot.slane %v3867_v14, 4  ;;  %5509 = vmatprep.mubr.bf16.mxu0 %v4999_v42  ;;  %v3875_v63 = vrot.slane %v3873_v37, 7  ;;  %v5001_v28 = vshrl.u32 %v12274_v18, 16  ;;  %v12286_v1 = vpop.f32.mrb[150].mxu0 }
 0x278   : > { %v3585_v39 = vmax.f32 %v3553_v46, 0.0  ;;  %5510 = vmatmul.mubr.bf16.gmra.mrb[184].mxu0 %v12248_v53  ;;  %v5003_v62 = vshll.u32 %v12274_v18, 16  ;;  %v3554_v58 = vadd.f32 %v12233_v43, %v9505_v20  ;;  %v5195_v59 = vsel %vm825_vm1, %v5193_v33, %v5194_v16  ;;  %v12292_v27 = vpop.f32.mrb[151].mxu0  ;;  %v13424_v16 = vld [vmem:[#allocation16_spill] sm:$0xff] }
 0x279   : > { %v4091_v29 = vsel %vm12009_vm7, %v3870_v61, %v4090_v12  ;;  %v5008_v50 = vshll.u32 %v10061_v23, 16  ;;  %v3878_v6 = vor.u32 %v3876_v9, %v3875_v63  ;;  %v3880_v53 = vrot.slane %v3875_v63, 4  ;;  %9299 = vmatmul.mubr.bf16.gmra.mrb[108].mxu1 %v5195_v59 }
 0x27a   : > { %4092 = vst [vmem:[#allocation2 + $0x84] sm:$0xf] %v4091_v29  ;;  %v8299_v15 = vpack.c.bf16 %v3585_v39, %v3585_v39  ;;  %v5005_v45 = vrot.slane %v5003_v62, 1  ;;  %v3586_v21 = vmax.f32 %v3554_v58, 0.0  ;;  %v8672_v30 = vadd.f32 %v12259_v44, %v12255_v55  ;;  %v4724_v55 = vld [vmem:[#allocation2 + $0x6c] sm:$0xf] }
 0x27b   : > { %v5010_v51 = vrot.slane %v5008_v50, 1  ;;  %v8675_v31 = vadd.f32 %v8674_v24, %v12265_v41  ;;  %v3879_v23 = vsel %vm12014_vm8, %v3871_v38, %v3878_v6  ;;  %v4095_v52 = vsel %vm12022_vm9, %v3880_v53, %v4094_v26  ;;  %v4764_v44 = vld [vmem:[#allocation2 + $0x6c] sm:$0xe]  ;;  %v4727_v50 = vld [vmem:[#allocation2 + $0x7c] sm:$0xf] }
 0x27c   : > { %v3882_v5 = vshrl.u32 %v8299_v15, 16  ;;  %v3885_v7 = vshll.u32 %v8299_v15, 16  ;;  %4093 = vst [vmem:[#allocation2 + $0x88] sm:$0xf] %v3879_v23  ;;  %4096 = vst [vmem:[#allocation2 + $0x8c] sm:$0x1] %v4095_v52  ;;  %v8300_v47 = vpack.c.bf16 %v3586_v21, %v3586_v21  ;;  %v5006_v3 = vor.u32 %v5005_v45, %v5001_v28 }
 0x27d   : > { %v9516_v17 = vadd.f32 %v8672_v30, %v11964_v19  ;;  %v9524_v32 = vadd.f32 %v8675_v31, %v11971_v48  ;;  %v12303_v24 = vcombine.low %v4724_v55, %v4725_v11  ;;  %v8142_v4 = vcombine.low %v4764_v44, %v4725_v11  ;;  %v4101_v28 = vld [vmem:[#allocation2 + $0x98] sm:$0x1]  ;;  %v10068_v11 = vld [vmem:[#allocation2 + $0x80] ss:$0 sps:$4 sm:$0x11]   ;;  %v13425_v52 = vld [vmem:[#allocation14_spill] sm:$0xff] }
 0x27e   : > { %v3884_v41 = vrot.slane %v3882_v5, 7  ;;  %v5197_v49 = vrot.slane %v10064_v22, 1  ;;  %v12305_v60 = vpop.f32.mrb[152].mxu0  ;;  %v3890_v0 = vshrl.u32 %v8300_v47, 16  ;;  %v3893_v14 = vshll.u32 %v8300_v47, 16 }
 0x27f   : > { %v5011_v25 = vsel %vm568_vm0, %v5006_v3, %v5010_v51  ;;  %v9517_v12 = vadd.f32 %v9516_v17, %v13424_v16  ;;  %v12309_v37 = vpop.f32.mrb[153].mxu0  ;;  %v9525_v9 = vadd.f32 %v9524_v32, %v12128_v35  ;;  %v5196_v42 = vrot.slane %v8142_v4, 1  ;;  %v4726_v31 = vld [vmem:[#allocation2 + $0x78] sm:$0xf]  ;;  %v13427_v4 = vld [vmem:[#allocation13_spill] sm:$0xff] }
 0x280   : > { %v3887_v19 = vor.u32 %v3885_v7, %v3884_v41  ;;  %v3888_v48 = vrot.slane %v3884_v41, 4  ;;  %5517 = vmatprep.mubr.bf16.mxu0 %v5011_v25  ;;  %v12312_v46 = vpop.f32.mrb[154].mxu0  ;;  %v3892_v61 = vrot.slane %v3890_v0, 7  ;;  %v5013_v20 = vshrl.u32 %v12303_v24, 16  ;;  %v13426_v7 = vld [vmem:[#allocation17_spill] sm:$0xff] }
 0x281   : > { %v3555_v38 = vadd.f32 %v12233_v43, %v9517_v12  ;;  %5518 = vmatmul.mubr.bf16.gmra.mrb[188].mxu0 %v12274_v18  ;;  %v5015_v33 = vshll.u32 %v12303_v24, 16  ;;  %v12318_v63 = vpop.f32.mrb[155].mxu0  ;;  %v3556_v35 = vadd.f32 %v12233_v43, %v9525_v9  ;;  %v5198_v62 = vsel %vm825_vm1, %v5196_v42, %v5197_v49  ;;  %v4104_v9 = vld [vmem:[#allocation2 + $0x9c] sm:$0xf] }
 0x282   : > { %v4098_v39 = vsel %vm12009_vm7, %v3887_v19, %v4097_v54  ;;  %v5020_v29 = vshll.u32 %v10064_v22, 16  ;;  %v3895_v26 = vor.u32 %v3893_v14, %v3892_v61  ;;  %v3897_v58 = vrot.slane %v3892_v61, 4  ;;  %9302 = vmatprep.mubr.bf16.mxu1 %v5198_v62  ;;  %v13428_v54 = vld [vmem:[#allocation21_spill] sm:$0xff] }
 0x283   : > { %4099 = vst [vmem:[#allocation2 + $0x90] sm:$0xf] %v4098_v39  ;;  %v3587_v59 = vmax.f32 %v3555_v38, 0.0  ;;  %v5017_v18 = vrot.slane %v5015_v33, 1  ;;  %v3588_v6 = vmax.f32 %v3556_v35, 0.0  ;;  %v8678_v15 = vadd.f32 %v12281_v57, %v12278_v40 }
 0x284   : > { %v5022_v53 = vrot.slane %v5020_v29, 1  ;;  %v8681_v45 = vadd.f32 %v12292_v27, %v12286_v1  ;;  %v3896_v21 = vsel %vm12014_vm8, %v3888_v48, %v3895_v26  ;;  %v4102_v22 = vsel %vm12022_vm9, %v3897_v58, %v4101_v28  ;;  %v4765_v57 = vld [vmem:[#allocation2 + $0x78] sm:$0xe]  ;;  %v4108_v28 = vld [vmem:[#allocation2 + $0xa4] sm:$0x1] }
 0x285   : > { %v8301_v51 = vpack.c.bf16 %v3587_v59, %v3587_v59  ;;  %v5018_v30 = vor.u32 %v5017_v18, %v5013_v20  ;;  %4100 = vst [vmem:[#allocation2 + $0x94] sm:$0xf] %v3896_v21  ;;  %4103 = vst [vmem:[#allocation2 + $0x98] sm:$0x1] %v4102_v22  ;;  %v8302_v23 = vpack.c.bf16 %v3588_v6, %v3588_v6  ;;  %v5200_v12 = vrot.slane %v10068_v11, 1 }
 0x286   : > { %v9512_v5 = vadd.f32 %v8678_v15, %v13425_v52  ;;  %v9520_v40 = vadd.f32 %v8681_v45, %v13426_v7  ;;  %v12334_v47 = vcombine.low %v4726_v31, %v4727_v50  ;;  %v12336_v1 = vpop.f32.mrb[156].mxu0  ;;  %v8143_v32 = vcombine.low %v4765_v57, %v4727_v50  ;;  %v4729_v59 = vld [vmem:[#allocation2 + $0x88] sm:$0xf]  ;;  %v4766_v57 = vld [vmem:[#allocation2 + $0x84] sm:$0xe] }
 0x287   : > { %v3899_v27 = vshrl.u32 %v8301_v51, 16  ;;  %v3902_v3 = vshll.u32 %v8301_v51, 16  ;;  %v5023_v17 = vsel %vm568_vm0, %v5018_v30, %v5022_v53  ;;  %v12339_v55 = vpop.f32.mrb[157].mxu0  ;;  %v3907_v44 = vshrl.u32 %v8302_v23, 16  ;;  %v4728_v51 = vld [vmem:[#allocation2 + $0x84] sm:$0xf] }
 0x288   : > { %v3910_v41 = vshll.u32 %v8302_v23, 16  ;;  %5525 = vmatprep.mubr.bf16.mxu0 %v5023_v17  ;;  %v9513_v49 = vadd.f32 %v9512_v5, %v13427_v4  ;;  %v9521_v0 = vadd.f32 %v9520_v40, %v13428_v54  ;;  %v12343_v14 = vpop.f32.mrb[158].mxu0  ;;  %v5199_v16 = vrot.slane %v8143_v32, 1  ;;  %v10072_v30 = vld [vmem:[#allocation2 + $0x8c] ss:$0 sps:$4 sm:$0x11]  }
 0x289   : > { %v3901_v25 = vrot.slane %v3899_v27, 7  ;;  %5526 = vmatmul.mubr.bf16.gmra.mrb[192].mxu0 %v12303_v24  ;;  %v5025_v19 = vshrl.u32 %v12334_v47, 16  ;;  %v12347_v48 = vpop.f32.mrb[159].mxu0  ;;  %v3909_v42 = vrot.slane %v3907_v44, 7  ;;  %v5027_v20 = vshll.u32 %v12334_v47, 16  ;;  %v13430_v17 = vld [vmem:[#allocation19_spill] sm:$0xff] }
 0x28a   : > { %v3557_v61 = vadd.f32 %v12233_v43, %v9513_v49  ;;  %v3558_v38 = vadd.f32 %v12233_v43, %v9521_v0  ;;  %v5201_v35 = vsel %vm825_vm1, %v5199_v16, %v5200_v12  ;;  %v5032_v24 = vshll.u32 %v10068_v11, 16  ;;  %v13429_v11 = vld [vmem:[#allocation12_spill] sm:$0xff]  ;;  %v4115_v54 = vld [vmem:[#allocation2 + $0xb0] sm:$0x1] }
 0x28b   : > { %v3904_v33 = vor.u32 %v3902_v3, %v3901_v25  ;;  %v3905_v39 = vrot.slane %v3901_v25, 4  ;;  %v3912_v62 = vor.u32 %v3910_v41, %v3909_v42  ;;  %v3914_v29 = vrot.slane %v3909_v42, 4  ;;  %9303 = vmatmul.mubr.bf16.gmra.mrb[112].mxu1 %v5201_v35 }
 0x28c   : > { %v3589_v26 = vmax.f32 %v3557_v61, 0.0  ;;  %v3590_v58 = vmax.f32 %v3558_v38, 0.0  ;;  %v5029_v50 = vrot.slane %v5027_v20, 1  ;;  %v5034_v6 = vrot.slane %v5032_v24, 1 }
 0x28d   : > { %v4105_v18 = vsel %vm12009_vm7, %v3904_v33, %v4104_v9  ;;  %v8684_v53 = vadd.f32 %v12309_v37, %v12305_v60  ;;  %v3913_v15 = vsel %vm12014_vm8, %v3905_v39, %v3912_v62  ;;  %v4109_v45 = vsel %vm12022_vm9, %v3914_v29, %v4108_v28  ;;  %v4731_v39 = vld [vmem:[#allocation2 + $0x94] sm:$0xf]  ;;  %v10076_v24 = vld [vmem:[#allocation2 + $0x98] ss:$0 sps:$4 sm:$0x11]  }
 0x28e   : > { %4106 = vst [vmem:[#allocation2 + $0x9c] sm:$0xf] %v4105_v18  ;;  %v8303_v21 = vpack.c.bf16 %v3589_v26, %v3589_v26  ;;  %v8304_v22 = vpack.c.bf16 %v3590_v58, %v3590_v58  ;;  %4107 = vst [vmem:[#allocation2 + $0xa0] sm:$0xf] %v3913_v15  ;;  %v5030_v31 = vor.u32 %v5029_v50, %v5025_v19  ;;  %v5203_v49 = vrot.slane %v10072_v30, 1 }
 0x28f   : > { %4110 = vst [vmem:[#allocation2 + $0xa4] sm:$0x1] %v4109_v45  ;;  %v9532_v23 = vadd.f32 %v8684_v53, %v13429_v11  ;;  %v8687_v52 = vadd.f32 %v12318_v63, %v12312_v46  ;;  %v12364_v60 = vcombine.low %v4728_v51, %v4729_v59  ;;  %v8144_v44 = vcombine.low %v4766_v57, %v4729_v59  ;;  %v4111_v63 = vld [vmem:[#allocation2 + $0xa8] sm:$0xf]  ;;  %v4730_v59 = vld [vmem:[#allocation2 + $0x90] sm:$0xf] }
 0x290   : > { %v3916_v37 = vshrl.u32 %v8303_v21, 16  ;;  %v3919_v5 = vshll.u32 %v8303_v21, 16  ;;  %v3924_v7 = vshrl.u32 %v8304_v22, 16  ;;  %v3927_v40 = vshll.u32 %v8304_v22, 16  ;;  %v4767_v18 = vld [vmem:[#allocation2 + $0x90] sm:$0xe] }
 0x291   : > { %v5035_v27 = vsel %vm568_vm0, %v5030_v31, %v5034_v6  ;;  %v9533_v3 = vadd.f32 %v9532_v23, %v12150_v34  ;;  %v9540_v32 = vadd.f32 %v8687_v52, %v13430_v17  ;;  %v5037_v46 = vshrl.u32 %v12364_v60, 16  ;;  %v13431_v51 = vld [vmem:[#allocation18_spill] sm:$0xff]  ;;  %v4118_v31 = vld [vmem:[#allocation2 + $0xb4] sm:$0xf]  ;;  %v13432_v23 = vld [vmem:[#allocation20_spill] sm:$0xff] }
 0x292   : > { %v3918_v41 = vrot.slane %v3916_v37, 7  ;;  %v3926_v4 = vrot.slane %v3924_v7, 7  ;;  %5533 = vmatprep.mubr.bf16.mxu0 %v5035_v27  ;;  %v5202_v16 = vrot.slane %v8144_v44, 1  ;;  %v5039_v34 = vshll.u32 %v12364_v60, 16 }
 0x293   : > { %v3559_v0 = vadd.f32 %v12233_v43, %v9533_v3  ;;  %5534 = vmatmul.mubr.bf16.gmra.mrb[196].mxu0 %v12334_v47  ;;  %v9541_v25 = vadd.f32 %v9540_v32, %v12161_v8  ;;  %v5044_v35 = vshll.u32 %v10072_v30, 16  ;;  %v8690_v58 = vadd.f32 %v12339_v55, %v12336_v1 }
 0x294   : > { %v3921_v12 = vor.u32 %v3919_v5, %v3918_v41  ;;  %v3922_v19 = vrot.slane %v3918_v41, 4  ;;  %v3929_v9 = vor.u32 %v3927_v40, %v3926_v4  ;;  %v3931_v42 = vrot.slane %v3926_v4, 4 }
 0x295   : > { %v3591_v61 = vmax.f32 %v3559_v0, 0.0  ;;  %v3560_v38 = vadd.f32 %v12233_v43, %v9541_v25  ;;  %v5204_v20 = vsel %vm825_vm1, %v5202_v16, %v5203_v49  ;;  %v5041_v33 = vrot.slane %v5039_v34, 1  ;;  %v4732_v17 = vld [vmem:[#allocation2 + $0x9c] sm:$0xf] }
 0x296   : > { %v4112_v28 = vsel %vm12009_vm7, %v3921_v12, %v4111_v63  ;;  %v3930_v8 = vsel %vm12014_vm8, %v3922_v19, %v3929_v9  ;;  %v4116_v47 = vsel %vm12022_vm9, %v3931_v42, %v4115_v54  ;;  %9306 = vmatprep.mubr.bf16.mxu1 %v5204_v20  ;;  %v5046_v50 = vrot.slane %v5044_v35, 1  ;;  %v10080_v49 = vld [vmem:[#allocation2 + $0xa4] ss:$0 sps:$4 sm:$0x11]   ;;  %v4768_v34 = vld [vmem:[#allocation2 + $0x9c] sm:$0xe] }
 0x297   : > { %4113 = vst [vmem:[#allocation2 + $0xa8] sm:$0xf] %v4112_v28  ;;  %4114 = vst [vmem:[#allocation2 + $0xac] sm:$0xf] %v3930_v8  ;;  %v8305_v62 = vpack.c.bf16 %v3591_v61, %v3591_v61  ;;  %v3592_v29 = vmax.f32 %v3560_v38, 0.0  ;;  %v5042_v26 = vor.u32 %v5041_v33, %v5037_v46  ;;  %v8693_v6 = vadd.f32 %v12347_v48, %v12343_v14 }
 0x298   : > { %4117 = vst [vmem:[#allocation2 + $0xb0] sm:$0x1] %v4116_v47  ;;  %v12386_v53 = vcombine.low %v4730_v59, %v4731_v39  ;;  %v8145_v15 = vcombine.low %v4767_v18, %v4731_v39  ;;  %v9528_v30 = vadd.f32 %v8690_v58, %v13431_v51  ;;  %v5206_v55 = vrot.slane %v10076_v24, 1  ;;  %v4733_v48 = vld [vmem:[#allocation2 + $0xa0] sm:$0xf] }
 0x299   : > { %v3933_v45 = vshrl.u32 %v8305_v62, 16  ;;  %v3936_v21 = vshll.u32 %v8305_v62, 16  ;;  %v8306_v22 = vpack.c.bf16 %v3592_v29, %v3592_v29  ;;  %v5047_v11 = vsel %vm568_vm0, %v5042_v26, %v5046_v50 }
 0x29a   : > { %v9536_v52 = vadd.f32 %v8693_v6, %v13432_v23  ;;  %v5205_v1 = vrot.slane %v8145_v15, 1  ;;  %5541 = vmatprep.mubr.bf16.mxu0 %v5047_v11  ;;  %v9529_v14 = vadd.f32 %v9528_v30, %v12144_v36  ;;  %v5049_v27 = vshrl.u32 %v12386_v53, 16  ;;  %v4122_v36 = vld [vmem:[#allocation2 + $0xbc] sm:$0x1]  ;;  %v4125_v30 = vld [vmem:[#allocation2 + $0xc0] sm:$0xf] }
 0x29b   : > { %v3935_v37 = vrot.slane %v3933_v45, 7  ;;  %v3941_v5 = vshrl.u32 %v8306_v22, 16  ;;  %v3944_v7 = vshll.u32 %v8306_v22, 16  ;;  %5542 = vmatmul.mubr.bf16.gmra.mrb[200].mxu0 %v12364_v60  ;;  %v5051_v3 = vshll.u32 %v12386_v53, 16 }
 0x29c   : > { %v9537_v40 = vadd.f32 %v9536_v52, %v12157_v56  ;;  %v5207_v57 = vsel %vm825_vm1, %v5205_v1, %v5206_v55  ;;  %v3561_v4 = vadd.f32 %v12233_v43, %v9529_v14  ;;  %v5056_v63 = vshll.u32 %v10076_v24, 16 }
 0x29d   : > { %v3938_v32 = vor.u32 %v3936_v21, %v3935_v37  ;;  %v3939_v44 = vrot.slane %v3935_v37, 4  ;;  %v3943_v41 = vrot.slane %v3941_v5, 7  ;;  %9307 = vmatmul.mubr.bf16.gmra.mrb[116].mxu1 %v5207_v57  ;;  %v5053_v60 = vrot.slane %v5051_v3, 1  ;;  %v4180_v3 = vld [vmem:[#allocation2] sm:$0xe] }
 0x29e   : > { %v3562_v46 = vadd.f32 %v12233_v43, %v9537_v40  ;;  %v12399_v56 = vcombine.low %v4732_v17, %v4733_v48  ;;  %v3593_v16 = vmax.f32 %v3561_v4, 0.0  ;;  %v5058_v9 = vrot.slane %v5056_v63, 1  ;;  %v4735_v33 = vld [vmem:[#allocation2 + $0xac] sm:$0xf]  ;;  %v4734_v58 = vld [vmem:[#allocation2 + $0xa8] sm:$0xf] }
 0x29f   : > { %v4119_v54 = vsel %vm12009_vm7, %v3938_v32, %v4118_v31  ;;  %v3946_v0 = vor.u32 %v3944_v7, %v3943_v41  ;;  %v3948_v25 = vrot.slane %v3943_v41, 4  ;;  %v5054_v19 = vor.u32 %v5053_v60, %v5049_v27  ;;  %v10086_v39 = vld [vmem:[#allocation2 + $0xb0] ss:$0 sps:$4 sm:$0x11]   ;;  %v4769_v6 = vld [vmem:[#allocation2 + $0xa8] sm:$0xe] }
 0x2a0   : > { %4120 = vst [vmem:[#allocation2 + $0xb4] sm:$0xf] %v4119_v54  ;;  %v3594_v12 = vmax.f32 %v3562_v46, 0.0  ;;  %v8146_v42 = vcombine.low %v4768_v34, %v4733_v48  ;;  %v8307_v38 = vpack.c.bf16 %v3593_v16, %v3593_v16  ;;  %v5209_v20 = vrot.slane %v10080_v49, 1  ;;  %v4133_v27 = vld [vmem:[#allocation2 + $0x4] sm:$0xf] }
 0x2a1   : > { %v3947_v61 = vsel %vm12014_vm8, %v3939_v44, %v3946_v0  ;;  %v4123_v43 = vsel %vm12022_vm9, %v3948_v25, %v4122_v36  ;;  %v5059_v8 = vsel %vm568_vm0, %v5054_v19, %v5058_v9  ;;  %v5061_v35 = vshrl.u32 %v12399_v56, 16 }
 0x2a2   : > { %4121 = vst [vmem:[#allocation2 + $0xb8] sm:$0xf] %v3947_v61  ;;  %4124 = vst [vmem:[#allocation2 + $0xbc] sm:$0x1] %v4123_v43  ;;  %v8308_v28 = vpack.c.bf16 %v3594_v12, %v3594_v12  ;;  %v5208_v47 = vrot.slane %v8146_v42, 1  ;;  %v3950_v24 = vshrl.u32 %v8307_v38, 16  ;;  %5549 = vmatprep.mubr.bf16.mxu0 %v5059_v8  ;;  %v12412_v15 = vcombine.low %v4734_v58, %v4735_v33 }
 0x2a3   : > { %v3953_v62 = vshll.u32 %v8307_v38, 16  ;;  %v5063_v29 = vshll.u32 %v12399_v56, 16  ;;  %v5068_v26 = vshll.u32 %v10080_v49, 16  ;;  %5550 = vmatmul.mubr.bf16.gmra.mrb[204].mxu0 %v12386_v53  ;;  %v8147_v51 = vcombine.low %v4769_v6, %v4735_v33  ;;  %v4129_v53 = vld [vmem:[#allocation2 + $0xc8] sm:$0x1] }
 0x2a4   : > { %v3958_v59 = vshrl.u32 %v8308_v28, 16  ;;  %v3961_v18 = vshll.u32 %v8308_v28, 16  ;;  %v5210_v50 = vsel %vm825_vm1, %v5208_v47, %v5209_v20  ;;  %v3952_v45 = vrot.slane %v3950_v24, 7  ;;  %v4132_v61 = vld [vmem:[#allocation2] sm:$0xf] }
 0x2a5   : > { %9310 = vmatprep.mubr.bf16.mxu1 %v5210_v50  ;;  %v5065_v21 = vrot.slane %v5063_v29, 1  ;;  %v5070_v22 = vrot.slane %v5068_v26, 1  ;;  %v5212_v11 = vrot.slane %v10086_v39, 1  ;;  %v5073_v23 = vshrl.u32 %v12412_v15, 16  ;;  %v4135_v29 = vld [vmem:[#allocation2 + $0x10] sm:$0xf] }
 0x2a6   : > { %v3960_v31 = vrot.slane %v3958_v59, 7  ;;  %v5075_v52 = vshll.u32 %v12412_v15, 16  ;;  %v3955_v1 = vor.u32 %v3953_v62, %v3952_v45  ;;  %v3956_v55 = vrot.slane %v3952_v45, 4  ;;  %v4181_v26 = vld [vmem:[#allocation2 + $0xc] sm:$0xe] }
 0x2a7   : > { %v5066_v37 = vor.u32 %v5065_v21, %v5061_v35  ;;  %v5211_v5 = vrot.slane %v8147_v51, 1  ;;  %v5080_v40 = vshll.u32 %v10086_v39, 16  ;;  %v4736_v57 = vld [vmem:[#allocation2 + $0xb4] sm:$0xf]  ;;  %v8086_v12 = vcombine.low %v4180_v3, %v4133_v27  ;;  %v4137_v50 = vld [vmem:[#allocation2 + $0x1c] sm:$0xf] }
 0x2a8   : > { %v3963_v7 = vor.u32 %v3961_v18, %v3960_v31  ;;  %v3965_v14 = vrot.slane %v3960_v31, 4  ;;  %v5077_v48 = vrot.slane %v5075_v52, 1  ;;  %v4126_v17 = vsel %vm12009_vm7, %v3955_v1, %v4125_v30  ;;  %v4770_v4 = vld [vmem:[#allocation2 + $0xb4] sm:$0xe] }
 0x2a9   : > { %v5071_v32 = vsel %vm568_vm0, %v5066_v37, %v5070_v22  ;;  %v5213_v44 = vsel %vm825_vm1, %v5211_v5, %v5212_v11  ;;  %v4737_v41 = vld [vmem:[#allocation2 + $0xb8] sm:$0xf]  ;;  %4127 = vst [vmem:[#allocation2 + $0xc0] sm:$0xf] %v4126_v17  ;;  %v5082_v60 = vrot.slane %v5080_v40, 1  ;;  %v4596_v33 = vrot.slane %v8086_v12, 1 }
 0x2aa   : > { %v3964_v49 = vsel %vm12014_vm8, %v3956_v55, %v3963_v7  ;;  %v4130_v36 = vsel %vm12022_vm9, %v3965_v14, %v4129_v53  ;;  %5557 = vmatprep.mubr.bf16.mxu0 %v5071_v32  ;;  %9311 = vmatmul.mubr.bf16.gmra.mrb[120].mxu1 %v5213_v44  ;;  %v5078_v46 = vor.u32 %v5077_v48, %v5073_v23  ;;  %v10094_v63 = vld [vmem:[#allocation2 + $0xbc] ss:$0 sps:$4 sm:$0x11]   ;;  %v12435_v21 = vld [vmem:[#allocation2 + $0x14] ss:$0 sps:$4 sm:$0x11]  }
 0x2ab   : > { %4128 = vst [vmem:[#allocation2 + $0xc4] sm:$0xf] %v3964_v49  ;;  %4131 = vst [vmem:[#allocation2 + $0xc8] sm:$0x1] %v4130_v36  ;;  %v8116_v10 = vcombine.low %v4736_v57, %v4737_v41  ;;  %v8148_v54 = vcombine.low %v4770_v4, %v4737_v41  ;;  %5558 = vmatmul.mubr.bf16.gmra.mrb[208].mxu0 %v12399_v56  ;;  %v5215_v25 = vrot.slane %v10094_v63, 1  ;;  %v5092_v34 = vshll.u32 %v10094_v63, 16 }
 0x2ac   : > { %v5083_v0 = vsel %vm568_vm0, %v5078_v46, %v5082_v60  ;;  %v4597_v56 = vrot.slane %v10110_v13, 1  ;;  %v12427_v8 = vcombine.low %v4132_v61, %v4133_v27  ;;  %v8087_v31 = vcombine.low %v4181_v26, %v4135_v29  ;;  %v4182_v11 = vld [vmem:[#allocation2 + $0x18] sm:$0xe]  ;;  %v12440_v23 = vld [vmem:[#allocation2 + $0x20] ss:$0 sps:$4 sm:$0x11]  }
 0x2ad   : > { %5565 = vmatprep.mubr.bf16.mxu0 %v5083_v0  ;;  %v5214_v2 = vrot.slane %v8148_v54, 1  ;;  %v5087_v16 = vshll.u32 %v8116_v10, 16  ;;  %v5085_v9 = vshrl.u32 %v8116_v10, 16  ;;  %v5094_v38 = vrot.slane %v5092_v34, 1  ;;  %v4134_v40 = vld [vmem:[#allocation2 + $0xc] sm:$0xf] }
 0x2ae   : > { %v4598_v45 = vsel %vm825_vm1, %v4596_v33, %v4597_v56  ;;  %v4343_v22 = vshll.u32 %v12427_v8, 16  ;;  %v8088_v52 = vcombine.low %v4182_v11, %v4137_v50  ;;  %v4341_v53 = vshrl.u32 %v12427_v8, 16  ;;  %v4139_v17 = vld [vmem:[#allocation2 + $0x28] sm:$0xf]  ;;  %v10119_v32 = vld [vmem:[#allocation6 + $0x180] sm:$0xff]   ;;  %v10125_v44 = vld [vmem:[#allocation6 + $0x1c8] sm:$0xff]  }
 0x2af   : > { %v5216_v19 = vsel %vm825_vm1, %v5214_v2, %v5215_v25  ;;  %v5089_v42 = vrot.slane %v5087_v16, 1  ;;  %v4348_v5 = vshll.u32 %v10110_v13, 16  ;;  %v4599_v14 = vrot.slane %v8087_v31, 1  ;;  %v12448_v41 = vld [vmem:[#allocation2 + $0x34] sm:$0xf]  ;;  %v10129_v16 = vld [vmem:[#allocation6 + $0x188] sm:$0xff]  }
 0x2b0   : > { %9314 = vmatprep.mubr.bf16.mxu1 %v5216_v19  ;;  %v4738_v20 = vld [vmem:[#allocation2 + $0xc0] sm:$0xf]  ;;  %v4345_v37 = vrot.slane %v4343_v22, 1  ;;  %v4600_v48 = vrot.slane %v12435_v21, 1  ;;  %v4602_v57 = vrot.slane %v8088_v52, 1  ;;  %v4603_v27 = vrot.slane %v12440_v23, 1 }
 0x2b1   : > { %v5090_v43 = vor.u32 %v5089_v42, %v5085_v9  ;;  %v4771_v28 = vld [vmem:[#allocation2 + $0xc0] sm:$0xe]  ;;  %v12446_v3 = vcombine.low %v4134_v40, %v4135_v29  ;;  %v4350_v49 = vrot.slane %v4348_v5, 1  ;;  %v4183_v36 = vld [vmem:[#allocation2 + $0x24] sm:$0xe]  ;;  %v10133_v13 = vld [vmem:[#allocation6 + $0x1d0] sm:$0xff]  }
 0x2b2   : > { %v4739_v39 = vld [vmem:[#allocation2 + $0xc4] sm:$0xf]  ;;  %v10102_v24 = vld [vmem:[#allocation2 + $0xc8] ss:$0 sps:$4 sm:$0x11]   ;;  %v4346_v4 = vor.u32 %v4345_v37, %v4341_v53  ;;  %v4601_v60 = vsel %vm825_vm1, %v4599_v14, %v4600_v48  ;;  %v8089_v63 = vcombine.low %v4183_v36, %v4139_v17  ;;  %v4604_v54 = vsel %vm825_vm1, %v4602_v57, %v4603_v27  ;;  %v10153_v5 = vld [vmem:[#allocation6 + $0x1a0] sm:$0xff]  }
 0x2b3   : > { %v5095_v47 = vsel %vm568_vm0, %v5090_v43, %v5094_v38  ;;  %v12430_v35 = vcombine.low %v4738_v20, %v4739_v39  ;;  %v8149_v62 = vcombine.low %v4771_v28, %v4739_v39  ;;  %5566 = vmatmul.mubr.bf16.gmra.mrb[212].mxu0 %v12412_v15  ;;  %v5218_v59 = vrot.slane %v10102_v24, 1  ;;  %v12450_v46 = vld [vmem:[#allocation2 + $0x2c] ss:$0 sps:$4 sm:$0x11]   ;;  %v4136_v12 = vld [vmem:[#allocation2 + $0x18] sm:$0xf] }
 0x2b4   : > { %5573 = vmatprep.mubr.bf16.mxu0 %v5095_v47  ;;  %v5104_v6 = vshll.u32 %v10102_v24, 16  ;;  %v4355_v0 = vshll.u32 %v12446_v3, 16  ;;  %v12455_v25 = vld [vmem:[#allocation2 + $0x38] ss:$0 sps:$4 sm:$0x11]   ;;  %v4351_v34 = vsel %vm568_vm0, %v4346_v4, %v4350_v49  ;;  %v4605_v19 = vrot.slane %v8089_v63, 1 }
 0x2b5   : > { %v5217_v58 = vrot.slane %v8149_v62, 1  ;;  %v5099_v18 = vshll.u32 %v12430_v35, 16  ;;  %v5097_v30 = vshrl.u32 %v12430_v35, 16  ;;  %v4606_v9 = vrot.slane %v12450_v46, 1  ;;  %v12460_v42 = vld [vmem:[#allocation2 + $0x40] sm:$0xf] }
 0x2b6   : > { %v5106_v55 = vrot.slane %v5104_v6, 1  ;;  %v12463_v61 = vcombine.low %v4136_v12, %v4137_v50  ;;  %v4357_v43 = vrot.slane %v4355_v0, 1  ;;  %v4609_v20 = vrot.slane %v12455_v25, 1  ;;  %v4185_v33 = vld [vmem:[#allocation2 + $0x3c] sm:$0xe]  ;;  %v10137_v39 = vld [vmem:[#allocation6 + $0x190] sm:$0xff]  }
 0x2b7   : > { %v5219_v51 = vsel %vm825_vm1, %v5217_v58, %v5218_v59  ;;  %v5101_v15 = vrot.slane %v5099_v18, 1  ;;  %v12466_v56 = vld [vmem:[#allocation2 + $0x4c] sm:$0xf]  ;;  %v4353_v28 = vshrl.u32 %v12446_v3, 16  ;;  %v4360_v47 = vshll.u32 %v12435_v21, 16  ;;  %v10161_v36 = vld [vmem:[#allocation6 + $0x1a8] sm:$0xff]  }
 0x2b8   : > { %9315 = vmatmul.mubr.bf16.gmra.mrb[124].mxu1 %v5219_v51  ;;  %v12470_v24 = vld [vmem:[#allocation2 + $0x44] ss:$0 sps:$4 sm:$0x11]   ;;  %v4607_v62 = vsel %vm825_vm1, %v4605_v19, %v4606_v9  ;;  %v8091_v29 = vcombine.low %v4185_v33, %v12460_v42  ;;  %v4186_v26 = vld [vmem:[#allocation2 + $0x48] sm:$0xe]  ;;  %v4367_v18 = vshll.u32 %v12463_v61, 16 }
 0x2b9   : > { %v5102_v1 = vor.u32 %v5101_v15, %v5097_v30  ;;  %9334 = vmatprep.mubr.bf16.mxu1 %v4598_v45  ;;  %v4358_v58 = vor.u32 %v4357_v43, %v4353_v28  ;;  %v12476_v50 = vld [vmem:[#allocation2 + $0x50] ss:$0 sps:$4 sm:$0x11]   ;;  %v8092_v6 = vcombine.low %v4186_v26, %v12466_v56  ;;  %v4362_v21 = vrot.slane %v4360_v47, 1  ;;  %v4138_v22 = vld [vmem:[#allocation2 + $0x24] sm:$0xf] }
 0x2ba   : > { %v10145_v45 = vld [vmem:[#allocation6 + $0x198] sm:$0xff]   ;;  %v10149_v51 = vld [vmem:[#allocation6 + $0x1e0] sm:$0xff]   ;;  %v12479_v30 = vcombine.low %v4138_v22, %v4139_v17  ;;  %v4611_v15 = vrot.slane %v8091_v29, 1  ;;  %v4612_v31 = vrot.slane %v12470_v24, 1  ;;  %v4369_v52 = vrot.slane %v4367_v18, 1  ;;  %v10169_v43 = vld [vmem:[#allocation6 + $0x1b0] sm:$0xff]  }
 0x2bb   : > { %v5107_v7 = vsel %vm568_vm0, %v5102_v1, %v5106_v55  ;;  %5574 = vmatmul.mubr.bf16.gmra.mrb[216].mxu0 %v8116_v10  ;;  %v4184_v10 = vld [vmem:[#allocation2 + $0x30] sm:$0xe]  ;;  %v4363_v11 = vsel %vm568_vm0, %v4358_v58, %v4362_v21  ;;  %v4614_v1 = vrot.slane %v8092_v6, 1  ;;  %v4615_v55 = vrot.slane %v12476_v50, 1  ;;  %v12485_v53 = vld [vmem:[#allocation2 + $0x58] sm:$0xf] }
 0x2bc   : > { %5581 = vmatprep.mubr.bf16.mxu0 %v5107_v7  ;;  %v8090_v2 = vcombine.low %v4184_v10, %v12448_v41  ;;  %v12487_v37 = vld [vmem:[#allocation2 + $0x64] sm:$0xf]  ;;  %v4365_v7 = vshrl.u32 %v12463_v61, 16  ;;  %v4372_v14 = vshll.u32 %v12440_v23, 16  ;;  %v4187_v48 = vld [vmem:[#allocation2 + $0x54] sm:$0xe]  ;;  %v4613_v40 = vsel %vm825_vm1, %v4611_v15, %v4612_v31 }
 0x2bd   : > { %v12492_v57 = vld [vmem:[#allocation2 + $0x5c] ss:$0 sps:$4 sm:$0x11]   ;;  %v8093_v27 = vcombine.low %v4187_v48, %v12485_v53  ;;  %v4188_v17 = vld [vmem:[#allocation2 + $0x60] sm:$0xe]  ;;  %v4379_v4 = vshll.u32 %v12479_v30, 16 }
 0x2be   : > { %v4608_v38 = vrot.slane %v8090_v2, 1  ;;  %v12497_v49 = vld [vmem:[#allocation2 + $0x68] ss:$0 sps:$4 sm:$0x11]   ;;  %v8094_v23 = vcombine.low %v4188_v17, %v12487_v37  ;;  %v4374_v63 = vrot.slane %v4372_v14, 1  ;;  %v4618_v2 = vrot.slane %v12492_v57, 1 }
 0x2bf   : > { %v10165_v10 = vld [vmem:[#allocation6 + $0x1f0] sm:$0xff]   ;;  %v4617_v0 = vrot.slane %v8093_v27, 1  ;;  %v4621_v12 = vrot.slane %v12497_v49, 1  ;;  %v12507_v19 = vld [vmem:[#allocation2 + $0x70] sm:$0xf]  ;;  %v12522_v6 = vld [vmem:[#allocation6 + $0x200] sm:$0xff]  }
 0x2c0   : > { %9335 = vmatmul.mubr.bf16.vlgmr.msra.gmra.mrb[96].mxu1 %v4601_v60  ;;  %v4610_v59 = vsel %vm825_vm1, %v4608_v38, %v4609_v20  ;;  %v4140_v60 = vld [vmem:[#allocation2 + $0x30] sm:$0xf]  ;;  %v12509_v9 = vld [vmem:[#allocation2 + $0x7c] sm:$0xf]  ;;  %v4384_v38 = vshll.u32 %v12450_v46, 16 }
 0x2c1   : > { %9338 = vmatprep.mubr.bf16.mxu1 %v4604_v54  ;;  %8991 = vmatpush3.bf16.msra.mxu1 %v10119_v32  ;;  %v4370_v32 = vor.u32 %v4369_v52, %v4365_v7  ;;  %v12501_v54 = vcombine.low %v4140_v60, %v12448_v41  ;;  %v4377_v41 = vshrl.u32 %v12479_v30, 16  ;;  %v4189_v20 = vld [vmem:[#allocation2 + $0x6c] sm:$0xe]  ;;  %v4619_v33 = vsel %vm825_vm1, %v4617_v0, %v4618_v2  ;;  %v4190_v47 = vld [vmem:[#allocation2 + $0x78] sm:$0xe]  ;;  %v10174_v58 = vld [vmem:[#allocation6 + $0x1b8] sm:$0xff]  }
 0x2c2   : > { %8992 = vmatprep.subr.bf16.mxu1 %v10125_v44  ;;  %v4616_v44 = vsel %vm825_vm1, %v4614_v1, %v4615_v55  ;;  %v8095_v28 = vcombine.low %v4189_v20, %v12507_v19  ;;  %v12519_v26 = vld [vmem:[#allocation2 + $0x80] ss:$0 sps:$4 sm:$0x11]   ;;  %v8096_v46 = vcombine.low %v4190_v47, %v12509_v9  ;;  %v4386_v18 = vrot.slane %v4384_v38, 1  ;;  %v12531_v52 = vld [vmem:[#allocation2 + $0x88] sm:$0xf] }
 0x2c3   : > { %5582 = vmatmul.mubr.bf16.gmra.mrb[220].mxu0 %v12430_v35  ;;  %v10141_v35 = vld [vmem:[#allocation6 + $0x1d8] sm:$0xff]   ;;  %v4391_v29 = vshll.u32 %v12501_v54, 16  ;;  %v4396_v55 = vshll.u32 %v12455_v25, 16  ;;  %v12539_v7 = vld [vmem:[#allocation2 + $0x8c] ss:$0 sps:$4 sm:$0x11]  }
 0x2c4   : > { %5927 = vmatprep.mubr.bf16.mxu0 %v4351_v34  ;;  %v4381_v34 = vrot.slane %v4379_v4, 1  ;;  %v4623_v21 = vrot.slane %v8095_v28, 1  ;;  %v4626_v31 = vrot.slane %v8096_v46, 1  ;;  %v12533_v1 = vld [vmem:[#allocation2 + $0x94] sm:$0xf] }
 0x2c5   : > { %8993 = vmatpush3.bf16.msra.mxu1 %v10129_v16  ;;  %v4375_v16 = vsel %vm568_vm0, %v4370_v32, %v4374_v63  ;;  %v4393_v15 = vrot.slane %v4391_v29, 1  ;;  %v4192_v48 = vld [vmem:[#allocation2 + $0x90] sm:$0xe]  ;;  %v12544_v32 = vld [vmem:[#allocation2 + $0x98] ss:$0 sps:$4 sm:$0x11]  }
 0x2c6   : > { %8994 = vmatprep.subr.bf16.mxu1 %v10133_v13  ;;  %v4620_v13 = vrot.slane %v8094_v23, 1  ;;  %v8098_v25 = vcombine.low %v4192_v48, %v12533_v1  ;;  %v4398_v4 = vrot.slane %v4396_v55, 1  ;;  %v4161_v60 = vld [vmem:[#allocation2 + $0xac] sm:$0xf]  ;;  %v12551_v63 = vld [vmem:[#allocation2 + $0x1c] sm:$0xf] }
 0x2c7   : > { %v4194_v20 = vld [vmem:[#allocation2 + $0xa8] sm:$0xe]  ;;  %v12564_v28 = vld [vmem:[#allocation2 + $0xa4] ss:$0 sps:$4 sm:$0x11]  }
 0x2c8   : > { %9339 = vmatmul.mubr.bf16.gmra.mrb[100].mxu1 %v4607_v62  ;;  %v4622_v62 = vsel %vm825_vm1, %v4620_v13, %v4621_v12  ;;  %v4632_v2 = vrot.slane %v8098_v25, 1  ;;  %v4193_v12 = vld [vmem:[#allocation2 + $0x9c] sm:$0xe]  ;;  %v4148_v29 = vld [vmem:[#allocation2 + $0x60] sm:$0xf] }
 0x2c9   : > { %9342 = vmatprep.mubr.bf16.mxu1 %v4610_v59  ;;  %8995 = vmatpush3.bf16.msra.mxu1 %v10137_v39  ;;  %v12514_v39 = vld [vmem:[#allocation2 + $0x74] ss:$0 sps:$4 sm:$0x11]   ;;  %v4142_v59 = vld [vmem:[#allocation2 + $0x3c] sm:$0xf] }
 0x2ca   : > { %8996 = vmatprep.subr.bf16.mxu1 %v10141_v35  ;;  %v4382_v35 = vor.u32 %v4381_v34, %v4377_v41  ;;  %v4624_v22 = vrot.slane %v12514_v39, 1  ;;  %v12556_v34 = vld [vmem:[#allocation2 + $0xa0] sm:$0xf]  ;;  %v6218_v41 = vld [vmem:[#allocation2 + $0x18] sm:$0xf] }
 0x2cb   : > { %5928 = vmatmul.mubr.bf16.vlgmr.msra.gmra.mrb[224].mxu0 %v12427_v8  ;;  %v10157_v8 = vld [vmem:[#allocation6 + $0x1e8] sm:$0xff]   ;;  %v8099_v47 = vcombine.low %v4193_v12, %v12556_v34 }
 0x2cc   : > { %5935 = vmatprep.mubr.bf16.mxu0 %v4363_v11  ;;  %v4627_v11 = vrot.slane %v12519_v26, 1 }
 0x2cd   : > { %8997 = vmatpush3.bf16.msra.mxu1 %v10145_v45  ;;  %v12525_v45 = vcombine.low %v4142_v59, %v12460_v42  ;;  %v4389_v42 = vshrl.u32 %v12501_v54, 16  ;;  %v12569_v59 = vcombine.low %v6218_v41, %v12551_v63 }
 0x2ce   : > { %8998 = vmatprep.subr.bf16.mxu1 %v10149_v51  ;;  %v4387_v51 = vsel %vm568_vm0, %v4382_v35, %v4386_v18  ;;  %v4628_v27 = vsel %vm825_vm1, %v4626_v31, %v4627_v11  ;;  %v8100_v35 = vcombine.low %v4194_v20, %v4161_v60 }
 0x2cf   : > { %v4403_v17 = vshll.u32 %v12525_v45, 16  ;;  %v4401_v38 = vshrl.u32 %v12525_v45, 16 }
 0x2d0   : > { %9343 = vmatmul.mubr.bf16.gmra.mrb[104].mxu1 %v4613_v40  ;;  %v4394_v40 = vor.u32 %v4393_v15, %v4389_v42  ;;  %v4162_v15 = vld [vmem:[#allocation2 + $0xb4] sm:$0xf]  ;;  %v12580_v42 = vld [vmem:[#allocation2 + $0xbc] ss:$0 sps:$4 sm:$0x11]   ;;  %v4638_v48 = vrot.slane %v8100_v35, 1 }
 0x2d1   : > { %9346 = vmatprep.mubr.bf16.mxu1 %v4616_v44  ;;  %8999 = vmatpush3.bf16.msra.mxu1 %v10153_v5  ;;  %v4191_v5 = vld [vmem:[#allocation2 + $0x84] sm:$0xe]  ;;  %v4405_v0 = vrot.slane %v4403_v17, 1  ;;  %v12587_v17 = vld [vmem:[#allocation2 + $0x28] sm:$0xf]  ;;  %v4642_v35 = vrot.slane %v12580_v42, 1 }
 0x2d2   : > { %9000 = vmatprep.subr.bf16.mxu1 %v10157_v8  ;;  %v8097_v14 = vcombine.low %v4191_v5, %v12531_v52  ;;  %v4144_v8 = vld [vmem:[#allocation2 + $0x48] sm:$0xf] }
 0x2d3   : > { %5936 = vmatmul.mubr.bf16.gmra.mrb[228].mxu0 %v12446_v3  ;;  %v10173_v3 = vld [vmem:[#allocation6 + $0x1f8] sm:$0xff]   ;;  %v12548_v44 = vcombine.low %v4144_v8, %v12466_v56  ;;  %v4408_v56 = vshll.u32 %v12470_v24, 16  ;;  %v4406_v46 = vor.u32 %v4405_v0, %v4401_v38 }
 0x2d4   : > { %5943 = vmatprep.mubr.bf16.mxu0 %v4375_v16  ;;  %v4629_v23 = vrot.slane %v8097_v14, 1  ;;  %v4633_v16 = vrot.slane %v12544_v32, 1  ;;  %v4146_v24 = vld [vmem:[#allocation2 + $0x54] sm:$0xf]  ;;  %v4635_v14 = vrot.slane %v8099_v47, 1 }
 0x2d5   : > { %9001 = vmatpush3.bf16.msra.mxu1 %v10161_v36  ;;  %v4630_v36 = vrot.slane %v12539_v7, 1  ;;  %v4415_v13 = vshll.u32 %v12548_v44, 16  ;;  %v12572_v18 = vcombine.low %v4146_v24, %v12485_v53  ;;  %v4413_v31 = vshrl.u32 %v12548_v44, 16  ;;  %v4195_v0 = vld [vmem:[#allocation2 + $0xb4] sm:$0xe] }
 0x2d6   : > { %9002 = vmatprep.subr.bf16.mxu1 %v10165_v10  ;;  %v4399_v10 = vsel %vm568_vm0, %v4394_v40, %v4398_v4  ;;  %v4636_v53 = vrot.slane %v12564_v28, 1  ;;  %v6429_v40 = vshll.u32 %v12569_v59, 16  ;;  %v12604_v38 = vld [vmem:[#allocation2 + $0x34] sm:$0xf] }
 0x2d8   : > { %9347 = vmatmul.mubr.bf16.gmra.mrb[108].mxu1 %v4619_v33  ;;  %v4631_v33 = vsel %vm825_vm1, %v4629_v23, %v4630_v36  ;;  %v4637_v12 = vsel %vm825_vm1, %v4635_v14, %v4636_v53 }
 0x2d9   : > { %9350 = vmatprep.mubr.bf16.mxu1 %v4622_v62  ;;  %9003 = vmatpush3.bf16.msra.mxu1 %v10169_v43  ;;  %v4160_v43 = vld [vmem:[#allocation2 + $0xa8] sm:$0xf]  ;;  %v4163_v62 = vld [vmem:[#allocation2 + $0xb8] sm:$0xf] }
 0x2da   : > { %9004 = vmatprep.subr.bf16.mxu1 %v10173_v3  ;;  %v10167_v3 = vld [vmem:[#allocation2 + $0xb0] ss:$0 sps:$4 sm:$0x11]   ;;  %v12578_v11 = vcombine.low %v4162_v15, %v4163_v62 }
 0x2db   : > { %5944 = vmatmul.mubr.bf16.gmra.mrb[232].mxu0 %v12463_v61  ;;  %v4625_v61 = vsel %vm825_vm1, %v4623_v21, %v4624_v22  ;;  %v12575_v21 = vcombine.low %v4148_v29, %v12487_v37  ;;  %v4410_v22 = vrot.slane %v4408_v56, 1  ;;  %v4516_v5 = vshll.u32 %v10167_v3, 16 }
 0x2dc   : > { %5951 = vmatprep.mubr.bf16.mxu0 %v4387_v51  ;;  %v4417_v51 = vrot.slane %v4415_v13, 1  ;;  %v4639_v37 = vrot.slane %v10167_v3, 1  ;;  %v4523_v56 = vshll.u32 %v12578_v11, 16  ;;  %v4528_v13 = vshll.u32 %v12580_v42, 16  ;;  %v4152_v42 = vld [vmem:[#allocation2 + $0x78] sm:$0xf] }
 0x2dd   : > { %9005 = vmatpush3.bf16.msra.mxu1 %v10174_v58  ;;  %v4634_v58 = vsel %vm825_vm1, %v4632_v2, %v4633_v16  ;;  %v4411_v8 = vsel %vm568_vm0, %v4406_v46, %v4410_v22  ;;  %v4518_v16 = vrot.slane %v4516_v5, 1  ;;  %v4521_v3 = vshrl.u32 %v12578_v11, 16  ;;  %v6222_v46 = vld [vmem:[#allocation2 + $0x30] sm:$0xf] }
 0x2de   : > { %9366 = vmatprep.subr.bf16.mxu1 %v12522_v6  ;;  %v4418_v36 = vor.u32 %v4417_v51, %v4413_v31  ;;  %v4439_v24 = vshll.u32 %v12575_v21, 16  ;;  %v4530_v22 = vrot.slane %v4528_v13, 1  ;;  %v12615_v31 = vld [vmem:[#allocation2 + $0x2c] ss:$0 sps:$4 sm:$0x11]   ;;  %v12619_v5 = vcombine.low %v6222_v46, %v12604_v38 }
 0x2e0   : > { %9351 = vmatmul.mubr.bf16.gmra.mrb[112].mxu1 %v4625_v61  ;;  %v4150_v61 = vld [vmem:[#allocation2 + $0x6c] sm:$0xf] }
 0x2e1   : > { %9354 = vmatprep.mubr.bf16.mxu1 %v4628_v27  ;;  %v6220_v27 = vld [vmem:[#allocation2 + $0x24] sm:$0xf]  ;;  %v12591_v23 = vcombine.low %v4150_v61, %v12507_v19  ;;  %v4640_v19 = vsel %vm825_vm1, %v4638_v48, %v4639_v37  ;;  %v12623_v48 = vld [vmem:[#allocation2 + $0x40] sm:$0xf] }
 0x2e2   : > { %v12602_v41 = vcombine.low %v6220_v27, %v12587_v17  ;;  %v4441_v27 = vrot.slane %v4439_v24, 1 }
 0x2e3   : > { %5952 = vmatmul.mubr.bf16.gmra.mrb[236].mxu0 %v12479_v30  ;;  %v12561_v30 = vcombine.low %v4160_v43, %v4161_v60  ;;  %v4420_v60 = vshll.u32 %v12476_v50, 16  ;;  %v8101_v43 = vcombine.low %v4195_v0, %v4163_v62  ;;  %v6431_v50 = vrot.slane %v6429_v40, 1 }
 0x2e4   : > { %5959 = vmatprep.mubr.bf16.mxu0 %v4399_v10  ;;  %v4427_v10 = vshll.u32 %v12572_v18, 16  ;;  %v6427_v62 = vshrl.u32 %v12569_v59, 16  ;;  %v4451_v53 = vshll.u32 %v12591_v23, 16  ;;  %v4425_v40 = vshrl.u32 %v12572_v18, 16 }
 0x2e5   : > { %v4511_v55 = vshll.u32 %v12561_v30, 16  ;;  %v4509_v25 = vshrl.u32 %v12561_v30, 16  ;;  %v4422_v47 = vrot.slane %v4420_v60, 1  ;;  %v4641_v15 = vrot.slane %v8101_v43, 1 }
 0x2e6   : > { %v4429_v61 = vrot.slane %v4427_v10, 1  ;;  %v6432_v14 = vor.u32 %v6431_v50, %v6427_v62  ;;  %v4444_v60 = vshll.u32 %v12497_v49, 16  ;;  %v6224_v10 = vld [vmem:[#allocation2 + $0x3c] sm:$0xf]  ;;  %v6439_v50 = vshrl.u32 %v12602_v41, 16 }
 0x2e7   : > { %v4513_v4 = vrot.slane %v4511_v55, 1  ;;  %v4423_v51 = vsel %vm568_vm0, %v4418_v36, %v4422_v47  ;;  %v6441_v55 = vshll.u32 %v12602_v41, 16  ;;  %v4437_v36 = vshrl.u32 %v12575_v21, 16  ;;  %v6266_v62 = vld [vmem:[#allocation2 + $0x18] sm:$0xe] }
 0x2e8   : > { %9355 = vmatmul.mubr.bf16.gmra.mrb[116].mxu1 %v4631_v33  ;;  %v4525_v33 = vrot.slane %v4523_v56, 1  ;;  %v4643_v0 = vsel %vm825_vm1, %v4641_v15, %v4642_v35  ;;  %v4154_v56 = vld [vmem:[#allocation2 + $0x84] sm:$0xf]  ;;  %v4430_v13 = vor.u32 %v4429_v61, %v4425_v40  ;;  %v4446_v47 = vrot.slane %v4444_v60, 1 }
 0x2e9   : > { %9358 = vmatprep.mubr.bf16.mxu1 %v4634_v58  ;;  %v4514_v2 = vor.u32 %v4513_v4, %v4509_v25  ;;  %v12632_v25 = vld [vmem:[#allocation2 + $0x38] ss:$0 sps:$4 sm:$0x11]   ;;  %v12645_v43 = vcombine.low %v4154_v56, %v12531_v52  ;;  %v4442_v49 = vor.u32 %v4441_v27, %v4437_v36  ;;  %v4449_v35 = vshrl.u32 %v12591_v23, 16  ;;  %v10182_v40 = vld [vmem:[#allocation6 + $0x208] sm:$0xff]  }
 0x2ea   : > { %v4526_v58 = vor.u32 %v4525_v33, %v4521_v3  ;;  %v4456_v3 = vshll.u32 %v12514_v39, 16  ;;  %v6458_v24 = vshll.u32 %v12632_v25, 16  ;;  %v12667_v56 = vld [vmem:[#allocation2 + $0x58] sm:$0xf] }
 0x2eb   : > { %5960 = vmatmul.mubr.bf16.gmra.mrb[240].mxu0 %v12501_v54  ;;  %v12595_v54 = vld [vmem:[#allocation2 + $0x20] ss:$0 sps:$4 sm:$0x11]   ;;  %v12607_v20 = vsel %vm568_vm0, %v4514_v2, %v4518_v16  ;;  %v6443_v2 = vrot.slane %v6441_v55, 1  ;;  %v12640_v16 = vcombine.low %v6224_v10, %v12623_v48 }
 0x2ec   : > { %5967 = vmatprep.mubr.bf16.mxu0 %v4411_v8  ;;  %v6434_v29 = vshll.u32 %v12595_v54, 16  ;;  %v12626_v37 = vsel %vm568_vm0, %v4526_v58, %v4530_v22  ;;  %v12629_v8 = vcombine.low %v4152_v42, %v12509_v9  ;;  %v6453_v9 = vshll.u32 %v12619_v5, 16  ;;  %v12651_v58 = vld [vmem:[#allocation2 + $0x44] ss:$0 sps:$4 sm:$0x11]  }
 0x2ed   : > { %v6465_v52 = vshll.u32 %v12640_v16, 16  ;;  %v8230_v22 = vcombine.low %v6266_v62, %v12551_v63  ;;  %v4447_v42 = vsel %vm568_vm0, %v4442_v49, %v4446_v47  ;;  %v4458_v61 = vrot.slane %v4456_v3, 1  ;;  %v12677_v49 = vld [vmem:[#allocation2 + $0x68] ss:$0 sps:$4 sm:$0x11]  }
 0x2ee   : > { %v6436_v4 = vrot.slane %v6434_v29, 1  ;;  %v6444_v29 = vor.u32 %v6443_v2, %v6439_v50  ;;  %v6455_v46 = vrot.slane %v6453_v9, 1  ;;  %v4463_v55 = vshll.u32 %v12629_v8, 16  ;;  %v6268_v3 = vld [vmem:[#allocation2 + $0x30] sm:$0xe] }
 0x2ef   : > { %v6460_v27 = vrot.slane %v6458_v24, 1  ;;  %v6682_v36 = vrot.slane %v8230_v22, 1  ;;  %v6683_v60 = vrot.slane %v12595_v54, 1  ;;  %v6467_v2 = vrot.slane %v6465_v52, 1  ;;  %v12695_v52 = vld [vmem:[#allocation2 + $0x7c] sm:$0xf] }
 0x2f0   : > { %9359 = vmatmul.mubr.bf16.gmra.mrb[120].mxu1 %v4637_v12  ;;  %v6437_v12 = vsel %vm568_vm0, %v6432_v14, %v6436_v4  ;;  %v6451_v14 = vshrl.u32 %v12619_v5, 16  ;;  %v12662_v4 = vld [vmem:[#allocation2 + $0x50] ss:$0 sps:$4 sm:$0x11]   ;;  %v6686_v24 = vrot.slane %v12615_v31, 1  ;;  %v8232_v62 = vcombine.low %v6268_v3, %v12604_v38 }
 0x2f1   : > { %9362 = vmatprep.mubr.bf16.mxu1 %v4640_v19  ;;  %v4453_v19 = vrot.slane %v4451_v53, 1  ;;  %v12680_v54 = vsel %vm825_vm1, %v6682_v36, %v6683_v60  ;;  %v6271_v60 = vld [vmem:[#allocation2 + $0x54] sm:$0xe]  ;;  %v12735_v63 = vld [vmem:[#allocation2 + $0xac] sm:$0xf] }
 0x2f2   : > { %13433 = vst [vmem:[#allocation15_spill] sm:$0xff] %v12680_v54  ;;  %v12757_v54 = vld [vmem:[#allocation2 + $0xc8] ss:$0 sps:$4 sm:$0x11]  }
 0x2f3   : > { %5968 = vmatmul.mubr.bf16.gmra.mrb[244].mxu0 %v12525_v45  ;;  %v4432_v45 = vshll.u32 %v12492_v57, 16  ;;  %v6446_v57 = vshll.u32 %v12615_v31, 16  ;;  %v4454_v15 = vor.u32 %v4453_v19, %v4449_v35  ;;  %v12675_v19 = vrot.slane %v4463_v55, 1  ;;  %v12689_v35 = vld [vmem:[#allocation2 + $0x74] ss:$0 sps:$4 sm:$0x11]  }
 0x2f4   : > { %5975 = vmatprep.mubr.bf16.mxu0 %v4423_v51  ;;  %v6270_v55 = vld [vmem:[#allocation2 + $0x48] sm:$0xe] }
 0x2f5   : > { %v4434_v33 = vrot.slane %v4432_v45, 1  ;;  %v6448_v39 = vrot.slane %v6446_v57, 1  ;;  %v6226_v45 = vld [vmem:[#allocation2 + $0x48] sm:$0xf]  ;;  %v12673_v57 = vsel %vm568_vm0, %v4454_v15, %v4458_v61  ;;  %v6692_v15 = vrot.slane %v12651_v58, 1 }
 0x2f6   : > { %v12705_v61 = vld [vmem:[#allocation2 + $0x88] sm:$0xf] }
 0x2f7   : > { %v4435_v51 = vsel %vm568_vm0, %v4430_v13, %v4434_v33  ;;  %v6449_v10 = vsel %vm568_vm0, %v6444_v29, %v6448_v39  ;;  %v12669_v13 = vld [vmem:[#allocation2 + $0x5c] ss:$0 sps:$4 sm:$0x11]   ;;  %v6463_v33 = vshrl.u32 %v12640_v16, 16  ;;  %v6269_v29 = vld [vmem:[#allocation2 + $0x3c] sm:$0xe] }
 0x2f8   : > { %9363 = vmatmul.mubr.bf16.gmra.mrb[124].mxu1 %v4643_v0  ;;  %v6456_v0 = vor.u32 %v6455_v46, %v6451_v14  ;;  %v10187_v46 = vld [vmem:[#allocation6 + $0x210] sm:$0xff]   ;;  %v8233_v39 = vcombine.low %v6269_v29, %v12623_v48  ;;  %v12728_v29 = vld [vmem:[#allocation2 + $0xb0] ss:$0 sps:$4 sm:$0x11]  }
 0x2f9   : > { %6971 = vmatprep.mubr.bf16.mxu1 %v6437_v12  ;;  %v6267_v12 = vld [vmem:[#allocation2 + $0x24] sm:$0xe]  ;;  %v12703_v38 = vor.u32 %v6467_v2, %v6463_v33  ;;  %v12707_v14 = vld [vmem:[#allocation2 + $0x8c] ss:$0 sps:$4 sm:$0x11]   ;;  %v6704_v2 = vrot.slane %v12689_v35, 1 }
 0x2fa   : > { %v8231_v50 = vcombine.low %v6267_v12, %v12587_v17  ;;  %v12693_v17 = vld [vmem:[#allocation2 + $0x70] sm:$0xf]  ;;  %v6461_v31 = vsel %vm568_vm0, %v6456_v0, %v6460_v27  ;;  %v6691_v12 = vrot.slane %v8233_v39, 1  ;;  %v6695_v27 = vrot.slane %v12662_v4, 1 }
 0x2fb   : > { %5976 = vmatmul.mubr.bf16.gmra.mrb[248].mxu0 %v12548_v44  ;;  %v6227_v44 = vld [vmem:[#allocation2 + $0x4c] sm:$0xf]  ;;  %v8235_v0 = vcombine.low %v6271_v60, %v12667_v56  ;;  %v6701_v39 = vrot.slane %v12677_v49, 1  ;;  %v6274_v60 = vld [vmem:[#allocation2 + $0x78] sm:$0xe] }
 0x2fc   : > { %5983 = vmatprep.mubr.bf16.mxu0 %v4435_v51  ;;  %v12685_v47 = vcombine.low %v6226_v45, %v6227_v44  ;;  %v6685_v22 = vrot.slane %v8231_v50, 1  ;;  %v6689_v51 = vrot.slane %v12632_v25, 1  ;;  %v6688_v45 = vrot.slane %v8232_v62, 1  ;;  %v12712_v25 = vld [vmem:[#allocation2 + $0x98] ss:$0 sps:$4 sm:$0x11]  }
 0x2fd   : > { %v8234_v36 = vcombine.low %v6270_v55, %v6227_v44  ;;  %v10192_v44 = vld [vmem:[#allocation6 + $0x218] sm:$0xff]   ;;  %v12720_v50 = vld [vmem:[#allocation2 + $0xa0] sm:$0xf]  ;;  %v6273_v55 = vld [vmem:[#allocation2 + $0x6c] sm:$0xe] }
 0x2fe   : > { %v12715_v48 = vsel %vm825_vm1, %v6685_v22, %v6686_v24  ;;  %v12725_v3 = vsel %vm825_vm1, %v6688_v45, %v6689_v51  ;;  %v6698_v24 = vrot.slane %v12669_v13, 1  ;;  %v6272_v62 = vld [vmem:[#allocation2 + $0x60] sm:$0xe]  ;;  %v12737_v51 = vld [vmem:[#allocation2 + $0xbc] ss:$0 sps:$4 sm:$0x11]  }
 0x2ff   : > { %13434 = vst [vmem:[#allocation22_spill] sm:$0xff] %v12715_v48  ;;  %13435 = vst [vmem:[#allocation23_spill] sm:$0xff] %v12725_v3  ;;  %v6694_v33 = vrot.slane %v8234_v36, 1  ;;  %v8237_v36 = vcombine.low %v6273_v55, %v12693_v17  ;;  %v6276_v55 = vld [vmem:[#allocation2 + $0x90] sm:$0xe]  ;;  %v10197_v48 = vld [vmem:[#allocation6 + $0x220] sm:$0xff]  }
 0x300   : > { %6972 = vmatmul.mubr.bf16.vlgmr.msra.gmra.mrb[128].mxu1 %v12569_v59  ;;  %v12687_v59 = vld [vmem:[#allocation2 + $0x64] sm:$0xf]  ;;  %v6277_v3 = vld [vmem:[#allocation2 + $0x9c] sm:$0xe] }
 0x301   : > { %6979 = vmatprep.mubr.bf16.mxu1 %v6449_v10  ;;  %9367 = vmatpush3.bf16.msra.mxu1 %v12522_v6  ;;  %v12697_v6 = vld [vmem:[#allocation2 + $0x80] ss:$0 sps:$4 sm:$0x11]   ;;  %v12710_v10 = vld [vmem:[#allocation2 + $0x94] sm:$0xf]  ;;  %v8236_v22 = vcombine.low %v6272_v62, %v12687_v59  ;;  %v12740_v45 = vsel %vm825_vm1, %v6694_v33, %v6695_v27 }
 0x302   : > { %9368 = vmatprep.subr.bf16.mxu1 %v10182_v40  ;;  %13437 = vst [vmem:[#allocation16_spill] sm:$0xff] %v12740_v45  ;;  %v12748_v62 = vld [vmem:[#allocation2 + $0xc4] sm:$0xf]  ;;  %v6707_v27 = vrot.slane %v12697_v6, 1  ;;  %v6703_v45 = vrot.slane %v8237_v36, 1 }
 0x303   : > { %5984 = vmatmul.mubr.bf16.gmra.mrb[252].mxu0 %v12572_v18  ;;  %v12722_v18 = vld [vmem:[#allocation2 + $0xa4] ss:$0 sps:$4 sm:$0x11]   ;;  %v6700_v9 = vrot.slane %v8236_v22, 1  ;;  %v6713_v22 = vrot.slane %v12712_v25, 1 }
 0x304   : > { %5991 = vmatprep.mubr.bf16.mxu0 %v4447_v42  ;;  %v12731_v42 = vsel %vm825_vm1, %v6691_v12, %v6692_v15  ;;  %v8238_v15 = vcombine.low %v6274_v60, %v12695_v52  ;;  %v6275_v12 = vld [vmem:[#allocation2 + $0x84] sm:$0xe] }
 0x305   : > { %9369 = vmatpush3.bf16.msra.mxu1 %v10182_v40  ;;  %13436 = vst [vmem:[#allocation24_spill] sm:$0xff] %v12731_v42  ;;  %v6697_v40 = vrot.slane %v8235_v0, 1  ;;  %v12746_v0 = vld [vmem:[#allocation2 + $0xb8] sm:$0xf]  ;;  %v8239_v33 = vcombine.low %v6275_v12, %v12705_v61  ;;  %v6710_v42 = vrot.slane %v12707_v14, 1  ;;  %v6716_v12 = vrot.slane %v12722_v18, 1 }
 0x306   : > { %9370 = vmatprep.subr.bf16.mxu1 %v10187_v46  ;;  %v6706_v60 = vrot.slane %v8238_v15, 1 }
 0x307   : > { %v12751_v53 = vsel %vm825_vm1, %v6697_v40, %v6698_v24  ;;  %v12760_v24 = vsel %vm825_vm1, %v6700_v9, %v6701_v39  ;;  %v6709_v40 = vrot.slane %v8239_v33, 1 }
 0x308   : > { %6980 = vmatmul.mubr.bf16.gmra.mrb[132].mxu1 %v12602_v41  ;;  %v8240_v41 = vcombine.low %v6276_v55, %v12710_v10  ;;  %13438 = vst [vmem:[#allocation14_spill] sm:$0xff] %v12760_v24  ;;  %v12768_v36 = vsel %vm825_vm1, %v6706_v60, %v6707_v27  ;;  %v6278_v55 = vld [vmem:[#allocation2 + $0xa8] sm:$0xe]  ;;  %v6279_v24 = vld [vmem:[#allocation2 + $0xb4] sm:$0xe]  ;;  %v13440_v60 = vshll.u32 %v12651_v58, 16 }
 0x309   : > { %6987 = vmatprep.mubr.bf16.mxu1 %v6461_v31  ;;  %9371 = vmatpush3.bf16.msra.mxu1 %v10187_v46  ;;  %v8241_v31 = vcombine.low %v6277_v3, %v12720_v50  ;;  %v12765_v46 = vsel %vm825_vm1, %v6703_v45, %v6704_v2  ;;  %v12773_v9 = vsel %vm825_vm1, %v6709_v40, %v6710_v42  ;;  %v6719_v3 = vrot.slane %v12728_v29, 1  ;;  %v6280_v2 = vld [vmem:[#allocation2 + $0xc0] sm:$0xe] }
 0x30a   : > { %9372 = vmatprep.subr.bf16.mxu1 %v10192_v44  ;;  %v6712_v15 = vrot.slane %v8240_v41, 1  ;;  %v8242_v33 = vcombine.low %v6278_v55, %v12735_v63  ;;  %v8243_v27 = vcombine.low %v6279_v24, %v12746_v0  ;;  %v8244_v42 = vcombine.low %v6280_v2, %v12748_v62  ;;  %v10202_v40 = vld [vmem:[#allocation6 + $0x228] sm:$0xff]  }
 0x30b   : > { %5992 = vmatmul.mubr.bf16.gmra.mrb[0].mxu0 %v12575_v21  ;;  %v6715_v39 = vrot.slane %v8241_v31, 1  ;;  %v6722_v21 = vrot.slane %v12737_v51, 1  ;;  %v6472_v41 = vrot.slane %v13440_v60, 1  ;;  %v4475_v24 = vshll.u32 %v12645_v43, 16 }
 0x30c   : > { %5999 = vmatprep.mubr.bf16.mxu0 %v12673_v57  ;;  %v12779_v45 = vsel %vm825_vm1, %v6712_v15, %v6713_v22  ;;  %v6718_v55 = vrot.slane %v8242_v33, 1  ;;  %v6725_v57 = vrot.slane %v12757_v54, 1  ;;  %v6228_v15 = vld [vmem:[#allocation2 + $0x54] sm:$0xf]  ;;  %v6724_v2 = vrot.slane %v8244_v42, 1 }
 0x30d   : > { %9373 = vmatpush3.bf16.msra.mxu1 %v10192_v44  ;;  %13439 = vst [vmem:[#allocation17_spill] sm:$0xff] %v12779_v45  ;;  %v12787_v31 = vsel %vm825_vm1, %v6715_v39, %v6716_v12  ;;  %v13441_v44 = vshrl.u32 %v12629_v8, 16  ;;  %v6721_v45 = vrot.slane %v8243_v27, 1  ;;  %v6473_v58 = vsel %vm568_vm0, %v12703_v38, %v6472_v41 }
 0x30e   : > { %9374 = vmatprep.subr.bf16.mxu1 %v10197_v48  ;;  %v13442_v12 = vshll.u32 %v12685_v47, 16  ;;  %v12800_v33 = vcombine.low %v6228_v15, %v12667_v56  ;;  %v12803_v60 = vsel %vm825_vm1, %v6718_v55, %v6719_v3  ;;  %v13443_v38 = vshll.u32 %v12519_v26, 16  ;;  %v10207_v3 = vld [vmem:[#allocation6 + $0x230] sm:$0xff]  }
 0x30f   : > { %v4466_v22 = vor.u32 %v12675_v19, %v13441_v44  ;;  %v4156_v19 = vld [vmem:[#allocation2 + $0x90] sm:$0xf]  ;;  %v12806_v27 = vsel %vm825_vm1, %v6721_v45, %v6722_v21  ;;  %v6475_v56 = vshrl.u32 %v12685_v47, 16  ;;  %v6482_v15 = vshll.u32 %v12662_v4, 16 }
 0x310   : > { %6988 = vmatmul.mubr.bf16.gmra.mrb[136].mxu1 %v12619_v5  ;;  %v6479_v39 = vrot.slane %v13442_v12, 1  ;;  %v8734_v44 = vpop.f32.mrb[160].mxu0  ;;  %v12809_v5 = vsel %vm825_vm1, %v6724_v2, %v6725_v57  ;;  %v4470_v42 = vrot.slane %v13443_v38, 1  ;;  %v12816_v55 = vcombine.low %v4156_v19, %v12533_v1  ;;  %v6230_v38 = vld [vmem:[#allocation2 + $0x60] sm:$0xf] }
 0x311   : > { %6995 = vmatprep.mubr.bf16.mxu1 %v6473_v58  ;;  %9375 = vmatpush3.bf16.msra.mxu1 %v10197_v48  ;;  %v8735_v41 = vpop.f32.mrb[161].mxu0  ;;  %v4477_v57 = vrot.slane %v4475_v24, 1  ;;  %v6489_v58 = vshll.u32 %v12800_v33, 16  ;;  %v4473_v4 = vshrl.u32 %v12645_v43, 16  ;;  %v4480_v1 = vshll.u32 %v12539_v7, 16 }
 0x312   : > { %9376 = vmatprep.subr.bf16.mxu1 %v10202_v40  ;;  %v12818_v48 = vadd.f32 %v8735_v41, %v8734_v44  ;;  %v8737_v45 = vpop.f32.mrb[162].mxu0  ;;  %v4471_v21 = vsel %vm568_vm0, %v4466_v22, %v4470_v42  ;;  %v6480_v26 = vor.u32 %v6479_v39, %v6475_v56  ;;  %v6484_v19 = vrot.slane %v6482_v15, 1  ;;  %v10212_v44 = vld [vmem:[#allocation6 + $0x238] sm:$0xff]  }
 0x313   : > { %6000 = vmatmul.mubr.bf16.gmra.mrb[4].mxu0 %v12591_v23  ;;  %v8738_v2 = vpop.f32.mrb[163].mxu0  ;;  %v4487_v23 = vshll.u32 %v12816_v55, 16  ;;  %v4478_v22 = vor.u32 %v4477_v57, %v4473_v4  ;;  %v6491_v39 = vrot.slane %v6489_v58, 1  ;;  %v12831_v42 = vcombine.low %v6230_v38, %v12687_v59  ;;  %v6232_v4 = vld [vmem:[#allocation2 + $0x6c] sm:$0xf] }
 0x314   : > { %6007 = vmatprep.mubr.bf16.mxu0 %v4471_v21  ;;  %v12823_v12 = vadd.f32 %v8738_v2, %v8737_v45  ;;  %v6485_v24 = vsel %vm568_vm0, %v6480_v26, %v6484_v19  ;;  %v4482_v41 = vrot.slane %v4480_v1, 1  ;;  %v6487_v7 = vshrl.u32 %v12800_v33, 16 }
 0x315   : > { %9377 = vmatpush3.bf16.msra.mxu1 %v10202_v40  ;;  %v4158_v40 = vld [vmem:[#allocation2 + $0x9c] sm:$0xf]  ;;  %v6494_v56 = vshll.u32 %v12669_v13, 16  ;;  %v4489_v45 = vrot.slane %v4487_v23, 1  ;;  %v6501_v59 = vshll.u32 %v12831_v42, 16  ;;  %v4492_v57 = vshll.u32 %v12544_v32, 16 }
 0x316   : > { %9378 = vmatprep.subr.bf16.mxu1 %v10207_v3  ;;  %v12836_v15 = vcombine.low %v4158_v40, %v12556_v34  ;;  %v6492_v21 = vor.u32 %v6491_v39, %v6487_v7  ;;  %v8205_v38 = vcombine.low %v6232_v4, %v12693_v17  ;;  %v6506_v39 = vshll.u32 %v12677_v49, 16 }
 0x317   : > { %v6496_v13 = vrot.slane %v6494_v56, 1  ;;  %v6503_v23 = vrot.slane %v6501_v59, 1  ;;  %v4494_v32 = vrot.slane %v4492_v57, 1  ;;  %v4504_v17 = vshll.u32 %v12564_v28, 16 }
 0x318   : > { %6996 = vmatmul.mubr.bf16.gmra.mrb[140].mxu1 %v12640_v16  ;;  %v4483_v16 = vsel %vm568_vm0, %v4478_v22, %v4482_v41  ;;  %v4499_v34 = vshll.u32 %v12836_v15, 16  ;;  %v6513_v7 = vshll.u32 %v8205_v38, 16  ;;  %v4497_v56 = vshrl.u32 %v12836_v15, 16 }
 0x319   : > { %7003 = vmatprep.mubr.bf16.mxu1 %v6485_v24  ;;  %9379 = vmatpush3.bf16.msra.mxu1 %v10207_v3  ;;  %v4485_v3 = vshrl.u32 %v12816_v55, 16  ;;  %v6497_v1 = vsel %vm568_vm0, %v6492_v21, %v6496_v13  ;;  %v6499_v24 = vshrl.u32 %v12831_v42, 16  ;;  %v6511_v28 = vshrl.u32 %v8205_v38, 16 }
 0x31a   : > { %9380 = vmatprep.subr.bf16.mxu1 %v10212_v44  ;;  %v4501_v40 = vrot.slane %v4499_v34, 1  ;;  %v6518_v4 = vshll.u32 %v12689_v35, 16 }
 0x31b   : > { %6008 = vmatmul.mubr.bf16.gmra.mrb[8].mxu0 %v12629_v8  ;;  %v4490_v2 = vor.u32 %v4489_v45, %v4485_v3  ;;  %v6504_v41 = vor.u32 %v6503_v23, %v6499_v24  ;;  %v6234_v3 = vld [vmem:[#allocation2 + $0x78] sm:$0xf]  ;;  %v6236_v24 = vld [vmem:[#allocation2 + $0x84] sm:$0xf] }
 0x31c   : > { %6015 = vmatprep.mubr.bf16.mxu0 %v4483_v16  ;;  %v6508_v16 = vrot.slane %v6506_v39, 1  ;;  %v4502_v21 = vor.u32 %v4501_v40, %v4497_v56  ;;  %v8206_v13 = vcombine.low %v6234_v3, %v12695_v52  ;;  %v8207_v35 = vcombine.low %v6236_v24, %v12705_v61 }
 0x31d   : > { %9381 = vmatpush3.bf16.msra.mxu1 %v10212_v44  ;;  %v8740_v26 = vpop.f32.mrb[164].mxu0  ;;  %v6530_v56 = vshll.u32 %v12697_v6, 16 }
 0x31e   : > { %v8741_v58 = vpop.f32.mrb[165].mxu0 }
 0x31f   : > { %v12845_v8 = vadd.f32 %v8741_v58, %v8740_v26  ;;  %v8743_v19 = vpop.f32.mrb[166].mxu0  ;;  %v6515_v26 = vrot.slane %v6513_v7, 1  ;;  %v4506_v58 = vrot.slane %v4504_v17, 1  ;;  %v6523_v7 = vshrl.u32 %v8206_v13, 16 }
 0x320   : > { %7004 = vmatmul.mubr.bf16.gmra.mrb[144].mxu1 %v12685_v47  ;;  %v8744_v44 = vpop.f32.mrb[167].mxu0  ;;  %v4495_v47 = vsel %vm568_vm0, %v4490_v2, %v4494_v32 }
 0x321   : > { %7011 = vmatprep.mubr.bf16.mxu1 %v6497_v1  ;;  %v12849_v22 = vadd.f32 %v8744_v44, %v8743_v19  ;;  %v6516_v1 = vor.u32 %v6515_v26, %v6511_v28  ;;  %v6525_v19 = vshll.u32 %v8206_v13, 16  ;;  %v6520_v44 = vrot.slane %v6518_v4, 1  ;;  %v6240_v4 = vld [vmem:[#allocation2 + $0x9c] sm:$0xf] }
 0x323   : > { %6016 = vmatmul.mubr.bf16.gmra.mrb[12].mxu0 %v12645_v43  ;;  %v6509_v43 = vsel %vm568_vm0, %v6504_v41, %v6508_v16  ;;  %v6521_v39 = vsel %vm568_vm0, %v6516_v1, %v6520_v44 }
 0x324   : > { %6023 = vmatprep.mubr.bf16.mxu0 %v4495_v47  ;;  %v6527_v47 = vrot.slane %v6525_v19, 1  ;;  %v8209_v19 = vcombine.low %v6240_v4, %v12720_v50 }
 0x325   : > { %v8746_v45 = vpop.f32.mrb[168].mxu0 }
 0x326   : > { %v8747_v59 = vpop.f32.mrb[169].mxu0  ;;  %v6528_v17 = vor.u32 %v6527_v47, %v6523_v7  ;;  %v6242_v47 = vld [vmem:[#allocation2 + $0xa8] sm:$0xf] }
 0x327   : > { %v12858_v49 = vadd.f32 %v8747_v59, %v8746_v45  ;;  %v8749_v57 = vpop.f32.mrb[170].mxu0  ;;  %v6537_v45 = vshll.u32 %v8207_v35, 16  ;;  %v8210_v7 = vcombine.low %v6242_v47, %v12735_v63 }
 0x328   : > { %7012 = vmatmul.mubr.bf16.gmra.mrb[148].mxu1 %v12800_v33  ;;  %v8750_v2 = vpop.f32.mrb[171].mxu0  ;;  %v4507_v33 = vsel %vm568_vm0, %v4502_v21, %v4506_v58  ;;  %v6238_v21 = vld [vmem:[#allocation2 + $0x90] sm:$0xf] }
 0x329   : > { %7019 = vmatprep.mubr.bf16.mxu1 %v6509_v43  ;;  %v12862_v34 = vadd.f32 %v8750_v2, %v8749_v57  ;;  %v6539_v3 = vrot.slane %v6537_v45, 1  ;;  %v8208_v43 = vcombine.low %v6238_v21, %v12710_v10  ;;  %v6542_v2 = vshll.u32 %v12707_v14, 16 }
 0x32b   : > { %6024 = vmatmul.mubr.bf16.gmra.mrb[16].mxu0 %v12816_v55  ;;  %v6544_v28 = vrot.slane %v6542_v2, 1 }
 0x32c   : > { %6031 = vmatprep.mubr.bf16.mxu0 %v4507_v33 }
 0x32e   : > { %v8752_v23 = vpop.f32.mrb[172].mxu0 }
 0x32f   : > { %v8753_v32 = vpop.f32.mrb[173].mxu0 }
 0x330   : > { %7020 = vmatmul.mubr.bf16.gmra.mrb[152].mxu1 %v12831_v42  ;;  %v12868_v52 = vadd.f32 %v8753_v32, %v8752_v23  ;;  %v8755_v40 = vpop.f32.mrb[174].mxu0  ;;  %v6532_v42 = vrot.slane %v6530_v56, 1  ;;  %v6547_v32 = vshrl.u32 %v8208_v43, 16  ;;  %v6559_v56 = vshrl.u32 %v8209_v19, 16 }
 0x331   : > { %7027 = vmatprep.mubr.bf16.mxu1 %v6521_v39  ;;  %v8756_v55 = vpop.f32.mrb[175].mxu0 }
 0x332   : > { %v12872_v41 = vadd.f32 %v8756_v55, %v8755_v40  ;;  %v6533_v61 = vsel %vm568_vm0, %v6528_v17, %v6532_v42  ;;  %v6566_v17 = vshll.u32 %v12722_v18, 16  ;;  %v6571_v18 = vshrl.u32 %v8210_v7, 16 }
 0x333   : > { %6032 = vmatmul.mubr.bf16.gmra.mrb[20].mxu0 %v12836_v15  ;;  %v6535_v15 = vshrl.u32 %v8207_v35, 16 }
 0x334   : > { %6039 = vmatprep.mubr.bf16.mxu0 %v12607_v20 }
 0x335   : > { %v6540_v20 = vor.u32 %v6539_v3, %v6535_v15  ;;  %v6578_v15 = vshll.u32 %v12728_v29, 16 }
 0x336   : > { %v8758_v16 = vpop.f32.mrb[176].mxu0 }
 0x337   : > { %v8759_v59 = vpop.f32.mrb[177].mxu0  ;;  %v6545_v10 = vsel %vm568_vm0, %v6540_v20, %v6544_v28 }
 0x338   : > { %7028 = vmatmul.mubr.bf16.gmra.mrb[156].mxu1 %v8205_v38  ;;  %v12879_v57 = vadd.f32 %v8759_v59, %v8758_v16  ;;  %v8761_v6 = vpop.f32.mrb[178].mxu0  ;;  %v6549_v38 = vshll.u32 %v8208_v43, 16 }
 0x339   : > { %7035 = vmatprep.mubr.bf16.mxu1 %v6533_v61  ;;  %v8762_v26 = vpop.f32.mrb[179].mxu0  ;;  %v6568_v61 = vrot.slane %v6566_v17, 1 }
 0x33a   : > { %v12882_v58 = vadd.f32 %v8762_v26, %v8761_v6  ;;  %v6551_v1 = vrot.slane %v6549_v38, 1 }
 0x33b   : > { %6040 = vmatmul.mubr.bf16.gmra.mrb[24].mxu0 %v12561_v30  ;;  %v6554_v30 = vshll.u32 %v12712_v25, 16 }
 0x33c   : > { %6047 = vmatprep.mubr.bf16.mxu0 %v12626_v37  ;;  %v6552_v39 = vor.u32 %v6551_v1, %v6547_v32 }
 0x33d   : > { %v6556_v40 = vrot.slane %v6554_v30, 1  ;;  %v6590_v30 = vshll.u32 %v12737_v51, 16 }
 0x33f   : > { %v6557_v50 = vsel %vm568_vm0, %v6552_v39, %v6556_v40  ;;  %v12911_v39 = vld [vmem:[#allocation2 + $0xd0] sm:$0xf] }
 0x340   : > { %v8764_v33 = vpop.f32.mrb[180].mxu0  ;;  %7036 = vmatmul.mubr.bf16.gmra.mrb[160].mxu1 %v8206_v13  ;;  %v6561_v13 = vshll.u32 %v8209_v19, 16 }
 0x341   : > { %v8765_v23 = vpop.f32.mrb[181].mxu0  ;;  %7043 = vmatprep.mubr.bf16.mxu1 %v6545_v10  ;;  %v6580_v10 = vrot.slane %v6578_v15, 1 }
 0x342   : > { %v12888_v14 = vadd.f32 %v8765_v23, %v8764_v33  ;;  %v8767_v44 = vpop.f32.mrb[182].mxu0  ;;  %v6563_v55 = vrot.slane %v6561_v13, 1  ;;  %v6246_v23 = vld [vmem:[#allocation2 + $0xc0] sm:$0xf] }
 0x343   : > { %v8768_v24 = vpop.f32.mrb[183].mxu0  ;;  %6048 = vmatmul.mubr.bf16.gmra.mrb[28].mxu0 %v12578_v11  ;;  %v6573_v11 = vshll.u32 %v8210_v7, 16  ;;  %v8212_v32 = vcombine.low %v6246_v23, %v12748_v62 }
 0x344   : > { %v12892_v37 = vadd.f32 %v8768_v24, %v8767_v44  ;;  %v6564_v42 = vor.u32 %v6563_v55, %v6559_v56  ;;  %v6248_v24 = vld [vmem:[#allocation2 + $0xcc] sm:$0xf] }
 0x345   : > { %v6575_v63 = vrot.slane %v6573_v11, 1  ;;  %v6597_v47 = vshll.u32 %v8212_v32, 16  ;;  %v8213_v17 = vcombine.low %v6248_v24, %v12911_v39  ;;  %v6602_v11 = vshll.u32 %v12757_v54, 16 }
 0x346   : > { %v6569_v6 = vsel %vm568_vm0, %v6564_v42, %v6568_v61  ;;  %v6595_v42 = vshrl.u32 %v8212_v32, 16 }
 0x347   : > { %v6576_v20 = vor.u32 %v6575_v63, %v6571_v18  ;;  %v6599_v51 = vrot.slane %v6597_v47, 1  ;;  %v6607_v63 = vshrl.u32 %v8213_v17, 16 }
 0x348   : > { %7044 = vmatmul.mubr.bf16.gmra.mrb[164].mxu1 %v8207_v35  ;;  %v6244_v35 = vld [vmem:[#allocation2 + $0xb4] sm:$0xf] }
 0x349   : > { %7051 = vmatprep.mubr.bf16.mxu1 %v6557_v50  ;;  %v8211_v26 = vcombine.low %v6244_v35, %v12746_v0  ;;  %v6581_v44 = vsel %vm568_vm0, %v6576_v20, %v6580_v10  ;;  %v6600_v61 = vor.u32 %v6599_v51, %v6595_v42 }
 0x34b   : > { %v8770_v25 = vpop.f32.mrb[184].mxu0  ;;  %v6585_v38 = vshll.u32 %v8211_v26, 16  ;;  %v6583_v29 = vshrl.u32 %v8211_v26, 16 }
 0x34c   : > { %v8771_v45 = vpop.f32.mrb[185].mxu0 }
 0x34d   : > { %v12897_v16 = vadd.f32 %v8771_v45, %v8770_v25  ;;  %v8773_v21 = vpop.f32.mrb[186].mxu0  ;;  %v6587_v0 = vrot.slane %v6585_v38, 1 }
 0x34e   : > { %v8774_v59 = vpop.f32.mrb[187].mxu0 }
 0x34f   : > { %v12899_v3 = vadd.f32 %v8774_v59, %v8773_v21  ;;  %v6588_v40 = vor.u32 %v6587_v0, %v6583_v29  ;;  %v12920_v21 = vld [vmem:[#allocation2 + $0xd4] ss:$0 sps:$4 sm:$0x11]   ;;  %v6609_v59 = vshll.u32 %v8213_v17, 16 }
 0x350   : > { %7052 = vmatmul.mubr.bf16.gmra.mrb[168].mxu1 %v8208_v43  ;;  %v6614_v15 = vshll.u32 %v12920_v21, 16 }
 0x351   : > { %7059 = vmatprep.mubr.bf16.mxu1 %v6569_v6  ;;  %v6604_v6 = vrot.slane %v6602_v11, 1  ;;  %v6611_v18 = vrot.slane %v6609_v59, 1  ;;  %v13446_v11 = vld [vmem:[#allocation23_spill] sm:$0xff] }
 0x352   : > { %v6616_v10 = vrot.slane %v6614_v15, 1  ;;  %v13448_v15 = vld [vmem:[#allocation16_spill] sm:$0xff] }
 0x353   : > { %v6605_v38 = vsel %vm568_vm0, %v6600_v61, %v6604_v6  ;;  %v13447_v6 = vld [vmem:[#allocation24_spill] sm:$0xff] }
 0x354   : > { %v8776_v2 = vpop.f32.mrb[188].mxu0 }
 0x355   : > { %v8777_v28 = vpop.f32.mrb[189].mxu0 }
 0x356   : > { %v12904_v4 = vadd.f32 %v8777_v28, %v8776_v2  ;;  %v8779_v33 = vpop.f32.mrb[190].mxu0 }
 0x357   : > { %v8780_v1 = vpop.f32.mrb[191].mxu0 }
 0x358   : > { %v12906_v43 = vadd.f32 %v8780_v1, %v8779_v33  ;;  %7060 = vmatmul.mubr.bf16.gmra.mrb[172].mxu1 %v8209_v19  ;;  %v6592_v19 = vrot.slane %v6590_v30, 1  ;;  %v6612_v33 = vor.u32 %v6611_v18, %v6607_v63 }
 0x359   : > { %7067 = vmatprep.mubr.bf16.mxu1 %v6581_v44 }
 0x35a   : > { %v6593_v62 = vsel %vm568_vm0, %v6588_v40, %v6592_v19  ;;  %v6617_v1 = vsel %vm568_vm0, %v6612_v33, %v6616_v10 }
 0x35c   : > { %v8782_v13 = vpop.f32.mrb[192].mxu0 }
 0x35d   : > { %v8783_v50 = vpop.f32.mrb[193].mxu0 }
 0x35e   : > { %v12913_v55 = vadd.f32 %v8783_v50, %v8782_v13  ;;  %v8785_v56 = vpop.f32.mrb[194].mxu0  ;;  %v13444_v50 = vld [vmem:[#allocation15_spill] sm:$0xff] }
 0x35f   : > { %v8786_v25 = vpop.f32.mrb[195].mxu0 }
 0x360   : > { %v12916_v45 = vadd.f32 %v8786_v25, %v8785_v56  ;;  %7068 = vmatmul.mubr.bf16.gmra.mrb[176].mxu1 %v8210_v7 }
 0x361   : > { %7075 = vmatprep.mubr.bf16.mxu1 %v6593_v62  ;;  %v13445_v62 = vld [vmem:[#allocation22_spill] sm:$0xff] }
 0x366   : > { %v8788_v35 = vpop.f32.mrb[196].mxu0 }
 0x367   : > { %v8789_v2 = vpop.f32.mrb[197].mxu0 }
 0x368   : > { %v12923_v20 = vadd.f32 %v8789_v2, %v8788_v35  ;;  %v8791_v7 = vpop.f32.mrb[198].mxu0  ;;  %7076 = vmatmul.mubr.bf16.gmra.mrb[180].mxu1 %v8211_v26 }
 0x369   : > { %v8792_v28 = vpop.f32.mrb[199].mxu0  ;;  %7083 = vmatprep.mubr.bf16.mxu1 %v6605_v38 }
 0x36a   : > { %v12926_v54 = vadd.f32 %v8792_v28, %v8791_v7 }
 0x36e   : > { %v8794_v23 = vpop.f32.mrb[200].mxu0 }
 0x36f   : > { %v8795_v44 = vpop.f32.mrb[201].mxu0 }
 0x370   : > { %7084 = vmatmul.mubr.bf16.gmra.mrb[184].mxu1 %v8212_v32  ;;  %v12929_v0 = vadd.f32 %v8795_v44, %v8794_v23  ;;  %v8797_v29 = vpop.f32.mrb[202].mxu0 }
 0x371   : > { %7091 = vmatprep.mubr.bf16.mxu1 %v6617_v1  ;;  %v8798_v30 = vpop.f32.mrb[203].mxu0  ;;  %v13449_v1 = vld [vmem:[#allocation14_spill] sm:$0xff] }
 0x372   : > { %v12931_v24 = vadd.f32 %v8798_v30, %v8797_v29 }
 0x376   : > { %v8800_v26 = vpop.f32.mrb[204].mxu0 }
 0x377   : > { %v8801_v13 = vpop.f32.mrb[205].mxu0 }
 0x378   : > { %7092 = vmatmul.mubr.bf16.gmra.mrb[188].mxu1 %v8213_v17  ;;  %v12933_v40 = vadd.f32 %v8801_v13, %v8800_v26  ;;  %v8803_v47 = vpop.f32.mrb[206].mxu0 }
 0x379   : > { %9382 = vmatprep.mubr.bf16.mxu1 %v13444_v50  ;;  %v8804_v56 = vpop.f32.mrb[207].mxu0 }
 0x37a   : > { %v12936_v19 = vadd.f32 %v8804_v56, %v8803_v47 }
 0x37e   : > { %v8806_v25 = vpop.f32.mrb[208].mxu0 }
 0x37f   : > { %v8807_v32 = vpop.f32.mrb[209].mxu0 }
 0x380   : > { %9383 = vmatmul.mubr.bf16.vlgmr.msra.gmra.mrb[96].mxu1 %v13445_v62  ;;  %v12939_v51 = vadd.f32 %v8807_v32, %v8806_v25  ;;  %v8809_v42 = vpop.f32.mrb[210].mxu0  ;;  %v13450_v62 = vld [vmem:[#allocation17_spill] sm:$0xff] }
 0x381   : > { %9386 = vmatprep.mubr.bf16.mxu1 %v13446_v11  ;;  %v8810_v59 = vpop.f32.mrb[211].mxu0 }
 0x382   : > { %v12942_v61 = vadd.f32 %v8810_v59, %v8809_v42 }
 0x386   : > { %v8812_v17 = vpop.f32.mrb[212].mxu0 }
 0x387   : > { %v8813_v35 = vpop.f32.mrb[213].mxu0 }
 0x388   : > { %9387 = vmatmul.mubr.bf16.gmra.mrb[100].mxu1 %v13447_v6  ;;  %v12945_v63 = vadd.f32 %v8813_v35, %v8812_v17  ;;  %v8815_v18 = vpop.f32.mrb[214].mxu0 }
 0x389   : > { %9390 = vmatprep.mubr.bf16.mxu1 %v13448_v15  ;;  %v8816_v2 = vpop.f32.mrb[215].mxu0 }
 0x38a   : > { %v12948_v7 = vadd.f32 %v8816_v2, %v8815_v18  ;;  %v6281_v18 = vld [vmem:[#allocation2 + $0xcc] sm:$0xe] }
 0x38e   : > { %v8818_v38 = vpop.f32.mrb[216].mxu0 }
 0x38f   : > { %v8819_v28 = vpop.f32.mrb[217].mxu0 }
 0x390   : > { %9391 = vmatmul.mubr.bf16.gmra.mrb[104].mxu1 %v12751_v53  ;;  %v12951_v33 = vadd.f32 %v8819_v28, %v8818_v38  ;;  %v8821_v10 = vpop.f32.mrb[218].mxu0 }
 0x391   : > { %9394 = vmatprep.mubr.bf16.mxu1 %v13449_v1  ;;  %v8822_v23 = vpop.f32.mrb[219].mxu0  ;;  %v6728_v1 = vrot.slane %v12920_v21, 1 }
 0x392   : > { %v12954_v44 = vadd.f32 %v8822_v23, %v8821_v10 }
 0x396   : > { %v8824_v29 = vpop.f32.mrb[220].mxu0 }
 0x397   : > { %v8825_v30 = vpop.f32.mrb[221].mxu0 }
 0x398   : > { %9395 = vmatmul.mubr.bf16.gmra.mrb[108].mxu1 %v12765_v46  ;;  %v12957_v26 = vadd.f32 %v8825_v30, %v8824_v29  ;;  %v8827_v13 = vpop.f32.mrb[222].mxu0 }
 0x399   : > { %9398 = vmatprep.mubr.bf16.mxu1 %v12768_v36  ;;  %v8828_v47 = vpop.f32.mrb[223].mxu0 }
 0x39a   : > { %v12960_v50 = vadd.f32 %v8828_v47, %v8827_v13 }
 0x39e   : > { %v8870_v53 = vpop.f32.mrb[224].mxu0 }
 0x39f   : > { %v8871_v56 = vpop.f32.mrb[225].mxu0 }
 0x3a0   : > { %9399 = vmatmul.mubr.bf16.gmra.mrb[112].mxu1 %v12773_v9  ;;  %v8872_v25 = vadd.f32 %v8871_v56, %v8870_v53  ;;  %v8873_v32 = vpop.f32.mrb[226].mxu0 }
 0x3a1   : > { %9402 = vmatprep.mubr.bf16.mxu1 %v13450_v62  ;;  %v8874_v42 = vpop.f32.mrb[227].mxu0 }
 0x3a2   : > { %v12965_v11 = vadd.f32 %v8872_v25, %v12818_v48  ;;  %v8875_v46 = vadd.f32 %v8874_v42, %v8873_v32 }
 0x3a4   : > { %v12968_v59 = vadd.f32 %v8875_v46, %v12823_v12  ;;  %v8245_v12 = vcombine.low %v6281_v18, %v12911_v39 }
 0x3a6   : > { %v8876_v36 = vpop.f32.mrb[228].mxu0 }
 0x3a7   : > { %v8877_v17 = vpop.f32.mrb[229].mxu0 }
 0x3a8   : > { %9403 = vmatmul.mubr.bf16.gmra.mrb[116].mxu1 %v12787_v31  ;;  %v8878_v35 = vadd.f32 %v8877_v17, %v8876_v36  ;;  %v8879_v6 = vpop.f32.mrb[230].mxu0 }
 0x3a9   : > { %9406 = vmatprep.mubr.bf16.mxu1 %v12803_v60  ;;  %v8880_v9 = vpop.f32.mrb[231].mxu0  ;;  %v6727_v60 = vrot.slane %v8245_v12, 1 }
 0x3aa   : > { %v12973_v15 = vadd.f32 %v8878_v35, %v12845_v8  ;;  %v8881_v2 = vadd.f32 %v8880_v9, %v8879_v6 }
 0x3ab   : > { %v6729_v39 = vsel %vm825_vm1, %v6727_v60, %v6728_v1 }
 0x3ac   : > { %v12976_v48 = vadd.f32 %v8881_v2, %v12849_v22 }
 0x3ae   : > { %v8882_v38 = vpop.f32.mrb[232].mxu0 }
 0x3af   : > { %v8883_v28 = vpop.f32.mrb[233].mxu0 }
 0x3b0   : > { %9407 = vmatmul.mubr.bf16.gmra.mrb[120].mxu1 %v12806_v27  ;;  %v8884_v31 = vadd.f32 %v8883_v28, %v8882_v38  ;;  %v8885_v10 = vpop.f32.mrb[234].mxu0 }
 0x3b1   : > { %9410 = vmatprep.mubr.bf16.mxu1 %v12809_v5  ;;  %v8886_v23 = vpop.f32.mrb[235].mxu0 }
 0x3b2   : > { %v12983_v8 = vadd.f32 %v8884_v31, %v12858_v49  ;;  %v8887_v29 = vadd.f32 %v8886_v23, %v8885_v10 }
 0x3b4   : > { %v12986_v22 = vadd.f32 %v8887_v29, %v12862_v34 }
 0x3b6   : > { %v8888_v30 = vpop.f32.mrb[236].mxu0 }
 0x3b7   : > { %v8889_v13 = vpop.f32.mrb[237].mxu0 }
 0x3b8   : > { %9411 = vmatmul.mubr.bf16.gmra.mrb[124].mxu1 %v6729_v39  ;;  %v8890_v27 = vadd.f32 %v8889_v13, %v8888_v30  ;;  %v8891_v47 = vpop.f32.mrb[238].mxu0 }
 0x3b9   : > { %v8892_v53 = vpop.f32.mrb[239].mxu0 }
 0x3ba   : > { %v12990_v5 = vadd.f32 %v8890_v27, %v12868_v52  ;;  %v8893_v21 = vadd.f32 %v8892_v53, %v8891_v47 }
 0x3bc   : > { %v12993_v56 = vadd.f32 %v8893_v21, %v12872_v41 }
 0x3be   : > { %v8894_v49 = vpop.f32.mrb[240].mxu0 }
 0x3bf   : > { %v8895_v25 = vpop.f32.mrb[241].mxu0 }
 0x3c0   : > { %v8896_v32 = vadd.f32 %v8895_v25, %v8894_v49  ;;  %v8897_v34 = vpop.f32.mrb[242].mxu0 }
 0x3c1   : > { %v8898_v62 = vpop.f32.mrb[243].mxu0 }
 0x3c2   : > { %v12996_v42 = vadd.f32 %v8896_v32, %v12879_v57  ;;  %v8899_v46 = vadd.f32 %v8898_v62, %v8897_v34 }
 0x3c4   : > { %v12999_v36 = vadd.f32 %v8899_v46, %v12882_v58 }
 0x3c6   : > { %v8900_v17 = vpop.f32.mrb[244].mxu0 }
 0x3c7   : > { %v8901_v35 = vpop.f32.mrb[245].mxu0 }
 0x3c8   : > { %v8902_v52 = vadd.f32 %v8901_v35, %v8900_v17  ;;  %v8903_v6 = vpop.f32.mrb[246].mxu0 }
 0x3c9   : > { %v8904_v9 = vpop.f32.mrb[247].mxu0 }
 0x3ca   : > { %v13002_v41 = vadd.f32 %v8902_v52, %v12888_v14  ;;  %v8905_v18 = vadd.f32 %v8904_v9, %v8903_v6 }
 0x3cc   : > { %v13005_v2 = vadd.f32 %v8905_v18, %v12892_v37 }
 0x3ce   : > { %v8906_v12 = vpop.f32.mrb[248].mxu0 }
 0x3cf   : > { %v8907_v38 = vpop.f32.mrb[249].mxu0 }
 0x3d0   : > { %v8908_v57 = vadd.f32 %v8907_v38, %v8906_v12  ;;  %v8909_v28 = vpop.f32.mrb[250].mxu0 }
 0x3d1   : > { %v8910_v31 = vpop.f32.mrb[251].mxu0 }
 0x3d2   : > { %v13008_v58 = vadd.f32 %v8908_v57, %v12897_v16  ;;  %v8911_v10 = vadd.f32 %v8910_v31, %v8909_v28 }
 0x3d3   : > { %v9006_v60 = vpop.f32.mrb[128].mxu1 }
 0x3d4   : > { %v9007_v1 = vpop.f32.mrb[129].mxu1  ;;  %v13011_v23 = vadd.f32 %v8911_v10, %v12899_v3 }
 0x3d5   : > { %v9008_v14 = vadd.f32 %v9007_v1, %v9006_v60  ;;  %v9009_v29 = vpop.f32.mrb[130].mxu1 }
 0x3d6   : > { %v9010_v39 = vpop.f32.mrb[131].mxu1  ;;  %v8912_v30 = vpop.f32.mrb[252].mxu0 }
 0x3d7   : > { %v9011_v37 = vadd.f32 %v9010_v39, %v9009_v29  ;;  %v8913_v13 = vpop.f32.mrb[253].mxu0  ;;  %v13017_v32 = vadd.f32 %v12965_v11, %v9008_v14 }
 0x3d8   : > { %v8914_v27 = vadd.f32 %v8913_v13, %v8912_v30  ;;  %v8915_v47 = vpop.f32.mrb[254].mxu0 }
 0x3d9   : > { %v8916_v53 = vpop.f32.mrb[255].mxu0  ;;  %v13023_v17 = vadd.f32 %v12968_v59, %v9011_v37 }
 0x3da   : > { %v13014_v21 = vadd.f32 %v8914_v27, %v12904_v4  ;;  %v8917_v16 = vadd.f32 %v8916_v53, %v8915_v47 }
 0x3db   : > { %v9012_v49 = vpop.f32.mrb[132].mxu1 }
 0x3dc   : > { %v9013_v25 = vpop.f32.mrb[133].mxu1  ;;  %v13020_v3 = vadd.f32 %v8917_v16, %v12906_v43 }
 0x3dd   : > { %v9014_v34 = vadd.f32 %v9013_v25, %v9012_v49  ;;  %v9015_v62 = vpop.f32.mrb[134].mxu1 }
 0x3de   : > { %v9016_v46 = vpop.f32.mrb[135].mxu1  ;;  %v8918_v35 = vpop.f32.mrb[0].mxu0 }
 0x3df   : > { %v9017_v52 = vadd.f32 %v9016_v46, %v9015_v62  ;;  %v13026_v4 = vadd.f32 %v12973_v15, %v9014_v34  ;;  %v8919_v6 = vpop.f32.mrb[1].mxu0 }
 0x3e0   : > { %v8920_v9 = vadd.f32 %v8919_v6, %v8918_v35  ;;  %v8921_v18 = vpop.f32.mrb[2].mxu0 }
 0x3e1   : > { %v13029_v11 = vadd.f32 %v12976_v48, %v9017_v52  ;;  %v8922_v12 = vpop.f32.mrb[3].mxu0 }
 0x3e2   : > { %v13032_v43 = vadd.f32 %v8920_v9, %v12913_v55  ;;  %v8923_v38 = vadd.f32 %v8922_v12, %v8921_v18 }
 0x3e3   : > { %v9018_v57 = vpop.f32.mrb[136].mxu1 }
 0x3e4   : > { %v9019_v28 = vpop.f32.mrb[137].mxu1  ;;  %v13035_v59 = vadd.f32 %v8923_v38, %v12916_v45 }
 0x3e5   : > { %v9020_v31 = vadd.f32 %v9019_v28, %v9018_v57  ;;  %v9021_v10 = vpop.f32.mrb[138].mxu1 }
 0x3e6   : > { %v9022_v15 = vpop.f32.mrb[139].mxu1  ;;  %v8924_v60 = vpop.f32.mrb[4].mxu0 }
 0x3e7   : > { %v9023_v1 = vadd.f32 %v9022_v15, %v9021_v10  ;;  %v13038_v14 = vadd.f32 %v12983_v8, %v9020_v31  ;;  %v8925_v48 = vpop.f32.mrb[5].mxu0 }
 0x3e8   : > { %v8926_v29 = vadd.f32 %v8925_v48, %v8924_v60  ;;  %v8927_v39 = vpop.f32.mrb[6].mxu0 }
 0x3e9   : > { %v13041_v55 = vadd.f32 %v12986_v22, %v9023_v1  ;;  %v8928_v30 = vpop.f32.mrb[7].mxu0 }
 0x3ea   : > { %v13044_v37 = vadd.f32 %v8926_v29, %v12923_v20  ;;  %v8929_v45 = vadd.f32 %v8928_v30, %v8927_v39 }
 0x3eb   : > { %v9024_v13 = vpop.f32.mrb[140].mxu1 }
 0x3ec   : > { %v9025_v27 = vpop.f32.mrb[141].mxu1  ;;  %v13047_v47 = vadd.f32 %v8929_v45, %v12926_v54 }
 0x3ed   : > { %v9026_v53 = vadd.f32 %v9025_v27, %v9024_v13  ;;  %v9027_v16 = vpop.f32.mrb[142].mxu1 }
 0x3ee   : > { %v9028_v8 = vpop.f32.mrb[143].mxu1  ;;  %v8930_v49 = vpop.f32.mrb[8].mxu0 }
 0x3ef   : > { %v9029_v25 = vadd.f32 %v9028_v8, %v9027_v16  ;;  %v13050_v34 = vadd.f32 %v12990_v5, %v9026_v53  ;;  %v8931_v22 = vpop.f32.mrb[9].mxu0 }
 0x3f0   : > { %v8932_v62 = vadd.f32 %v8931_v22, %v8930_v49  ;;  %v8933_v46 = vpop.f32.mrb[10].mxu0 }
 0x3f1   : > { %v13053_v20 = vadd.f32 %v12993_v56, %v9029_v25  ;;  %v8934_v35 = vpop.f32.mrb[11].mxu0 }
 0x3f2   : > { %v13056_v52 = vadd.f32 %v8932_v62, %v12929_v0  ;;  %v8935_v54 = vadd.f32 %v8934_v35, %v8933_v46 }
 0x3f3   : > { %v9030_v6 = vpop.f32.mrb[144].mxu1 }
 0x3f4   : > { %v9031_v9 = vpop.f32.mrb[145].mxu1  ;;  %v13059_v18 = vadd.f32 %v8935_v54, %v12931_v24 }
 0x3f5   : > { %v9032_v12 = vadd.f32 %v9031_v9, %v9030_v6  ;;  %v9033_v38 = vpop.f32.mrb[146].mxu1 }
 0x3f6   : > { %v9034_v5 = vpop.f32.mrb[147].mxu1  ;;  %v8936_v57 = vpop.f32.mrb[12].mxu0 }
 0x3f7   : > { %v9035_v28 = vadd.f32 %v9034_v5, %v9033_v38  ;;  %v13062_v31 = vadd.f32 %v12996_v42, %v9032_v12  ;;  %v8937_v56 = vpop.f32.mrb[13].mxu0 }
 0x3f8   : > { %v8938_v10 = vadd.f32 %v8937_v56, %v8936_v57  ;;  %v8939_v15 = vpop.f32.mrb[14].mxu0 }
 0x3f9   : > { %v13065_v0 = vadd.f32 %v12999_v36, %v9035_v28  ;;  %v8940_v60 = vpop.f32.mrb[15].mxu0 }
 0x3fa   : > { %v13068_v1 = vadd.f32 %v8938_v10, %v12933_v40  ;;  %v8941_v24 = vadd.f32 %v8940_v60, %v8939_v15 }
 0x3fb   : > { %v9036_v48 = vpop.f32.mrb[148].mxu1 }
 0x3fc   : > { %v9037_v29 = vpop.f32.mrb[149].mxu1  ;;  %v13071_v39 = vadd.f32 %v8941_v24, %v12936_v19 }
 0x3fd   : > { %v9038_v30 = vadd.f32 %v9037_v29, %v9036_v48  ;;  %v9039_v45 = vpop.f32.mrb[150].mxu1 }
 0x3fe   : > { %v9040_v42 = vpop.f32.mrb[151].mxu1  ;;  %v8942_v13 = vpop.f32.mrb[16].mxu0 }
 0x3ff   : > { %v9041_v27 = vadd.f32 %v9040_v42, %v9039_v45  ;;  %v13074_v53 = vadd.f32 %v13002_v41, %v9038_v30  ;;  %v8943_v36 = vpop.f32.mrb[17].mxu0 }
 0x400   : > { %v8944_v16 = vadd.f32 %v8943_v36, %v8942_v13  ;;  %v8945_v8 = vpop.f32.mrb[18].mxu0 }
 0x401   : > { %v13077_v40 = vadd.f32 %v13005_v2, %v9041_v27  ;;  %v8946_v49 = vpop.f32.mrb[19].mxu0 }
 0x402   : > { %v13080_v25 = vadd.f32 %v8944_v16, %v12939_v51  ;;  %v8947_v19 = vadd.f32 %v8946_v49, %v8945_v8 }
 0x403   : > { %v9042_v22 = vpop.f32.mrb[152].mxu1 }
 0x404   : > { %v9043_v62 = vpop.f32.mrb[153].mxu1  ;;  %v13083_v46 = vadd.f32 %v8947_v19, %v12942_v61 }
 0x405   : > { %v9044_v35 = vadd.f32 %v9043_v62, %v9042_v22  ;;  %v9045_v54 = vpop.f32.mrb[154].mxu1 }
 0x406   : > { %v9046_v41 = vpop.f32.mrb[155].mxu1  ;;  %v8948_v6 = vpop.f32.mrb[20].mxu0 }
 0x407   : > { %v9047_v9 = vadd.f32 %v9046_v41, %v9045_v54  ;;  %v13086_v12 = vadd.f32 %v13008_v58, %v9044_v35  ;;  %v8949_v2 = vpop.f32.mrb[21].mxu0 }
 0x408   : > { %v8950_v38 = vadd.f32 %v8949_v2, %v8948_v6  ;;  %v8951_v5 = vpop.f32.mrb[22].mxu0 }
 0x409   : > { %v13089_v51 = vadd.f32 %v13011_v23, %v9047_v9  ;;  %v8952_v57 = vpop.f32.mrb[23].mxu0 }
 0x40a   : > { %v13092_v28 = vadd.f32 %v8950_v38, %v12945_v63  ;;  %v8953_v61 = vadd.f32 %v8952_v57, %v8951_v5 }
 0x40b   : > { %v9048_v56 = vpop.f32.mrb[156].mxu1 }
 0x40c   : > { %v9049_v10 = vpop.f32.mrb[157].mxu1  ;;  %v13095_v15 = vadd.f32 %v8953_v61, %v12948_v7 }
 0x40d   : > { %v9050_v60 = vadd.f32 %v9049_v10, %v9048_v56  ;;  %v9051_v24 = vpop.f32.mrb[158].mxu1 }
 0x40e   : > { %v9052_v58 = vpop.f32.mrb[159].mxu1  ;;  %v8954_v48 = vpop.f32.mrb[24].mxu0 }
 0x40f   : > { %v9053_v29 = vadd.f32 %v9052_v58, %v9051_v24  ;;  %v13098_v30 = vadd.f32 %v13014_v21, %v9050_v60  ;;  %v8955_v23 = vpop.f32.mrb[25].mxu0 }
 0x410   : > { %v8956_v45 = vadd.f32 %v8955_v23, %v8954_v48  ;;  %v8957_v42 = vpop.f32.mrb[26].mxu0 }
 0x411   : > { %v13101_v63 = vadd.f32 %v13020_v3, %v9053_v29  ;;  %v8958_v13 = vpop.f32.mrb[27].mxu0 }
 0x412   : > { %v13104_v27 = vadd.f32 %v8956_v45, %v12951_v33  ;;  %v8959_v7 = vadd.f32 %v8958_v13, %v8957_v42 }
 0x413   : > { %v9054_v36 = vpop.f32.mrb[160].mxu1 }
 0x414   : > { %v9055_v16 = vpop.f32.mrb[161].mxu1  ;;  %v9635_v8 = vadd.f32 %v8959_v7, %v12954_v44 }
 0x415   : > { %v9056_v49 = vadd.f32 %v9055_v16, %v9054_v36  ;;  %v9057_v19 = vpop.f32.mrb[162].mxu1 }
 0x416   : > { %v9058_v22 = vpop.f32.mrb[163].mxu1  ;;  %v8960_v21 = vpop.f32.mrb[28].mxu0 }
 0x417   : > { %v9059_v62 = vadd.f32 %v9058_v22, %v9057_v19  ;;  %v13108_v35 = vadd.f32 %v13032_v43, %v9056_v49  ;;  %v8961_v54 = vpop.f32.mrb[29].mxu0 }
 0x418   : > { %v8962_v3 = vadd.f32 %v8961_v54, %v8960_v21  ;;  %v8963_v41 = vpop.f32.mrb[30].mxu0 }
 0x419   : > { %v13111_v6 = vadd.f32 %v13035_v59, %v9059_v62  ;;  %v8964_v33 = vpop.f32.mrb[31].mxu0 }
 0x41a   : > { %v9626_v9 = vadd.f32 %v8962_v3, %v12957_v26  ;;  %v8965_v2 = vadd.f32 %v8964_v33, %v8963_v41 }
 0x41b   : > { %v9060_v38 = vpop.f32.mrb[164].mxu1 }
 0x41c   : > { %v9061_v44 = vpop.f32.mrb[165].mxu1  ;;  %v9632_v5 = vadd.f32 %v8965_v2, %v12960_v50 }
 0x41d   : > { %v9062_v57 = vadd.f32 %v9061_v44, %v9060_v38  ;;  %v9063_v61 = vpop.f32.mrb[166].mxu1 }
 0x41e   : > { %v9064_v56 = vpop.f32.mrb[167].mxu1 }
 0x41f   : > { %v9065_v10 = vadd.f32 %v9064_v56, %v9063_v61  ;;  %v13116_v43 = vadd.f32 %v13044_v37, %v9062_v57 }
 0x421   : > { %v13119_v60 = vadd.f32 %v13047_v47, %v9065_v10 }
 0x423   : > { %v9066_v59 = vpop.f32.mrb[168].mxu1 }
 0x424   : > { %v9067_v24 = vpop.f32.mrb[169].mxu1 }
 0x425   : > { %v9068_v58 = vadd.f32 %v9067_v24, %v9066_v59  ;;  %v9069_v48 = vpop.f32.mrb[170].mxu1 }
 0x426   : > { %v9070_v26 = vpop.f32.mrb[171].mxu1 }
 0x427   : > { %v9071_v29 = vadd.f32 %v9070_v26, %v9069_v48  ;;  %v13122_v23 = vadd.f32 %v13056_v52, %v9068_v58 }
 0x429   : > { %v13125_v50 = vadd.f32 %v13059_v18, %v9071_v29 }
 0x42b   : > { %v9072_v45 = vpop.f32.mrb[172].mxu1 }
 0x42c   : > { %v9073_v42 = vpop.f32.mrb[173].mxu1 }
 0x42d   : > { %v9074_v13 = vadd.f32 %v9073_v42, %v9072_v45  ;;  %v9075_v37 = vpop.f32.mrb[174].mxu1 }
 0x42e   : > { %v9076_v7 = vpop.f32.mrb[175].mxu1 }
 0x42f   : > { %v9077_v36 = vadd.f32 %v9076_v7, %v9075_v37  ;;  %v13128_v47 = vadd.f32 %v13068_v1, %v9074_v13  ;;  %v7334_v7 = vld [vmem:[%s10580_s15 + $0x10] sm:$0xff] }
 0x431   : > { %v13131_v16 = vadd.f32 %v13071_v39, %v9077_v36 }
 0x433   : > { %v9078_v49 = vpop.f32.mrb[176].mxu1 }
 0x434   : > { %v9079_v19 = vpop.f32.mrb[177].mxu1 }
 0x435   : > { %v9080_v22 = vadd.f32 %v9079_v19, %v9078_v49  ;;  %v9081_v52 = vpop.f32.mrb[178].mxu1 }
 0x436   : > { %v9082_v21 = vpop.f32.mrb[179].mxu1 }
 0x437   : > { %v9083_v62 = vadd.f32 %v9082_v21, %v9081_v52  ;;  %v13134_v18 = vadd.f32 %v13080_v25, %v9080_v22  ;;  %v7335_v21 = vld [vmem:[%s10580_s15 + $0x18] sm:$0xff] }
 0x439   : > { %v13137_v54 = vadd.f32 %v13083_v46, %v9083_v62 }
 0x43b   : > { %v9084_v3 = vpop.f32.mrb[180].mxu1 }
 0x43c   : > { %v9085_v41 = vpop.f32.mrb[181].mxu1 }
 0x43d   : > { %v9086_v33 = vadd.f32 %v9085_v41, %v9084_v3  ;;  %v9087_v1 = vpop.f32.mrb[182].mxu1  ;;  %v7333_v41 = vld [vmem:[%s10580_s15 + $0x8] sm:$0xff] }
 0x43e   : > { %v9088_v2 = vpop.f32.mrb[183].mxu1 }
 0x43f   : > { %v9089_v38 = vadd.f32 %v9088_v2, %v9087_v1  ;;  %v13140_v39 = vadd.f32 %v13092_v28, %v9086_v33 }
 0x441   : > { %v13143_v44 = vadd.f32 %v13095_v15, %v9089_v38 }
 0x443   : > { %v9090_v57 = vpop.f32.mrb[184].mxu1 }
 0x444   : > { %v9091_v61 = vpop.f32.mrb[185].mxu1 }
 0x445   : > { %v9092_v56 = vadd.f32 %v9091_v61, %v9090_v57  ;;  %v9093_v25 = vpop.f32.mrb[186].mxu1 }
 0x446   : > { %v9094_v10 = vpop.f32.mrb[187].mxu1 }
 0x447   : > { %v9095_v46 = vadd.f32 %v9094_v10, %v9093_v25  ;;  %v13146_v59 = vadd.f32 %v13104_v27, %v9092_v56  ;;  %v13157_v27 = vld [vmem:[%s13347_s5] ss:$0 sm:$0xff]  ;;  %v7338_v10 = vld [vmem:[%s10580_s15 + $0x30] sm:$0xff] }
 0x449   : > { %v13148_v24 = vadd.f32 %v9635_v8, %v9095_v46 }
 0x44b   : > { %v9096_v58 = vpop.f32.mrb[188].mxu1 }
 0x44c   : > { %v9097_v48 = vpop.f32.mrb[189].mxu1 }
 0x44d   : > { %v9098_v28 = vadd.f32 %v9097_v48, %v9096_v58  ;;  %v9099_v26 = vpop.f32.mrb[190].mxu1 }
 0x44e   : > { %v9100_v29 = vpop.f32.mrb[191].mxu1 }
 0x44f   : > { %v9101_v15 = vadd.f32 %v9100_v29, %v9099_v26  ;;  %v13150_v45 = vadd.f32 %v9626_v9, %v9098_v28  ;;  %v7332_v9 = vld [vmem:[%s10580_s15] sm:$0xff] }
 0x450   : > { %v7336_v28 = vld [vmem:[%s10580_s15 + $0x20] sm:$0xff] }
 0x451   : > { %v13152_v42 = vadd.f32 %v9632_v5, %v9101_v15 }
 0x453   : > { %v9384_v13 = vpop.f32.mrb[96].mxu1 }
 0x454   : > { %v9544_v8 = vadd.f32 %v13026_v4, %v9384_v13  ;;  %v7134_v37 = vpop.f32.mrb[97].mxu1 }
 0x455   : > { %v9547_v36 = vadd.f32 %v13017_v32, %v7134_v37  ;;  %v9385_v49 = vpop.f32.mrb[98].mxu1  ;;  %v7337_v37 = vld [vmem:[%s10580_s15 + $0x28] sm:$0xff] }
 0x456   : > { %v7302_v19 = vadd.f32 %v9544_v8, %v13157_v27  ;;  %v9550_v5 = vadd.f32 %v13029_v11, %v9385_v49  ;;  %v7137_v22 = vpop.f32.mrb[99].mxu1 }
 0x457   : > { %v7300_v52 = vadd.f32 %v9547_v36, %v13157_v27  ;;  %v9553_v62 = vadd.f32 %v13023_v17, %v7137_v22 }
 0x458   : > { %v7366_v3 = vadd.f32 %v7334_v7, %v7302_v19  ;;  %v7303_v4 = vadd.f32 %v9550_v5, %v13157_v27 }
 0x459   : > { %v7364_v33 = vadd.f32 %v7332_v9, %v7300_v52  ;;  %v7301_v32 = vadd.f32 %v9553_v62, %v13157_v27  ;;  %v7342_v62 = vld [vmem:[%s10580_s15 + $0x50] sm:$0xff] }
 0x45a   : > { %v7398_v1 = vmax.f32 %v7366_v3, 0.0  ;;  %v7367_v2 = vadd.f32 %v7335_v21, %v7303_v4 }
 0x45b   : > { %v7396_v38 = vmax.f32 %v7364_v33, 0.0  ;;  %v7365_v57 = vadd.f32 %v7333_v41, %v7301_v32  ;;  %v9388_v11 = vpop.f32.mrb[100].mxu1  ;;  %v7340_v33 = vld [vmem:[%s10580_s15 + $0x40] sm:$0xff] }
 0x45c   : > { %7430 = vst [vmem:[%s13173_s7 + $0x10] sm:$0xff] %v7398_v1  ;;  %v7399_v17 = vmax.f32 %v7367_v2, 0.0  ;;  %v9556_v61 = vadd.f32 %v13050_v34, %v9388_v11  ;;  %v7150_v56 = vpop.f32.mrb[101].mxu1  ;;  %v7339_v34 = vld [vmem:[%s10580_s15 + $0x38] sm:$0xff]  ;;  %v7341_v11 = vld [vmem:[%s10580_s15 + $0x48] sm:$0xff] }
 0x45d   : > { %7428 = vst [vmem:[%s13173_s7] sm:$0xff] %v7396_v38  ;;  %v7397_v25 = vmax.f32 %v7365_v57, 0.0  ;;  %v9559_v46 = vadd.f32 %v13038_v14, %v7150_v56  ;;  %v9389_v58 = vpop.f32.mrb[102].mxu1 }
 0x45e   : > { %7431 = vst [vmem:[%s13173_s7 + $0x18] sm:$0xff] %v7399_v17  ;;  %v7306_v48 = vadd.f32 %v9556_v61, %v13157_v27  ;;  %v9562_v26 = vadd.f32 %v13053_v20, %v9389_v58  ;;  %v7153_v29 = vpop.f32.mrb[103].mxu1 }
 0x45f   : > { %7429 = vst [vmem:[%s13173_s7 + $0x8] sm:$0xff] %v7397_v25  ;;  %v7304_v15 = vadd.f32 %v9559_v46, %v13157_v27  ;;  %v9565_v13 = vadd.f32 %v13041_v55, %v7153_v29 }
 0x460   : > { %v7370_v8 = vadd.f32 %v7338_v10, %v7306_v48  ;;  %v7307_v14 = vadd.f32 %v9562_v26, %v13157_v27  ;;  %v7346_v26 = vld [vmem:[%s10580_s15 + $0x70] sm:$0xff] }
 0x461   : > { %v7368_v7 = vadd.f32 %v7336_v28, %v7304_v15  ;;  %v7305_v36 = vadd.f32 %v9565_v13, %v13157_v27  ;;  %v7344_v13 = vld [vmem:[%s10580_s15 + $0x60] sm:$0xff] }
 0x462   : > { %v7402_v49 = vmax.f32 %v7370_v8, 0.0  ;;  %v7371_v20 = vadd.f32 %v7339_v34, %v7307_v14 }
 0x463   : > { %v7400_v19 = vmax.f32 %v7368_v7, 0.0  ;;  %v7369_v9 = vadd.f32 %v7337_v37, %v7305_v36  ;;  %v9392_v5 = vpop.f32.mrb[104].mxu1 }
 0x464   : > { %7434 = vst [vmem:[%s13173_s7 + $0x30] sm:$0xff] %v7402_v49  ;;  %v7403_v22 = vmax.f32 %v7371_v20, 0.0  ;;  %v9568_v55 = vadd.f32 %v13074_v53, %v9392_v5  ;;  %v7166_v52 = vpop.f32.mrb[105].mxu1  ;;  %v7343_v53 = vld [vmem:[%s10580_s15 + $0x58] sm:$0xff]  ;;  %v7345_v49 = vld [vmem:[%s10580_s15 + $0x68] sm:$0xff] }
 0x465   : > { %7432 = vst [vmem:[%s13173_s7 + $0x20] sm:$0xff] %v7400_v19  ;;  %v7401_v21 = vmax.f32 %v7369_v9, 0.0  ;;  %v9571_v3 = vadd.f32 %v13062_v31, %v7166_v52  ;;  %v9393_v4 = vpop.f32.mrb[106].mxu1 }
 0x466   : > { %7435 = vst [vmem:[%s13173_s7 + $0x38] sm:$0xff] %v7403_v22  ;;  %v7310_v41 = vadd.f32 %v9568_v55, %v13157_v27  ;;  %v9574_v32 = vadd.f32 %v13077_v40, %v9393_v4  ;;  %v7169_v1 = vpop.f32.mrb[107].mxu1 }
 0x467   : > { %7433 = vst [vmem:[%s13173_s7 + $0x28] sm:$0xff] %v7401_v21  ;;  %v7308_v2 = vadd.f32 %v9571_v3, %v13157_v27  ;;  %v9577_v38 = vadd.f32 %v13065_v0, %v7169_v1  ;;  %v7350_v3 = vld [vmem:[%s10580_s15 + $0x90] sm:$0xff] }
 0x468   : > { %v7374_v57 = vadd.f32 %v7342_v62, %v7310_v41  ;;  %v7311_v31 = vadd.f32 %v9574_v32, %v13157_v27  ;;  %v7348_v32 = vld [vmem:[%s10580_s15 + $0x80] sm:$0xff] }
 0x469   : > { %v7372_v17 = vadd.f32 %v7340_v33, %v7308_v2  ;;  %v7309_v61 = vadd.f32 %v9577_v38, %v13157_v27 }
 0x46a   : > { %v7406_v56 = vmax.f32 %v7374_v57, 0.0  ;;  %v7375_v40 = vadd.f32 %v7343_v53, %v7311_v31  ;;  %v7349_v31 = vld [vmem:[%s10580_s15 + $0x88] sm:$0xff] }
 0x46b   : > { %v7404_v25 = vmax.f32 %v7372_v17, 0.0  ;;  %v7373_v10 = vadd.f32 %v7341_v11, %v7309_v61  ;;  %v9396_v46 = vpop.f32.mrb[108].mxu1 }
 0x46c   : > { %7438 = vst [vmem:[%s13173_s7 + $0x50] sm:$0xff] %v7406_v56  ;;  %v7407_v58 = vmax.f32 %v7375_v40, 0.0  ;;  %v9580_v0 = vadd.f32 %v13098_v30, %v9396_v46  ;;  %v7182_v48 = vpop.f32.mrb[109].mxu1  ;;  %v7347_v30 = vld [vmem:[%s10580_s15 + $0x78] sm:$0xff] }
 0x46d   : > { %7436 = vst [vmem:[%s13173_s7 + $0x40] sm:$0xff] %v7404_v25  ;;  %v7405_v28 = vmax.f32 %v7373_v10, 0.0  ;;  %v9583_v29 = vadd.f32 %v13086_v12, %v7182_v48  ;;  %v9397_v15 = vpop.f32.mrb[110].mxu1 }
 0x46e   : > { %7439 = vst [vmem:[%s13173_s7 + $0x58] sm:$0xff] %v7407_v58  ;;  %v7314_v34 = vadd.f32 %v9580_v0, %v13157_v27  ;;  %v9586_v8 = vadd.f32 %v13101_v63, %v9397_v15  ;;  %v7185_v14 = vpop.f32.mrb[111].mxu1  ;;  %v7354_v0 = vld [vmem:[%s10580_s15 + $0xb0] sm:$0xff] }
 0x46f   : > { %7437 = vst [vmem:[%s13173_s7 + $0x48] sm:$0xff] %v7405_v28  ;;  %v7312_v37 = vadd.f32 %v9583_v29, %v13157_v27  ;;  %v9589_v7 = vadd.f32 %v13089_v51, %v7185_v14  ;;  %v7352_v29 = vld [vmem:[%s10580_s15 + $0xa0] sm:$0xff] }
 0x470   : > { %v7378_v36 = vadd.f32 %v7346_v26, %v7314_v34  ;;  %v7315_v12 = vadd.f32 %v9586_v8, %v13157_v27 }
 0x471   : > { %v7376_v20 = vadd.f32 %v7344_v13, %v7312_v37  ;;  %v7313_v19 = vadd.f32 %v9589_v7, %v13157_v27  ;;  %v7353_v37 = vld [vmem:[%s10580_s15 + $0xa8] sm:$0xff] }
 0x472   : > { %v7410_v9 = vmax.f32 %v7378_v36, 0.0  ;;  %v7379_v63 = vadd.f32 %v7347_v30, %v7315_v12 }
 0x473   : > { %v7408_v5 = vmax.f32 %v7376_v20, 0.0  ;;  %v7377_v22 = vadd.f32 %v7345_v49, %v7313_v19  ;;  %v9400_v55 = vpop.f32.mrb[112].mxu1 }
 0x474   : > { %7442 = vst [vmem:[%s13173_s7 + $0x70] sm:$0xff] %v7410_v9  ;;  %v7411_v52 = vmax.f32 %v7379_v63, 0.0  ;;  %v9592_v51 = vadd.f32 %v13116_v43, %v9400_v55  ;;  %v7198_v21 = vpop.f32.mrb[113].mxu1  ;;  %v7351_v43 = vld [vmem:[%s10580_s15 + $0x98] sm:$0xff] }
 0x475   : > { %7440 = vst [vmem:[%s13173_s7 + $0x60] sm:$0xff] %v7408_v5  ;;  %v7409_v62 = vmax.f32 %v7377_v22, 0.0  ;;  %v9595_v4 = vadd.f32 %v13108_v35, %v7198_v21  ;;  %v9401_v41 = vpop.f32.mrb[114].mxu1  ;;  %v7358_v5 = vld [vmem:[%s10580_s15 + $0xd0] sm:$0xff] }
 0x476   : > { %7443 = vst [vmem:[%s13173_s7 + $0x78] sm:$0xff] %v7411_v52  ;;  %v7318_v33 = vadd.f32 %v9592_v51, %v13157_v27  ;;  %v9598_v1 = vadd.f32 %v13119_v60, %v9401_v41  ;;  %v7201_v2 = vpop.f32.mrb[115].mxu1  ;;  %v7356_v51 = vld [vmem:[%s10580_s15 + $0xc0] sm:$0xff] }
 0x477   : > { %7441 = vst [vmem:[%s13173_s7 + $0x68] sm:$0xff] %v7409_v62  ;;  %v7316_v53 = vadd.f32 %v9595_v4, %v13157_v27  ;;  %v9601_v38 = vadd.f32 %v13111_v6, %v7201_v2 }
 0x478   : > { %v7382_v57 = vadd.f32 %v7350_v3, %v7318_v33  ;;  %v7319_v35 = vadd.f32 %v9598_v1, %v13157_v27  ;;  %v7357_v33 = vld [vmem:[%s10580_s15 + $0xc8] sm:$0xff] }
 0x479   : > { %v7380_v11 = vadd.f32 %v7348_v32, %v7316_v53  ;;  %v7317_v17 = vadd.f32 %v9601_v38, %v13157_v27 }
 0x47a   : > { %v7414_v61 = vmax.f32 %v7382_v57, 0.0  ;;  %v7383_v60 = vadd.f32 %v7351_v43, %v7319_v35 }
 0x47b   : > { %v7412_v56 = vmax.f32 %v7380_v11, 0.0  ;;  %v7381_v40 = vadd.f32 %v7349_v31, %v7317_v17  ;;  %v9404_v25 = vpop.f32.mrb[116].mxu1  ;;  %v7362_v11 = vld [vmem:[%s10580_s15 + $0xf0] sm:$0xff] }
 0x47c   : > { %7446 = vst [vmem:[%s13173_s7 + $0x90] sm:$0xff] %v7414_v61  ;;  %v7415_v10 = vmax.f32 %v7383_v60, 0.0  ;;  %v9604_v6 = vadd.f32 %v13128_v47, %v9404_v25  ;;  %v7214_v46 = vpop.f32.mrb[117].mxu1  ;;  %v7355_v47 = vld [vmem:[%s10580_s15 + $0xb8] sm:$0xff] }
 0x47d   : > { %7444 = vst [vmem:[%s13173_s7 + $0x80] sm:$0xff] %v7412_v56  ;;  %v7413_v58 = vmax.f32 %v7381_v40, 0.0  ;;  %v9607_v48 = vadd.f32 %v13122_v23, %v7214_v46  ;;  %v9405_v28 = vpop.f32.mrb[118].mxu1  ;;  %v7360_v56 = vld [vmem:[%s10580_s15 + $0xe0] sm:$0xff] }
 0x47e   : > { %7447 = vst [vmem:[%s13173_s7 + $0x98] sm:$0xff] %v7415_v10  ;;  %v7322_v26 = vadd.f32 %v9604_v6, %v13157_v27  ;;  %v9610_v15 = vadd.f32 %v13131_v16, %v9405_v28  ;;  %v7217_v34 = vpop.f32.mrb[119].mxu1  ;;  %v7363_v10 = vld [vmem:[%s10580_s15 + $0xf8] sm:$0xff] }
 0x47f   : > { %7445 = vst [vmem:[%s13173_s7 + $0x88] sm:$0xff] %v7413_v58  ;;  %v7320_v13 = vadd.f32 %v9607_v48, %v13157_v27  ;;  %v9613_v8 = vadd.f32 %v13125_v50, %v7217_v34  ;;  %v7361_v58 = vld [vmem:[%s10580_s15 + $0xe8] sm:$0xff] }
 0x480   : > { %v7386_v14 = vadd.f32 %v7354_v0, %v7322_v26  ;;  %v7323_v23 = vadd.f32 %v9610_v15, %v13157_v27 }
 0x481   : > { %v7384_v30 = vadd.f32 %v7352_v29, %v7320_v13  ;;  %v7321_v7 = vadd.f32 %v9613_v8, %v13157_v27 }
 0x482   : > { %v7418_v36 = vmax.f32 %v7386_v14, 0.0  ;;  %v7387_v16 = vadd.f32 %v7355_v47, %v7323_v23 }
 0x483   : > { %v7416_v12 = vmax.f32 %v7384_v30, 0.0  ;;  %v7385_v49 = vadd.f32 %v7353_v37, %v7321_v7  ;;  %v9408_v20 = vpop.f32.mrb[120].mxu1 }
 0x484   : > { %7450 = vst [vmem:[%s13173_s7 + $0xb0] sm:$0xff] %v7418_v36  ;;  %v7419_v19 = vmax.f32 %v7387_v16, 0.0  ;;  %v9616_v50 = vadd.f32 %v13140_v39, %v9408_v20  ;;  %v7230_v9 = vpop.f32.mrb[121].mxu1  ;;  %v7359_v39 = vld [vmem:[%s10580_s15 + $0xd8] sm:$0xff]  ;;  %s10318_s15 = scalar_lea.vmem %s13295_s26, 4096 }
 0x485   : > { %7448 = vst [vmem:[%s13173_s7 + $0xa0] sm:$0xff] %v7416_v12  ;;  %v7417_v63 = vmax.f32 %v7385_v49, 0.0  ;;  %v9619_v22 = vadd.f32 %v13134_v18, %v7230_v9  ;;  %v9409_v55 = vpop.f32.mrb[122].mxu1  ;;  %p10319_p6 = scmp.ne.s32.totalorder %s13295_s26, %s10318_s15  ;;  %p10326_p3 = scmp.lt.s32.totalorder %s10324_s19, %s10318_s15 }
 0x486   : > { %7451 = vst [vmem:[%s13173_s7 + $0xb8] sm:$0xff] %v7419_v19  ;;  %v7326_v52 = vadd.f32 %v9616_v50, %v13157_v27  ;;  %v9622_v21 = vadd.f32 %v13143_v44, %v9409_v55  ;;  %v7233_v62 = vpop.f32.mrb[123].mxu1 }
 0x487   : > { %7449 = vst [vmem:[%s13173_s7 + $0xa8] sm:$0xff] %v7417_v63  ;;  %v7324_v3 = vadd.f32 %v9619_v22, %v13157_v27  ;;  %v9625_v4 = vadd.f32 %v13137_v54, %v7233_v62  ;;  %p10320_p8 = pnand %p10319_p6, %p10526_p12  ;;  %p10327_p7 = por %p10326_p3, %p10325_p13 }
 0x488   : > { %v7390_v41 = vadd.f32 %v7358_v5, %v7326_v52  ;;  %v7327_v18 = vadd.f32 %v9622_v21, %v13157_v27 }
 0x489   : > { %v7388_v32 = vadd.f32 %v7356_v51, %v7324_v3  ;;  %v7325_v1 = vadd.f32 %v9625_v4, %v13157_v27  ;;  %p10321_p10 = pneg %p10320_p8 }
 0x48a   : > { %v7422_v2 = vmax.f32 %v7390_v41, 0.0  ;;  %v7391_v44 = vadd.f32 %v7359_v39, %v7327_v18 }
 0x48b   : > { %v7420_v53 = vmax.f32 %v7388_v32, 0.0  ;;  %v7389_v43 = vadd.f32 %v7357_v33, %v7325_v1  ;;  %v9412_v38 = vpop.f32.mrb[124].mxu1  ;;  %p10328_p9 = pnand %p10327_p7, %p10321_p10 }
 0x48c   : > { %7454 = vst [vmem:[%s13173_s7 + $0xd0] sm:$0xff] %v7422_v2  ;;  %v7423_v57 = vmax.f32 %v7391_v44, 0.0  ;;  %v9628_v54 = vadd.f32 %v13150_v45, %v9412_v38  ;;  %v7246_v35 = vpop.f32.mrb[125].mxu1 }
 0x48d   : > { %7452 = vst [vmem:[%s13173_s7 + $0xc0] sm:$0xff] %v7420_v53  ;;  %v7421_v31 = vmax.f32 %v7389_v43, 0.0  ;;  %v9631_v17 = vadd.f32 %v13146_v59, %v7246_v35  ;;  %v9413_v61 = vpop.f32.mrb[126].mxu1 }
 0x48e   : > { %7455 = vst [vmem:[%s13173_s7 + $0xd8] sm:$0xff] %v7423_v57  ;;  %v7330_v60 = vadd.f32 %v9628_v54, %v13157_v27  ;;  %v9634_v40 = vadd.f32 %v13152_v42, %v9413_v61  ;;  %v7249_v25 = vpop.f32.mrb[127].mxu1 }
 0x48f   : > { %7453 = vst [vmem:[%s13173_s7 + $0xc8] sm:$0xff] %v7421_v31  ;;  %v7328_v45 = vadd.f32 %v9631_v17, %v13157_v27  ;;  %v9637_v6 = vadd.f32 %v13148_v24, %v7249_v25 }
 0x490   : > { %v7394_v46 = vadd.f32 %v7362_v11, %v7330_v60  ;;  %v7331_v59 = vadd.f32 %v9634_v40, %v13157_v27 }
 0x491   : > { %v7392_v0 = vadd.f32 %v7360_v56, %v7328_v45  ;;  %v7329_v48 = vadd.f32 %v9637_v6, %v13157_v27 }
 0x492   : > { %v7426_v42 = vmax.f32 %v7394_v46, 0.0  ;;  %v7395_v28 = vadd.f32 %v7363_v10, %v7331_v59 }
 0x493   : > { %v7424_v26 = vmax.f32 %v7392_v0, 0.0  ;;  %v7393_v29 = vadd.f32 %v7361_v58, %v7329_v48 }
 0x494   : > { %7458 = vst [vmem:[%s13173_s7 + $0xf0] sm:$0xff] %v7426_v42  ;;  %v7427_v24 = vmax.f32 %v7395_v28, 0.0 }
 0x495   : > { %7456 = vst [vmem:[%s13173_s7 + $0xe0] sm:$0xff] %v7424_v26  ;;  %v7425_v27 = vmax.f32 %v7393_v29, 0.0 }
 0x496   : > { %7459 = vst [vmem:[%s13173_s7 + $0xf8] sm:$0xff] %v7427_v24 }
 0x497   : > { %7457 = vst [vmem:[%s13173_s7 + $0xe8] sm:$0xff] %v7425_v27 }
 0x498   : > { %10331 = shalt.err (!%p10328_p9)
}
 0x499   : > { %s10332_s10 = scalar_lea.hbm %s13293_s8, 4096  ;;  %s10336_s27 = scalar_lea.hbm %s13348_s6, 8192 }
 0x49a   : > { %p10333_p2 = scmp.ne.s32.totalorder %s13293_s8, %s10332_s10  ;;  %p10337_p11 = scmp.lt.u32.totalorder %s13293_s8, %s13348_s6 }
 0x49b   : > { %p10338_p1 = scmp.lt.u32.totalorder %s10336_s27, %s10332_s10  ;;  %p10340_p6 = scmp.lt.u32.totalorder %s10332_s10, %s13293_s8 }
 0x49c   : > { %p10334_p0 = pnand %p10333_p2, %p10526_p12 }
 0x49d   : > { %p10339_p4 = por %p10338_p1, %p10337_p11 }
 0x49e   : > { %p10335_p5 = pneg %p10334_p0 }
 0x49f   : > { %p10341_p8 = por %p10340_p6, %p10339_p4 }
 0x4a1   : > { %p10342_p10 = pnand %p10341_p8, %p10335_p5 }
 0x4a3   : > { %10345 = shalt.err (!%p10342_p10)
}
 0x4a4   : > { %s10398_s12 = smov 128   ;;  %s10399_s18 = smov 8  }
 0x4a5   : > { %9741 = dma.vmem_to_hbm [thread:$0]  (%p10526_p12), %s13295_s26, 4096, %s13293_s8, %s7461_s25, %s10398_s12, %s10398_s12, %s10399_s18  }
 0x4a6 PF: > { %s7489_s15 = sand.u32 1, %s10376_s21   ;;  %p13451_p13 = scmp.ne.s32.totalorder %s13359_s28, 0 }
 0x4a7   : > { %p13452_p3 = scmp.ge.s32.totalorder %s10388_s24, 2  ;;  %s7490_s29 = scalar_lea.sflag [#allocation5], %s7489_s15 }
 0x4a9   : > { %p9752_p7 = pnand %p13452_p3, %p13451_p13 }
 0x4ab   : > { %10371 = dma.done.wait (!%p9752_p7), %s7490_s29, 4096  }
 0x4ac   : > { %10373 = vsyncadd (!%p9752_p7), %s7490_s29, 4294963200  ;;  %p20_p9 = scmp.ge.s32.totalorder %s10491_s9, 4   ;;  %s13453_s21 = smov %s10380_s22 }
 0x4ad   : > { %s13454_s22 = smov %s10384_s23  ;;  %s13455_s23 = smov %s10522_s13 }
 0x4ae   : > { %s13456_s24 = smov %s10491_s9  ;;  %22 = sbr.rel (!%p20_p9) target bundleno = 6 (0x6), region = 104 }
 0x4b5   :  { %7495 = vsyncpa [#allocation4], 1 }
 0x4b6   :  { %7497 = vsyncpa [#allocation4 + $0x1], 1 }
 0x4b7   :  { %7498 = vsyncpa [#allocation7], 1 }
 0x4b8   :  { %7499 = vsyncpa [#allocation5], 1 }
 0x4b9   :  { %7501 = vsyncpa [#allocation5 + $0x1], 1 }

</bundles_post_ra>
